<compile_context>
chip_gen: v7x
topology: tpu7x:2x2x1
jax: 0.10.0
libtpu: 0.0.40
codegen_flags: <defaults>
</compile_context>

<pallas_src>
import jax
import jax.numpy as jnp
from jax.experimental import pallas as pl
from jax.experimental.pallas import tpu as pltpu


def _round_up(x, m):
    return ((x + m - 1) // m) * m


def _vmem_capacity_bytes():
    try:
        return int(pltpu.get_tpu_info().vmem_capacity_bytes)
    except Exception:
        return 64 * 1024 * 1024  # conservative default (v7x per-TC VMEM)


def _has_megacore():
    """True when the row grid can be sharded across >1 TensorCore per chip."""
    try:
        info = pltpu.get_tpu_info()
        for attr in ("num_cores", "core_count", "num_tensorcores"):
            val = getattr(info, attr, None)
            if val is not None:
                return int(val) > 1
    except Exception:
        pass
    try:
        kind = jax.devices()[0].device_kind.lower()
        return ("v4" in kind) or ("7" in kind)
    except Exception:
        return False


def _fused_head_kernel(xv_ref, xm_ref,
                       wv_ref, pv_ref,
                       wm_ref, pm_ref,
                       wf_ref, pf_ref,
                       o_ref):
    """Fused twostream feature head over one tile of rows.

    xv_ref: (TM, Dv) bf16      xm_ref: (TM, Dm) bf16
    wv_ref: (Dv, D)  bf16      pv_ref: (3, D) f32  rows = [bias; gamma; beta]
    wm_ref: (Dm, D)  bf16      pm_ref: (3, D) f32
    wf_ref: (2D, D)  bf16      pf_ref: (3, D) f32
    o_ref:  (TM, D)  output dtype
    """

    def ln_relu(y, p_ref):
        # y is the f32 MXU accumulator.  LayerNorm over last dim (eps=1e-5,
        # biased variance, as nn.LayerNorm), then ReLU.  All math stays f32.
        b = p_ref[0:1, :]
        g = p_ref[1:2, :]
        beta = p_ref[2:3, :]
        y = y + b
        mean = jnp.mean(y, axis=-1, keepdims=True)
        var = jnp.mean(jnp.square(y - mean), axis=-1, keepdims=True)
        scale = g * jax.lax.rsqrt(var + 1e-5)        # fold gamma into the scale
        return jnp.maximum((y - mean) * scale + beta, 0.0)

    cdt = wf_ref.dtype                               # bf16 compute dtype

    # Stages 1 & 2: per-stream Linear + LayerNorm + ReLU (stay in VMEM/vregs).
    v = ln_relu(jnp.dot(xv_ref[...], wv_ref[...],
                        preferred_element_type=jnp.float32), pv_ref)
    m = ln_relu(jnp.dot(xm_ref[...], wm_ref[...],
                        preferred_element_type=jnp.float32), pm_ref)

    # Stage 3: lane-concat [v | m] (cheap) and one K=2*D dot against unsplit Wf.
    f = jnp.concatenate([v.astype(cdt), m.astype(cdt)], axis=-1)
    yf = jnp.dot(f, wf_ref[...], preferred_element_type=jnp.float32)
    o_ref[...] = ln_relu(yf, pf_ref).astype(o_ref.dtype)


def _choose_tile_rows(n, d_v, d_m, d_out, in_itemsize, out_itemsize, w_itemsize,
                      max_rows, vmem_budget_bytes, megacore):
    """Largest row tile that fits the VMEM budget.

    Weights/params are single-buffered (pl.Buffered(1)); activation tiles are
    double-buffered; rough f32 intermediate working set included.
    """
    n8 = _round_up(max(n, 8), 8)
    tm = min(_round_up(max_rows, 8), n8)
    # Forcing >= 2 grid steps only helps megacore sharding; skip it on 1-TC chips.
    if megacore and n8 >= 16 and n8 // tm < 2:
        tm = _round_up(max(n8 // 2, 8), 8)
    fixed = w_itemsize * (d_v + d_m + 2 * d_out) * d_out + 3 * (3 * d_out) * 4
    while tm > 8:
        act = 2 * tm * (in_itemsize * (d_v + d_m) + out_itemsize * d_out)
        scratch = 4 * tm * 5 * d_out          # rough: y/v/m/f/yf f32 live values
        if fixed + act + scratch <= vmem_budget_bytes:
            break
        tm = max(8, _round_up(tm // 2, 8))
    return tm


def prepare_params(params, compute_dtype=jnp.bfloat16):
    """One-time parameter packing/casting, hoisted out of the per-call hot path."""
    def prep(p):
        return {
            "w": p["w"].astype(compute_dtype),
            "p": jnp.stack([p["b"], p["gamma"], p["beta"]],
                           axis=0).astype(jnp.float32),
        }
    return {k: prep(params[k]) for k in ("visual", "motion", "fusion")}


def base_feature_head_forward(visual_input, motion_input, prepared_params,
                              *, max_tile_rows=256):
    """visual/motion: (B, T, C) channels-last -> (B, T, d_model)."""
    b, t, d_v = visual_input.shape
    d_m = motion_input.shape[-1]

    wv = prepared_params["visual"]["w"]
    wm = prepared_params["motion"]["w"]
    wf = prepared_params["fusion"]["w"]          # (2*d_out, d_out), unsplit
    pv = prepared_params["visual"]["p"]
    pm = prepared_params["motion"]["p"]
    pf = prepared_params["fusion"]["p"]
    d_out = wv.shape[1]
    cdt = wv.dtype
    n = b * t

    xv = visual_input.reshape(n, d_v).astype(cdt)   # bf16: half the input DMA
    xm = motion_input.reshape(n, d_m).astype(cdt)

    vmem_cap = _vmem_capacity_bytes()
    vmem_budget = int(vmem_cap * 0.55)
    vmem_limit = int(vmem_cap * 0.70)

    tm = _choose_tile_rows(
        n, d_v, d_m, d_out,
        in_itemsize=jnp.dtype(cdt).itemsize,
        out_itemsize=jnp.dtype(visual_input.dtype).itemsize,
        w_itemsize=jnp.dtype(cdt).itemsize,
        max_rows=max_tile_rows,
        vmem_budget_bytes=vmem_budget,
        megacore=_has_megacore())

    grid = (pl.cdiv(n, tm),)   # Pallas masks the trailing partial row block.

    inv = pl.Buffered(1)       # grid-invariant operands: DMA once, single buffer

    # TODO(synk): for production d_in (1024-2048+) on v7x (64 MiB VMEM), add a
    # K grid axis marked "arbitrary" with f32 VMEM accumulators for v/m instead
    # of full-K weight blocks, so tm can stay large while K is streamed.

    out = pl.pallas_call(
        _fused_head_kernel,
        out_shape=jax.ShapeDtypeStruct((n, d_out), visual_input.dtype),
        grid_spec=pltpu.PrefetchScalarGridSpec(
            num_scalar_prefetch=0,
            grid=grid,
            in_specs=[
                pl.BlockSpec((tm, d_v), lambda i: (i, 0)),
                pl.BlockSpec((tm, d_m), lambda i: (i, 0)),
                pl.BlockSpec((d_v, d_out), lambda i: (0, 0), pipeline_mode=inv),
                pl.BlockSpec((3, d_out), lambda i: (0, 0), pipeline_mode=inv),
                pl.BlockSpec((d_m, d_out), lambda i: (0, 0), pipeline_mode=inv),
                pl.BlockSpec((3, d_out), lambda i: (0, 0), pipeline_mode=inv),
                pl.BlockSpec((2 * d_out, d_out), lambda i: (0, 0), pipeline_mode=inv),
                pl.BlockSpec((3, d_out), lambda i: (0, 0), pipeline_mode=inv),
            ],
            out_specs=pl.BlockSpec((tm, d_out), lambda i: (i, 0)),
        ),
        compiler_params=pltpu.CompilerParams(
            dimension_semantics=("parallel",),
            vmem_limit_bytes=vmem_limit,
        ),
    )(xv, xm, wv, pv, wm, pm, wf, pf)

    return out.reshape(b, t, d_out)


def init_linear_params(key, d_in, d_out, dtype=jnp.float32):
    """Mimics nn.Linear default init (uniform +-1/sqrt(fan_in)); LN gamma=1, beta=0."""
    kw, kb = jax.random.split(key)
    bound = 1.0 / (d_in ** 0.5)
    return {
        "w": jax.random.uniform(kw, (d_in, d_out), dtype, -bound, bound),
        "b": jax.random.uniform(kb, (d_out,), dtype, -bound, bound),
        "gamma": jnp.ones((d_out,), dtype),
        "beta": jnp.zeros((d_out,), dtype),
    }


def init_params(key, visual_size, motion_size, d_model, dtype=jnp.float32):
    kv, km, kf = jax.random.split(key, 3)
    return {
        "visual": init_linear_params(kv, visual_size, d_model, dtype),
        "motion": init_linear_params(km, motion_size, d_model, dtype),
        "fusion": init_linear_params(kf, 2 * d_model, d_model, dtype),
    }


def _ln_relu_ref(y, p):
    y = y + p[0]
    mean = jnp.mean(y, axis=-1, keepdims=True)
    var = jnp.mean(jnp.square(y - mean), axis=-1, keepdims=True)
    y = (y - mean) * (p[1] * jax.lax.rsqrt(var + 1e-5)) + p[2]
    return jnp.maximum(y, 0.0)


def _reference_forward_matched(visual_input, motion_input, prepared):
    """Pure-JAX reference mirroring the kernel's bf16-operand / f32-accum path."""
    cdt = prepared["visual"]["w"].dtype
    v = _ln_relu_ref(jnp.dot(visual_input.astype(cdt), prepared["visual"]["w"],
                             preferred_element_type=jnp.float32),
                     prepared["visual"]["p"])
    m = _ln_relu_ref(jnp.dot(motion_input.astype(cdt), prepared["motion"]["w"],
                             preferred_element_type=jnp.float32),
                     prepared["motion"]["p"])
    f = jnp.concatenate([v.astype(cdt), m.astype(cdt)], axis=-1)
    y = jnp.dot(f, prepared["fusion"]["w"], preferred_element_type=jnp.float32)
    return _ln_relu_ref(y, prepared["fusion"]["p"])


def _reference_forward_f32(visual_input, motion_input, params):
    """Full-f32 reference of the original PyTorch forward (loose sanity check)."""
    def block(x, p):
        y = x @ p["w"] + p["b"]
        mean = jnp.mean(y, axis=-1, keepdims=True)
        var = jnp.mean(jnp.square(y - mean), axis=-1, keepdims=True)
        y = (y - mean) / jnp.sqrt(var + 1e-5)
        return jnp.maximum(y * p["gamma"] + p["beta"], 0.0)

    v = block(visual_input, params["visual"])
    m = block(motion_input, params["motion"])
    return block(jnp.concatenate([v, m], axis=-1), params["fusion"])


if __name__ == "__main__":
    key = jax.random.PRNGKey(0)
    k_params, k_v, k_m = jax.random.split(key, 3)

    # Small, module-consistent shapes; T chosen so B*T = 320 does NOT divide the
    # row tile -> exercises the masked trailing partial block (no padding path).
    B, T = 2, 160
    VISUAL_SIZE, MOTION_SIZE, D_MODEL = 256, 256, 128

    params = init_params(k_params, VISUAL_SIZE, MOTION_SIZE, D_MODEL)
    prepared = prepare_params(params)            # one-time packing / bf16 cast

    visual_input = jax.random.normal(k_v, (B, T, VISUAL_SIZE), jnp.float32)
    motion_input = jax.random.normal(k_m, (B, T, MOTION_SIZE), jnp.float32)

    fwd = jax.jit(base_feature_head_forward)
    out = jax.block_until_ready(fwd(visual_input, motion_input, prepared))
    assert out.shape == (B, T, D_MODEL), out.shape
    assert bool(jnp.all(jnp.isfinite(out)))

    # Tight check vs. a reference that uses the same bf16-operand compute path.
    ref_matched = _reference_forward_matched(visual_input, motion_input, prepared)
    err_matched = float(jnp.max(jnp.abs(out - ref_matched)))
    assert err_matched < 2e-3, err_matched

    # Loose sanity check vs. the pure-f32 PyTorch-equivalent forward.
    ref_f32 = _reference_forward_f32(visual_input, motion_input, params)
    err_f32 = float(jnp.max(jnp.abs(out - ref_f32)))
    assert err_f32 < 1.5e-1, err_f32

    print("KERNEL_OK")
</pallas_src>

<mosaic_0001>
module attributes {stable_mosaic.version = 11 : i64} {
  func.func @_fused_head_kernel(%arg0: i32, %arg1: memref<256x256xbf16, #tpu.memory_space<vmem>>, %arg2: memref<256x256xbf16, #tpu.memory_space<vmem>>, %arg3: memref<256x128xbf16, #tpu.memory_space<vmem>>, %arg4: memref<3x128xf32, #tpu.memory_space<vmem>>, %arg5: memref<256x128xbf16, #tpu.memory_space<vmem>>, %arg6: memref<3x128xf32, #tpu.memory_space<vmem>>, %arg7: memref<256x128xbf16, #tpu.memory_space<vmem>>, %arg8: memref<3x128xf32, #tpu.memory_space<vmem>>, %arg9: memref<256x128xf32, #tpu.memory_space<vmem>>) attributes {dimension_semantics = [#tpu.dimension_semantics<parallel>], iteration_bounds = array<i64: 2>, scalar_prefetch = 0 : i64, scratch_operands = 0 : i64, tpu.core_type = #tpu.core_type<tc>, window_params = [{transform_indices = @transform_0, window_bounds = array<i64: 256, 256>}, {transform_indices = @transform_1, window_bounds = array<i64: 256, 256>}, {pipeline_mode = #tpu.pipeline_mode<synchronous>, transform_indices = @transform_2, window_bounds = array<i64: 256, 128>}, {pipeline_mode = #tpu.pipeline_mode<synchronous>, transform_indices = @transform_3, window_bounds = array<i64: 3, 128>}, {pipeline_mode = #tpu.pipeline_mode<synchronous>, transform_indices = @transform_4, window_bounds = array<i64: 256, 128>}, {pipeline_mode = #tpu.pipeline_mode<synchronous>, transform_indices = @transform_5, window_bounds = array<i64: 3, 128>}, {pipeline_mode = #tpu.pipeline_mode<synchronous>, transform_indices = @transform_6, window_bounds = array<i64: 256, 128>}, {pipeline_mode = #tpu.pipeline_mode<synchronous>, transform_indices = @transform_7, window_bounds = array<i64: 3, 128>}, {transform_indices = @transform_8, window_bounds = array<i64: 256, 128>}]} {
    %c0 = arith.constant 0 : index
    %c0_0 = arith.constant 0 : index
    %0 = vector.load %arg1[%c0, %c0_0] : memref<256x256xbf16, #tpu.memory_space<vmem>>, vector<256x256xbf16>
    %c0_1 = arith.constant 0 : index
    %c0_2 = arith.constant 0 : index
    %1 = vector.load %arg3[%c0_1, %c0_2] : memref<256x128xbf16, #tpu.memory_space<vmem>>, vector<256x128xbf16>
    %cst = arith.constant dense<0.000000e+00> : vector<256x128xf32>
    %2 = tpu.matmul %0, %1, %cst {dimension_numbers = #tpu.dot_dimension_numbers<[1], [0], [0], [1], [0, 0, 1, 1], [], []>} : vector<256x256xbf16>, vector<256x128xbf16>, vector<256x128xf32> -> vector<256x128xf32>
    %c0_3 = arith.constant 0 : index
    %c0_4 = arith.constant 0 : index
    %3 = vector.load %arg4[%c0_3, %c0_4] : memref<3x128xf32, #tpu.memory_space<vmem>>, vector<1x128xf32>
    %c1 = arith.constant 1 : index
    %c0_5 = arith.constant 0 : index
    %4 = vector.load %arg4[%c1, %c0_5] : memref<3x128xf32, #tpu.memory_space<vmem>>, vector<1x128xf32>
    %c2 = arith.constant 2 : index
    %c0_6 = arith.constant 0 : index
    %5 = vector.load %arg4[%c2, %c0_6] : memref<3x128xf32, #tpu.memory_space<vmem>>, vector<1x128xf32>
    %6 = vector.broadcast %3 : vector<1x128xf32> to vector<256x128xf32>
    %7 = arith.addf %2, %6 : vector<256x128xf32>
    %cst_7 = arith.constant dense<0.000000e+00> : vector<256xf32>
    %8 = vector.multi_reduction <add>, %7, %cst_7 [1] : vector<256x128xf32> to vector<256xf32>
    %9 = vector.shape_cast %8 : vector<256xf32> to vector<256x1xf32>
    %cst_8 = arith.constant 1.280000e+02 : f32
    %10 = vector.broadcast %cst_8 : f32 to vector<256x1xf32>
    %11 = arith.divf %9, %10 : vector<256x1xf32>
    %12 = vector.broadcast %11 : vector<256x1xf32> to vector<256x128xf32>
    %13 = arith.subf %7, %12 : vector<256x128xf32>
    %14 = arith.mulf %13, %13 : vector<256x128xf32>
    %cst_9 = arith.constant dense<0.000000e+00> : vector<256xf32>
    %15 = vector.multi_reduction <add>, %14, %cst_9 [1] : vector<256x128xf32> to vector<256xf32>
    %16 = vector.shape_cast %15 : vector<256xf32> to vector<256x1xf32>
    %cst_10 = arith.constant 1.280000e+02 : f32
    %17 = vector.broadcast %cst_10 : f32 to vector<256x1xf32>
    %18 = arith.divf %16, %17 : vector<256x1xf32>
    %cst_11 = arith.constant 9.99999974E-6 : f32
    %19 = vector.broadcast %cst_11 : f32 to vector<256x1xf32>
    %20 = arith.addf %18, %19 : vector<256x1xf32>
    %21 = math.rsqrt %20 : vector<256x1xf32>
    %22 = vector.broadcast %4 : vector<1x128xf32> to vector<256x128xf32>
    %23 = vector.broadcast %21 : vector<256x1xf32> to vector<256x128xf32>
    %24 = arith.mulf %22, %23 : vector<256x128xf32>
    %25 = vector.broadcast %11 : vector<256x1xf32> to vector<256x128xf32>
    %26 = arith.subf %7, %25 : vector<256x128xf32>
    %27 = arith.mulf %26, %24 : vector<256x128xf32>
    %28 = vector.broadcast %5 : vector<1x128xf32> to vector<256x128xf32>
    %29 = arith.addf %27, %28 : vector<256x128xf32>
    %cst_12 = arith.constant 0.000000e+00 : f32
    %30 = vector.broadcast %cst_12 : f32 to vector<256x128xf32>
    %31 = arith.maximumf %29, %30 : vector<256x128xf32>
    %c0_13 = arith.constant 0 : index
    %c0_14 = arith.constant 0 : index
    %32 = vector.load %arg2[%c0_13, %c0_14] : memref<256x256xbf16, #tpu.memory_space<vmem>>, vector<256x256xbf16>
    %c0_15 = arith.constant 0 : index
    %c0_16 = arith.constant 0 : index
    %33 = vector.load %arg5[%c0_15, %c0_16] : memref<256x128xbf16, #tpu.memory_space<vmem>>, vector<256x128xbf16>
    %cst_17 = arith.constant dense<0.000000e+00> : vector<256x128xf32>
    %34 = tpu.matmul %32, %33, %cst_17 {dimension_numbers = #tpu.dot_dimension_numbers<[1], [0], [0], [1], [0, 0, 1, 1], [], []>} : vector<256x256xbf16>, vector<256x128xbf16>, vector<256x128xf32> -> vector<256x128xf32>
    %c0_18 = arith.constant 0 : index
    %c0_19 = arith.constant 0 : index
    %35 = vector.load %arg6[%c0_18, %c0_19] : memref<3x128xf32, #tpu.memory_space<vmem>>, vector<1x128xf32>
    %c1_20 = arith.constant 1 : index
    %c0_21 = arith.constant 0 : index
    %36 = vector.load %arg6[%c1_20, %c0_21] : memref<3x128xf32, #tpu.memory_space<vmem>>, vector<1x128xf32>
    %c2_22 = arith.constant 2 : index
    %c0_23 = arith.constant 0 : index
    %37 = vector.load %arg6[%c2_22, %c0_23] : memref<3x128xf32, #tpu.memory_space<vmem>>, vector<1x128xf32>
    %38 = vector.broadcast %35 : vector<1x128xf32> to vector<256x128xf32>
    %39 = arith.addf %34, %38 : vector<256x128xf32>
    %cst_24 = arith.constant dense<0.000000e+00> : vector<256xf32>
    %40 = vector.multi_reduction <add>, %39, %cst_24 [1] : vector<256x128xf32> to vector<256xf32>
    %41 = vector.shape_cast %40 : vector<256xf32> to vector<256x1xf32>
    %cst_25 = arith.constant 1.280000e+02 : f32
    %42 = vector.broadcast %cst_25 : f32 to vector<256x1xf32>
    %43 = arith.divf %41, %42 : vector<256x1xf32>
    %44 = vector.broadcast %43 : vector<256x1xf32> to vector<256x128xf32>
    %45 = arith.subf %39, %44 : vector<256x128xf32>
    %46 = arith.mulf %45, %45 : vector<256x128xf32>
    %cst_26 = arith.constant dense<0.000000e+00> : vector<256xf32>
    %47 = vector.multi_reduction <add>, %46, %cst_26 [1] : vector<256x128xf32> to vector<256xf32>
    %48 = vector.shape_cast %47 : vector<256xf32> to vector<256x1xf32>
    %cst_27 = arith.constant 1.280000e+02 : f32
    %49 = vector.broadcast %cst_27 : f32 to vector<256x1xf32>
    %50 = arith.divf %48, %49 : vector<256x1xf32>
    %cst_28 = arith.constant 9.99999974E-6 : f32
    %51 = vector.broadcast %cst_28 : f32 to vector<256x1xf32>
    %52 = arith.addf %50, %51 : vector<256x1xf32>
    %53 = math.rsqrt %52 : vector<256x1xf32>
    %54 = vector.broadcast %36 : vector<1x128xf32> to vector<256x128xf32>
    %55 = vector.broadcast %53 : vector<256x1xf32> to vector<256x128xf32>
    %56 = arith.mulf %54, %55 : vector<256x128xf32>
    %57 = vector.broadcast %43 : vector<256x1xf32> to vector<256x128xf32>
    %58 = arith.subf %39, %57 : vector<256x128xf32>
    %59 = arith.mulf %58, %56 : vector<256x128xf32>
    %60 = vector.broadcast %37 : vector<1x128xf32> to vector<256x128xf32>
    %61 = arith.addf %59, %60 : vector<256x128xf32>
    %cst_29 = arith.constant 0.000000e+00 : f32
    %62 = vector.broadcast %cst_29 : f32 to vector<256x128xf32>
    %63 = arith.maximumf %61, %62 : vector<256x128xf32>
    %64 = arith.truncf %31 : vector<256x128xf32> to vector<256x128xbf16>
    %65 = arith.truncf %63 : vector<256x128xf32> to vector<256x128xbf16>
    %66 = tpu.concatenate %64, %65 in 1 : vector<256x128xbf16>, vector<256x128xbf16> -> vector<256x256xbf16>
    %c0_30 = arith.constant 0 : index
    %c0_31 = arith.constant 0 : index
    %67 = vector.load %arg7[%c0_30, %c0_31] : memref<256x128xbf16, #tpu.memory_space<vmem>>, vector<256x128xbf16>
    %cst_32 = arith.constant dense<0.000000e+00> : vector<256x128xf32>
    %68 = tpu.matmul %66, %67, %cst_32 {dimension_numbers = #tpu.dot_dimension_numbers<[1], [0], [0], [1], [0, 0, 1, 1], [], []>} : vector<256x256xbf16>, vector<256x128xbf16>, vector<256x128xf32> -> vector<256x128xf32>
    %c0_33 = arith.constant 0 : index
    %c0_34 = arith.constant 0 : index
    %69 = vector.load %arg8[%c0_33, %c0_34] : memref<3x128xf32, #tpu.memory_space<vmem>>, vector<1x128xf32>
    %c1_35 = arith.constant 1 : index
    %c0_36 = arith.constant 0 : index
    %70 = vector.load %arg8[%c1_35, %c0_36] : memref<3x128xf32, #tpu.memory_space<vmem>>, vector<1x128xf32>
    %c2_37 = arith.constant 2 : index
    %c0_38 = arith.constant 0 : index
    %71 = vector.load %arg8[%c2_37, %c0_38] : memref<3x128xf32, #tpu.memory_space<vmem>>, vector<1x128xf32>
    %72 = vector.broadcast %69 : vector<1x128xf32> to vector<256x128xf32>
    %73 = arith.addf %68, %72 : vector<256x128xf32>
    %cst_39 = arith.constant dense<0.000000e+00> : vector<256xf32>
    %74 = vector.multi_reduction <add>, %73, %cst_39 [1] : vector<256x128xf32> to vector<256xf32>
    %75 = vector.shape_cast %74 : vector<256xf32> to vector<256x1xf32>
    %cst_40 = arith.constant 1.280000e+02 : f32
    %76 = vector.broadcast %cst_40 : f32 to vector<256x1xf32>
    %77 = arith.divf %75, %76 : vector<256x1xf32>
    %78 = vector.broadcast %77 : vector<256x1xf32> to vector<256x128xf32>
    %79 = arith.subf %73, %78 : vector<256x128xf32>
    %80 = arith.mulf %79, %79 : vector<256x128xf32>
    %cst_41 = arith.constant dense<0.000000e+00> : vector<256xf32>
    %81 = vector.multi_reduction <add>, %80, %cst_41 [1] : vector<256x128xf32> to vector<256xf32>
    %82 = vector.shape_cast %81 : vector<256xf32> to vector<256x1xf32>
    %cst_42 = arith.constant 1.280000e+02 : f32
    %83 = vector.broadcast %cst_42 : f32 to vector<256x1xf32>
    %84 = arith.divf %82, %83 : vector<256x1xf32>
    %cst_43 = arith.constant 9.99999974E-6 : f32
    %85 = vector.broadcast %cst_43 : f32 to vector<256x1xf32>
    %86 = arith.addf %84, %85 : vector<256x1xf32>
    %87 = math.rsqrt %86 : vector<256x1xf32>
    %88 = vector.broadcast %70 : vector<1x128xf32> to vector<256x128xf32>
    %89 = vector.broadcast %87 : vector<256x1xf32> to vector<256x128xf32>
    %90 = arith.mulf %88, %89 : vector<256x128xf32>
    %91 = vector.broadcast %77 : vector<256x1xf32> to vector<256x128xf32>
    %92 = arith.subf %73, %91 : vector<256x128xf32>
    %93 = arith.mulf %92, %90 : vector<256x128xf32>
    %94 = vector.broadcast %71 : vector<1x128xf32> to vector<256x128xf32>
    %95 = arith.addf %93, %94 : vector<256x128xf32>
    %cst_44 = arith.constant 0.000000e+00 : f32
    %96 = vector.broadcast %cst_44 : f32 to vector<256x128xf32>
    %97 = arith.maximumf %95, %96 : vector<256x128xf32>
    %c0_45 = arith.constant 0 : index
    %c0_46 = arith.constant 0 : index
    %98 = vector.load %arg9[%c0_45, %c0_46] : memref<256x128xf32, #tpu.memory_space<vmem>>, vector<256x128xf32>
    tpu.vector_store %arg9[%c0_45, %c0_46], %97 {strides = array<i32>} : memref<256x128xf32, #tpu.memory_space<vmem>>, vector<256x128xf32>,
    return
  }
  func.func @transform_0(%arg0: i32) -> (i32, i32) {
    %c0_i32 = arith.constant 0 : i32
    %c0_i32_0 = arith.constant 0 : i32
    return %arg0, %c0_i32 : i32, i32
  }
  func.func @transform_1(%arg0: i32) -> (i32, i32) {
    %c0_i32 = arith.constant 0 : i32
    %c0_i32_0 = arith.constant 0 : i32
    return %arg0, %c0_i32 : i32, i32
  }
  func.func @transform_2(%arg0: i32) -> (i32, i32) {
    %c0_i32 = arith.constant 0 : i32
    %c0_i32_0 = arith.constant 0 : i32
    %c0_i32_1 = arith.constant 0 : i32
    return %c0_i32, %c0_i32_0 : i32, i32
  }
  func.func @transform_3(%arg0: i32) -> (i32, i32) {
    %c0_i32 = arith.constant 0 : i32
    %c0_i32_0 = arith.constant 0 : i32
    %c0_i32_1 = arith.constant 0 : i32
    return %c0_i32, %c0_i32_0 : i32, i32
  }
  func.func @transform_4(%arg0: i32) -> (i32, i32) {
    %c0_i32 = arith.constant 0 : i32
    %c0_i32_0 = arith.constant 0 : i32
    %c0_i32_1 = arith.constant 0 : i32
    return %c0_i32, %c0_i32_0 : i32, i32
  }
  func.func @transform_5(%arg0: i32) -> (i32, i32) {
    %c0_i32 = arith.constant 0 : i32
    %c0_i32_0 = arith.constant 0 : i32
    %c0_i32_1 = arith.constant 0 : i32
    return %c0_i32, %c0_i32_0 : i32, i32
  }
  func.func @transform_6(%arg0: i32) -> (i32, i32) {
    %c0_i32 = arith.constant 0 : i32
    %c0_i32_0 = arith.constant 0 : i32
    %c0_i32_1 = arith.constant 0 : i32
    return %c0_i32, %c0_i32_0 : i32, i32
  }
  func.func @transform_7(%arg0: i32) -> (i32, i32) {
    %c0_i32 = arith.constant 0 : i32
    %c0_i32_0 = arith.constant 0 : i32
    %c0_i32_1 = arith.constant 0 : i32
    return %c0_i32, %c0_i32_0 : i32, i32
  }
  func.func @transform_8(%arg0: i32) -> (i32, i32) {
    %c0_i32 = arith.constant 0 : i32
    %c0_i32_0 = arith.constant 0 : i32
    return %arg0, %c0_i32 : i32, i32
  }
}

</mosaic_0001>

<bundles_post_ra>
// kernel: base_feature_head_forward.1
= control target key start
LH: loop header
LB: loop body
LE: loop exit
PB: predicated region body
PF: predicated region fallthrough
CT: control target
= control target key end

     0   :  { %13 = vsyncpa [#allocation3], 0  ;;  %s5841_s0 = inlined_call_operand.vmem [shape: bf16[320,256], index: 0, kind: input, shape index: {}]   ;;  %s5842_s1 = inlined_call_operand.vmem [shape: bf16[320,256], index: 1, kind: input, shape index: {}]   ;;  %s5843_s2 = inlined_call_operand.vmem [shape: bf16[256,128], index: 2, kind: input, shape index: {}]   ;;  %s5844_s3 = inlined_call_operand.vmem [shape: f32[3,128], index: 3, kind: input, shape index: {}]   ;;  %s5845_s4 = inlined_call_operand.vmem [shape: bf16[256,128], index: 4, kind: input, shape index: {}]   ;;  %s5846_s5 = inlined_call_operand.vmem [shape: f32[3,128], index: 5, kind: input, shape index: {}]   ;;  %s5847_s6 = inlined_call_operand.vmem [shape: bf16[256,128], index: 6, kind: input, shape index: {}]   ;;  %s5848_s7 = inlined_call_operand.vmem [shape: f32[3,128], index: 7, kind: input, shape index: {}]   ;;  %s5849_s8 = inlined_call_operand.hbm [shape: f32[320,128], index: 8, kind: output, shape index: {}]  }
   0x1   :  { %15 = vsyncpa [#allocation3 + $0x1], 0  ;;  %s4177_s27 = smov 0   ;;  %s4179_s28 = smov 0  }
   0x2   :  { %s4181_s29 = smov 0   ;;  %s4183_s30 = smov 0  }
   0x3 LB: > { %s4198_s9 = sadd.s32 4294967295, %s4127_s30   ;;  %s3189_s10 = sadd.s32 4294967294, %s4127_s30   ;;  %s4127_s30 = sphi %s4183_s30, %s6011_s30   ;;  %s4123_s29 = sphi %s4181_s29, %s6010_s29   ;;  %s4119_s28 = sphi %s4179_s28, %s6009_s28   ;;  %s4115_s27 = sphi %s4177_s27, %s6008_s27  }
   0x4   : > { %s4202_s11 = sadd.s32 1, %s4127_s30   ;;  %s206_s12 = sadd.s32 1, %s4123_s29 }
   0x5   : > { %s203_s13 = ssub.s32 %s4127_s30, %s4202_s11  ;;  %p216_p0 = scmp.ne.s32.totalorder %s4123_s29, %s4119_s28 }
   0x6   : > { %p204_p1 = scmp.eq.s32.totalorder %s203_s13, 0  ;;  %p217_p2 = scmp.eq.s32.totalorder %s4198_s9, 1 }
   0x7   : > { %p222_p3 = scmp.ne.s32.totalorder %s4119_s28, %s4115_s27  ;;  %p223_p4 = scmp.eq.s32.totalorder %s3189_s10, 1 }
   0x8   : > { %s4213_s14 = scalar_select %p204_p1, %s4123_s29, %s206_s12  }
   0x9   : > { %p4215_p5 = por %p217_p2, %p216_p0  ;;  %p4219_p6 = por %p223_p4, %p222_p3 }
   0xa   : > { %p3192_p7 = scmp.ge.s32.totalorder %s4127_s30, 1  ;;  %p299_p8 = scmp.lt.s32.totalorder %s4127_s30, 3 }
   0xc   : > { %p300_p9 = pnand %p3192_p7, %p299_p8 }
   0xe   : > { %303 = sbr.rel (%p300_p9) target bundleno = 1408 (0x580), region = 52 }
  0x15   : > { %v3725_v0 = vld [vmem:[%s5843_s2 + $0x40] sm:$0xff]   ;;  %s4229_s19 = sshll.u32 %s4198_s9, 5  ;;  %v3727_v2 = vld [vmem:[%s5843_s2 + $0x48] sm:$0xff]   ;;  %v3729_v4 = vld [vmem:[%s5843_s2 + $0x50] sm:$0xff]   ;;  %s347_s26 = sand.u32 1, %s4119_s28  }
  0x16   : > { %v3726_v1 = vld [vmem:[%s5843_s2] sm:$0xff]   ;;  %3333 = vmatprep.subr.bf16.mxu0 %v3725_v0  ;;  %3669 = vmatprep.subr.bf16.mxu1 %v3725_v0  ;;  %v3728_v3 = vld [vmem:[%s5843_s2 + $0x8] sm:$0xff]   ;;  %p356_p10 = scmp.lt.s32.totalorder %s4229_s19, 39  ;;  %v3730_v5 = vld [vmem:[%s5843_s2 + $0x10] sm:$0xff]   ;;  %s3193_s18 = sshll.u32 %s347_s26, 8 }
  0x17   : > { %3334 = vmatpush3.bf16.msra.mxu0 %v3726_v1  ;;  %3677 = vmatpush3.bf16.msra.mxu1 %v3726_v1  ;;  %v3731_v6 = vld [vmem:[%s5843_s2 + $0x58] sm:$0xff]   ;;  %v3733_v8 = vld [vmem:[%s5843_s2 + $0x60] sm:$0xff]   ;;  %v3735_v10 = vld [vmem:[%s5843_s2 + $0x68] sm:$0xff]   ;;  %s5780_s21 = scalar_lea.sflag [#allocation3], %s347_s26 }
  0x18   : > { %3335 = vmatprep.subr.bf16.mxu0 %v3727_v2  ;;  %3670 = vmatprep.subr.bf16.mxu1 %v3727_v2  ;;  %s4248_s17 = scalar_select %p356_p10, %s4229_s19, 39  ;;  %v3732_v7 = vld [vmem:[%s5843_s2 + $0x18] sm:$0xff]   ;;  %v3734_v9 = vld [vmem:[%s5843_s2 + $0x20] sm:$0xff]   ;;  %v3736_v13 = vld [vmem:[%s5843_s2 + $0x28] sm:$0xff]  }
  0x19   : > { %v3737_v14 = vld [vmem:[%s5843_s2 + $0x70] sm:$0xff]   ;;  %v3739_v16 = vld [vmem:[%s5843_s2 + $0x78] sm:$0xff]   ;;  %v3747_v19 = vld [vmem:[%s5845_s4 + $0x40] sm:$0xff]  }
  0x1a   : > { %s3330_s23 = sshll.u32 %s4248_s17, 3  ;;  %v3738_v15 = vld [vmem:[%s5843_s2 + $0x30] sm:$0xff]   ;;  %v3740_v17 = vld [vmem:[%s5843_s2 + $0x38] sm:$0xff]   ;;  %v3748_v21 = vld [vmem:[%s5845_s4] sm:$0xff]  }
  0x1b   : > { %3336 = vmatpush3.bf16.msra.mxu0 %v3728_v3  ;;  %3678 = vmatpush3.bf16.msra.mxu1 %v3728_v3  ;;  %s4265_s12 = scalar_lea.vmem %s5841_s0, %s3330_s23  ;;  %v3755_v24 = vld [vmem:[%s5845_s4 + $0x48] sm:$0xff]   ;;  %v3763_v27 = vld [vmem:[%s5845_s4 + $0x50] sm:$0xff]   ;;  %v3771_v32 = vld [vmem:[%s5845_s4 + $0x58] sm:$0xff]   ;;  %s4340_s20 = scalar_lea.vmem %s5842_s1, %s3330_s23 }
  0x1c   : > { %3337 = vmatprep.subr.bf16.mxu0 %v3729_v4  ;;  %3671 = vmatprep.subr.bf16.mxu1 %v3729_v4  ;;  %v3743_v11 = vld [vmem:[%s4265_s12 + $0x4] ss:$8 sps:$4 sm:$0xff]   ;;  %v3741_v18 = vld [vmem:[%s4265_s12] ss:$8 sps:$4 sm:$0xff]   ;;  %v3749_v22 = vld [vmem:[%s4265_s12 + $0x14] ss:$8 sps:$4 sm:$0xff]  }
  0x1d   : > { %v3746_v12 = vld [vmem:[%s4265_s12 + $0x84] ss:$8 sps:$4 sm:$0xff]   ;;  %749 = vmatprep.mubr.bf16.mxu0 %v3743_v11  ;;  %v3744_v20 = vld [vmem:[%s4265_s12 + $0x80] ss:$8 sps:$4 sm:$0xff]   ;;  %v3751_v23 = vld [vmem:[%s4265_s12 + $0x94] ss:$8 sps:$4 sm:$0xff]  }
  0x1e   : > { %813 = vmatprep.mubr.bf16.mxu1 %v3746_v12  ;;  %v3756_v25 = vld [vmem:[%s5845_s4 + $0x8] sm:$0xff]   ;;  %v3753_v26 = vld [vmem:[%s4265_s12 + $0x10] ss:$8 sps:$4 sm:$0xff]   ;;  %v3779_v35 = vld [vmem:[%s5845_s4 + $0x60] sm:$0xff]  }
  0x1f   : > { %3338 = vmatpush3.bf16.msra.mxu0 %v3730_v5  ;;  %3679 = vmatpush3.bf16.msra.mxu1 %v3730_v5  ;;  %v3754_v28 = vld [vmem:[%s4265_s12 + $0x90] ss:$8 sps:$4 sm:$0xff]   ;;  %v3757_v29 = vld [vmem:[%s4265_s12 + $0x24] ss:$8 sps:$4 sm:$0xff]   ;;  %v3761_v33 = vld [vmem:[%s4265_s12 + $0x20] ss:$8 sps:$4 sm:$0xff]  }
  0x20   : > { %3339 = vmatprep.subr.bf16.mxu0 %v3731_v6  ;;  %3672 = vmatprep.subr.bf16.mxu1 %v3731_v6  ;;  %v3759_v30 = vld [vmem:[%s4265_s12 + $0xa4] ss:$8 sps:$4 sm:$0xff]   ;;  %v3764_v31 = vld [vmem:[%s5845_s4 + $0x10] sm:$0xff]   ;;  %v3772_v34 = vld [vmem:[%s5845_s4 + $0x18] sm:$0xff]  }
  0x21   : > { %v3762_v36 = vld [vmem:[%s4265_s12 + $0xa0] ss:$8 sps:$4 sm:$0xff]   ;;  %v3765_v37 = vld [vmem:[%s4265_s12 + $0x34] ss:$8 sps:$4 sm:$0xff]   ;;  %v3769_v43 = vld [vmem:[%s4265_s12 + $0x30] ss:$8 sps:$4 sm:$0xff]  }
  0x22   : > { %v3767_v38 = vld [vmem:[%s4265_s12 + $0xb4] ss:$8 sps:$4 sm:$0xff]   ;;  %v3780_v39 = vld [vmem:[%s5845_s4 + $0x20] sm:$0xff]   ;;  %v3787_v40 = vld [vmem:[%s5845_s4 + $0x68] sm:$0xff]  }
  0x23   : > { %3340 = vmatpush3.bf16.msra.mxu0 %v3732_v7  ;;  %3680 = vmatpush3.bf16.msra.mxu1 %v3732_v7  ;;  %v3788_v41 = vld [vmem:[%s5845_s4 + $0x28] sm:$0xff]   ;;  %v3795_v42 = vld [vmem:[%s5845_s4 + $0x70] sm:$0xff]   ;;  %v3803_v48 = vld [vmem:[%s5845_s4 + $0x78] sm:$0xff]  }
  0x24   : > { %3341 = vmatprep.subr.bf16.mxu0 %v3733_v8  ;;  %3673 = vmatprep.subr.bf16.mxu1 %v3733_v8  ;;  %v3770_v44 = vld [vmem:[%s4265_s12 + $0xb0] ss:$8 sps:$4 sm:$0xff]   ;;  %v3773_v45 = vld [vmem:[%s4265_s12 + $0x44] ss:$8 sps:$4 sm:$0xff]   ;;  %v3777_v50 = vld [vmem:[%s4265_s12 + $0x40] ss:$8 sps:$4 sm:$0xff]  }
  0x25   : > { %v3775_v46 = vld [vmem:[%s4265_s12 + $0xc4] ss:$8 sps:$4 sm:$0xff]   ;;  %v3796_v47 = vld [vmem:[%s5845_s4 + $0x30] sm:$0xff]   ;;  %v3804_v49 = vld [vmem:[%s5845_s4 + $0x38] sm:$0xff]  }
  0x26   : > { %v3778_v51 = vld [vmem:[%s4265_s12 + $0xc0] ss:$8 sps:$4 sm:$0xff]   ;;  %v3781_v52 = vld [vmem:[%s4265_s12 + $0x54] ss:$8 sps:$4 sm:$0xff]   ;;  %v3785_v54 = vld [vmem:[%s4265_s12 + $0x50] ss:$8 sps:$4 sm:$0xff]  }
  0x27   : > { %3342 = vmatpush3.bf16.msra.mxu0 %v3734_v9  ;;  %3681 = vmatpush3.bf16.msra.mxu1 %v3734_v9  ;;  %v3783_v53 = vld [vmem:[%s4265_s12 + $0xd4] ss:$8 sps:$4 sm:$0xff]   ;;  %v3786_v55 = vld [vmem:[%s4265_s12 + $0xd0] ss:$8 sps:$4 sm:$0xff]   ;;  %v3789_v56 = vld [vmem:[%s4265_s12 + $0x64] ss:$8 sps:$4 sm:$0xff]  }
  0x28   : > { %3343 = vmatprep.subr.bf16.mxu0 %v3735_v10  ;;  %3674 = vmatprep.subr.bf16.mxu1 %v3735_v10  ;;  %v3791_v57 = vld [vmem:[%s4265_s12 + $0xe4] ss:$8 sps:$4 sm:$0xff]   ;;  %v3793_v58 = vld [vmem:[%s4265_s12 + $0x60] ss:$8 sps:$4 sm:$0xff]   ;;  %v3797_v60 = vld [vmem:[%s4265_s12 + $0x74] ss:$8 sps:$4 sm:$0xff]  }
  0x29   : > { %v3794_v59 = vld [vmem:[%s4265_s12 + $0xe0] ss:$8 sps:$4 sm:$0xff]   ;;  %v3799_v61 = vld [vmem:[%s4265_s12 + $0xf4] ss:$8 sps:$4 sm:$0xff]   ;;  %v3801_v62 = vld [vmem:[%s4265_s12 + $0x70] ss:$8 sps:$4 sm:$0xff]  }
  0x2a   : > { %v3802_v63 = vld [vmem:[%s4265_s12 + $0xf0] ss:$8 sps:$4 sm:$0xff]   ;;  %v3807_v0 = vld [vmem:[%s4340_s20 + $0x4] ss:$8 sps:$4 sm:$0xff]   ;;  %v3805_v1 = vld [vmem:[%s4340_s20] ss:$8 sps:$4 sm:$0xff]  }
  0x2b   : > { %3344 = vmatpush3.bf16.msra.mxu0 %v3736_v13  ;;  %3682 = vmatpush3.bf16.msra.mxu1 %v3736_v13  ;;  %v3808_v2 = vld [vmem:[%s4340_s20 + $0x14] ss:$8 sps:$4 sm:$0xff]   ;;  %v3810_v3 = vld [vmem:[%s4340_s20 + $0x10] ss:$8 sps:$4 sm:$0xff]   ;;  %v3811_v4 = vld [vmem:[%s4340_s20 + $0x24] ss:$8 sps:$4 sm:$0xff]  }
  0x2c   : > { %3345 = vmatprep.subr.bf16.mxu0 %v3737_v14  ;;  %3675 = vmatprep.subr.bf16.mxu1 %v3737_v14  ;;  %v3813_v5 = vld [vmem:[%s4340_s20 + $0x20] ss:$8 sps:$4 sm:$0xff]   ;;  %v3814_v6 = vld [vmem:[%s4340_s20 + $0x34] ss:$8 sps:$4 sm:$0xff]   ;;  %v3816_v7 = vld [vmem:[%s4340_s20 + $0x30] ss:$8 sps:$4 sm:$0xff]  }
  0x2d   : > { %v3817_v8 = vld [vmem:[%s4340_s20 + $0x44] ss:$8 sps:$4 sm:$0xff]   ;;  %v3819_v9 = vld [vmem:[%s4340_s20 + $0x40] ss:$8 sps:$4 sm:$0xff]   ;;  %v3820_v10 = vld [vmem:[%s4340_s20 + $0x54] ss:$8 sps:$4 sm:$0xff]  }
  0x2e   : > { %v3822_v11 = vld [vmem:[%s4340_s20 + $0x50] ss:$8 sps:$4 sm:$0xff]   ;;  %v3823_v12 = vld [vmem:[%s4340_s20 + $0x64] ss:$8 sps:$4 sm:$0xff]   ;;  %v3825_v13 = vld [vmem:[%s4340_s20 + $0x60] ss:$8 sps:$4 sm:$0xff]  }
  0x2f   : > { %3346 = vmatpush3.bf16.msra.mxu0 %v3738_v15  ;;  %3683 = vmatpush3.bf16.msra.mxu1 %v3738_v15  ;;  %v3826_v14 = vld [vmem:[%s4340_s20 + $0x74] ss:$8 sps:$4 sm:$0xff]   ;;  %v3828_v15 = vld [vmem:[%s4340_s20 + $0x70] ss:$8 sps:$4 sm:$0xff]   ;;  %s5657_s12 = scalar_lea.vmem [#allocation2], %s3193_s18 }
  0x30   : > { %3347 = vmatprep.subr.bf16.mxu0 %v3739_v16  ;;  %3676 = vmatprep.subr.bf16.mxu1 %v3739_v16  ;;  %v3829_v16 = vld [vmem:[%s4340_s20 + $0x84] ss:$8 sps:$4 sm:$0xff]  }
  0x33   : > { %3348 = vmatpush3.bf16.msra.mxu0 %v3740_v17  ;;  %3684 = vmatpush3.bf16.msra.mxu1 %v3740_v17  ;;  %v3831_v17 = vld [vmem:[%s4340_s20 + $0x80] ss:$8 sps:$4 sm:$0xff]  }
  0x34   : > { %3445 = vmatprep.subr.bf16.mxu1 %v3747_v19  ;;  %v3834_v19 = vld [vmem:[%s4340_s20 + $0x90] ss:$8 sps:$4 sm:$0xff]  }
  0x36   : > { %750 = vmatmul.mubr.bf16.vlgmr.msra.gmra.mrb[0].mxu0 %v3741_v18  ;;  %814 = vmatmul.mubr.bf16.vlgmr.msra.gmra.mrb[0].mxu1 %v3744_v20  ;;  %v3832_v18 = vld [vmem:[%s4340_s20 + $0x94] ss:$8 sps:$4 sm:$0xff]   ;;  %v3835_v20 = vld [vmem:[%s4340_s20 + $0xa4] ss:$8 sps:$4 sm:$0xff]  }
  0x37   : > { %3446 = vmatpush3.bf16.msra.mxu1 %v3748_v21  ;;  %757 = vmatprep.mubr.bf16.mxu0 %v3749_v22  ;;  %v3837_v21 = vld [vmem:[%s4340_s20 + $0xa0] ss:$8 sps:$4 sm:$0xff]   ;;  %v3838_v22 = vld [vmem:[%s4340_s20 + $0xb4] ss:$8 sps:$4 sm:$0xff]  }
  0x38   : > { %821 = vmatprep.mubr.bf16.mxu1 %v3751_v23  ;;  %3447 = vmatprep.subr.bf16.mxu1 %v3755_v24  ;;  %v3840_v23 = vld [vmem:[%s4340_s20 + $0xb0] ss:$8 sps:$4 sm:$0xff]   ;;  %v3841_v24 = vld [vmem:[%s4340_s20 + $0xc4] ss:$8 sps:$4 sm:$0xff]  }
  0x3b   : > { %3448 = vmatpush3.bf16.msra.mxu1 %v3756_v25  ;;  %v3843_v25 = vld [vmem:[%s4340_s20 + $0xc0] ss:$8 sps:$4 sm:$0xff]  }
  0x3c   : > { %3449 = vmatprep.subr.bf16.mxu1 %v3763_v27  ;;  %v3846_v27 = vld [vmem:[%s4340_s20 + $0xd0] ss:$8 sps:$4 sm:$0xff]  }
  0x3e   : > { %758 = vmatmul.mubr.bf16.gmra.mrb[4].mxu0 %v3753_v26  ;;  %822 = vmatmul.mubr.bf16.gmra.mrb[4].mxu1 %v3754_v28  ;;  %v3844_v26 = vld [vmem:[%s4340_s20 + $0xd4] ss:$8 sps:$4 sm:$0xff]   ;;  %v3847_v28 = vld [vmem:[%s4340_s20 + $0xe4] ss:$8 sps:$4 sm:$0xff]  }
  0x3f   : > { %765 = vmatprep.mubr.bf16.mxu0 %v3757_v29  ;;  %829 = vmatprep.mubr.bf16.mxu1 %v3759_v30  ;;  %v3849_v29 = vld [vmem:[%s4340_s20 + $0xe0] ss:$8 sps:$4 sm:$0xff]   ;;  %v3850_v30 = vld [vmem:[%s4340_s20 + $0xf4] ss:$8 sps:$4 sm:$0xff]  }
  0x40   : > { %3450 = vmatpush3.bf16.msra.mxu1 %v3764_v31  ;;  %v3852_v31 = vld [vmem:[%s4340_s20 + $0xf0] ss:$8 sps:$4 sm:$0xff]   ;;  %s3104_s20 = ssub.s32 (%p4215_p5), 40, %s4229_s19 }
  0x41   : > { %3451 = vmatprep.subr.bf16.mxu1 %v3771_v32  ;;  %p3105_p11 = scmp.lt.s32.totalorder (%p4215_p5), %s3104_s20, 32 }
  0x44   : > { %3452 = vmatpush3.bf16.msra.mxu1 %v3772_v34 }
  0x45   : > { %3453 = vmatprep.subr.bf16.mxu1 %v3779_v35 }
  0x46   : > { %766 = vmatmul.mubr.bf16.gmra.mrb[8].mxu0 %v3761_v33  ;;  %830 = vmatmul.mubr.bf16.gmra.mrb[8].mxu1 %v3762_v36  ;;  %v4410_v36 = vld [vmem:[%s5844_s3] ss:$0 sm:$0xff] }
  0x47   : > { %773 = vmatprep.mubr.bf16.mxu0 %v3765_v37  ;;  %837 = vmatprep.mubr.bf16.mxu1 %v3767_v38 }
  0x48   : > { %3454 = vmatpush3.bf16.msra.mxu1 %v3780_v39 }
  0x49   : > { %3455 = vmatprep.subr.bf16.mxu1 %v3787_v40 }
  0x4c   : > { %3456 = vmatpush3.bf16.msra.mxu1 %v3788_v41 }
  0x4d   : > { %3457 = vmatprep.subr.bf16.mxu1 %v3795_v42 }
  0x4e   : > { %774 = vmatmul.mubr.bf16.gmra.mrb[12].mxu0 %v3769_v43  ;;  %838 = vmatmul.mubr.bf16.gmra.mrb[12].mxu1 %v3770_v44 }
  0x4f   : > { %781 = vmatprep.mubr.bf16.mxu0 %v3773_v45  ;;  %845 = vmatprep.mubr.bf16.mxu1 %v3775_v46 }
  0x50   : > { %3458 = vmatpush3.bf16.msra.mxu1 %v3796_v47 }
  0x51   : > { %3459 = vmatprep.subr.bf16.mxu1 %v3803_v48 }
  0x54   : > { %3460 = vmatpush3.bf16.msra.mxu1 %v3804_v49 }
  0x56   : > { %782 = vmatmul.mubr.bf16.gmra.mrb[16].mxu0 %v3777_v50  ;;  %846 = vmatmul.mubr.bf16.gmra.mrb[16].mxu1 %v3778_v51 }
  0x57   : > { %789 = vmatprep.mubr.bf16.mxu0 %v3781_v52  ;;  %853 = vmatprep.mubr.bf16.mxu1 %v3783_v53 }
  0x5e   : > { %790 = vmatmul.mubr.bf16.gmra.mrb[20].mxu0 %v3785_v54  ;;  %854 = vmatmul.mubr.bf16.gmra.mrb[20].mxu1 %v3786_v55 }
  0x5f   : > { %797 = vmatprep.mubr.bf16.mxu0 %v3789_v56  ;;  %861 = vmatprep.mubr.bf16.mxu1 %v3791_v57 }
  0x66   : > { %798 = vmatmul.mubr.bf16.gmra.mrb[24].mxu0 %v3793_v58  ;;  %862 = vmatmul.mubr.bf16.gmra.mrb[24].mxu1 %v3794_v59 }
  0x67   : > { %805 = vmatprep.mubr.bf16.mxu0 %v3797_v60  ;;  %869 = vmatprep.mubr.bf16.mxu1 %v3799_v61 }
  0x6e   : > { %806 = vmatmul.mubr.bf16.gmra.mrb[28].mxu0 %v3801_v62  ;;  %870 = vmatmul.mubr.bf16.gmra.mrb[28].mxu1 %v3802_v63 }
  0x6f   : > { %1694 = vmatprep.mubr.bf16.mxu1 %v3807_v0 }
  0x76   : > { %1695 = vmatmul.mubr.bf16.vlgmr.msra.gmra.mrb[32].mxu1 %v3805_v1 }
  0x77   : > { %1702 = vmatprep.mubr.bf16.mxu1 %v3808_v2 }
  0x7e   : > { %1703 = vmatmul.mubr.bf16.gmra.mrb[36].mxu1 %v3810_v3 }
  0x7f   : > { %1710 = vmatprep.mubr.bf16.mxu1 %v3811_v4 }
  0x86   : > { %1711 = vmatmul.mubr.bf16.gmra.mrb[40].mxu1 %v3813_v5 }
  0x87   : > { %1718 = vmatprep.mubr.bf16.mxu1 %v3814_v6 }
  0x8e   : > { %1719 = vmatmul.mubr.bf16.gmra.mrb[44].mxu1 %v3816_v7 }
  0x8f   : > { %1726 = vmatprep.mubr.bf16.mxu1 %v3817_v8 }
  0x96   : > { %1727 = vmatmul.mubr.bf16.gmra.mrb[48].mxu1 %v3819_v9 }
  0x97   : > { %1734 = vmatprep.mubr.bf16.mxu1 %v3820_v10 }
  0x9e   : > { %1735 = vmatmul.mubr.bf16.gmra.mrb[52].mxu1 %v3822_v11 }
  0x9f   : > { %1742 = vmatprep.mubr.bf16.mxu1 %v3823_v12 }
  0xa6   : > { %1743 = vmatmul.mubr.bf16.gmra.mrb[56].mxu1 %v3825_v13 }
  0xa7   : > { %1750 = vmatprep.mubr.bf16.mxu1 %v3826_v14 }
  0xae   : > { %1751 = vmatmul.mubr.bf16.gmra.mrb[60].mxu1 %v3828_v15 }
  0xaf   : > { %1758 = vmatprep.mubr.bf16.mxu1 %v3829_v16 }
  0xb6   : > { %1759 = vmatmul.mubr.bf16.gmra.mrb[64].mxu1 %v3831_v17 }
  0xb7   : > { %1766 = vmatprep.mubr.bf16.mxu1 %v3832_v18 }
  0xbe   : > { %1767 = vmatmul.mubr.bf16.gmra.mrb[68].mxu1 %v3834_v19 }
  0xbf   : > { %1774 = vmatprep.mubr.bf16.mxu1 %v3835_v20 }
  0xc6   : > { %1775 = vmatmul.mubr.bf16.gmra.mrb[72].mxu1 %v3837_v21 }
  0xc7   : > { %1782 = vmatprep.mubr.bf16.mxu1 %v3838_v22 }
  0xce   : > { %1783 = vmatmul.mubr.bf16.gmra.mrb[76].mxu1 %v3840_v23 }
  0xcf   : > { %1790 = vmatprep.mubr.bf16.mxu1 %v3841_v24 }
  0xd6   : > { %1791 = vmatmul.mubr.bf16.gmra.mrb[80].mxu1 %v3843_v25 }
  0xd7   : > { %1798 = vmatprep.mubr.bf16.mxu1 %v3844_v26 }
  0xde   : > { %1799 = vmatmul.mubr.bf16.gmra.mrb[84].mxu1 %v3846_v27 }
  0xdf   : > { %1806 = vmatprep.mubr.bf16.mxu1 %v3847_v28 }
  0xe6   : > { %1807 = vmatmul.mubr.bf16.gmra.mrb[88].mxu1 %v3849_v29 }
  0xe7   : > { %1814 = vmatprep.mubr.bf16.mxu1 %v3850_v30 }
  0xee   : > { %1815 = vmatmul.mubr.bf16.gmra.mrb[92].mxu1 %v3852_v31 }
 0x109   : > { %v3349_v32 = vpop.f32.mrb[0].mxu0  ;;  %v3397_v33 = vpop.f32.mrb[0].mxu1 }
 0x10a   : > { %v3350_v34 = vpop.f32.mrb[1].mxu0  ;;  %v3398_v35 = vpop.f32.mrb[1].mxu1 }
 0x10b   : > { %v3351_v37 = vadd.f32 %v3350_v34, %v3349_v32  ;;  %v3399_v38 = vadd.f32 %v3398_v35, %v3397_v33  ;;  %v3400_v39 = vpop.f32.mrb[2].mxu1  ;;  %v3352_v40 = vpop.f32.mrb[2].mxu0 }
 0x10c   : > { %v3401_v41 = vpop.f32.mrb[3].mxu1  ;;  %v3353_v42 = vpop.f32.mrb[3].mxu0 }
 0x10d   : > { %v3402_v43 = vadd.f32 %v3401_v41, %v3400_v39  ;;  %v3354_v44 = vadd.f32 %v3353_v42, %v3352_v40  ;;  %v4413_v45 = vadd.f32 %v3399_v38, %v4410_v36  ;;  %v4416_v46 = vadd.f32 %v3351_v37, %v4410_v36 }
 0x10f   : > { %910 = vadd.xlane.f32.xlu0 %v4413_v45  ;;  %878 = vadd.xlane.f32.xlu1 %v4416_v46  ;;  %v4421_v47 = vadd.f32 %v3354_v44, %v4410_v36  ;;  %v4428_v61 = vadd.f32 %v3402_v43, %v4410_v36 }
 0x111   : > { %v3355_v48 = vpop.f32.mrb[4].mxu0  ;;  %v3403_v49 = vpop.f32.mrb[4].mxu1 }
 0x112   : > { %v3356_v50 = vpop.f32.mrb[5].mxu0  ;;  %v3404_v51 = vpop.f32.mrb[5].mxu1 }
 0x113   : > { %v3357_v52 = vadd.f32 %v3356_v50, %v3355_v48  ;;  %v3405_v53 = vadd.f32 %v3404_v51, %v3403_v49  ;;  %v3406_v54 = vpop.f32.mrb[6].mxu1  ;;  %880 = vadd.xlane.f32.xlu1 %v4421_v47  ;;  %v3358_v55 = vpop.f32.mrb[6].mxu0 }
 0x114   : > { %v3407_v56 = vpop.f32.mrb[7].mxu1  ;;  %v3359_v57 = vpop.f32.mrb[7].mxu0 }
 0x115   : > { %v3408_v58 = vadd.f32 %v3407_v56, %v3406_v54  ;;  %v3360_v59 = vadd.f32 %v3359_v57, %v3358_v55  ;;  %v4425_v60 = vadd.f32 %v3357_v52, %v4410_v36  ;;  %v4436_v1 = vadd.f32 %v3405_v53, %v4410_v36 }
 0x117   : > { %882 = vadd.xlane.f32.xlu0 %v4425_v60  ;;  %912 = vadd.xlane.f32.xlu1 %v4428_v61  ;;  %v4433_v62 = vadd.f32 %v3360_v59, %v4410_v36  ;;  %v4444_v13 = vadd.f32 %v3408_v58, %v4410_v36 }
 0x119   : > { %v3361_v63 = vpop.f32.mrb[8].mxu0  ;;  %v3409_v0 = vpop.f32.mrb[8].mxu1 }
 0x11a   : > { %v3362_v2 = vpop.f32.mrb[9].mxu0  ;;  %v3410_v3 = vpop.f32.mrb[9].mxu1 }
 0x11b   : > { %v3363_v4 = vadd.f32 %v3362_v2, %v3361_v63  ;;  %v3411_v5 = vadd.f32 %v3410_v3, %v3409_v0  ;;  %v3412_v6 = vpop.f32.mrb[10].mxu1  ;;  %914 = vadd.xlane.f32.xlu0 %v4436_v1  ;;  %884 = vadd.xlane.f32.xlu1 %v4433_v62  ;;  %v3364_v7 = vpop.f32.mrb[10].mxu0 }
 0x11c   : > { %v3413_v8 = vpop.f32.mrb[11].mxu1  ;;  %v3365_v9 = vpop.f32.mrb[11].mxu0 }
 0x11d   : > { %v3414_v10 = vadd.f32 %v3413_v8, %v3412_v6  ;;  %v3366_v11 = vadd.f32 %v3365_v9, %v3364_v7  ;;  %v4441_v12 = vadd.f32 %v3363_v4, %v4410_v36  ;;  %v4452_v17 = vadd.f32 %v3411_v5, %v4410_v36 }
 0x11f   : > { %886 = vadd.xlane.f32.xlu0 %v4441_v12  ;;  %916 = vadd.xlane.f32.xlu1 %v4444_v13  ;;  %v4449_v14 = vadd.f32 %v3366_v11, %v4410_v36  ;;  %5900 = vst [vmem:[#allocation5_spill] sm:$0xff] %v4452_v17  ;;  %v4460_v29 = vadd.f32 %v3414_v10, %v4410_v36 }
 0x121   : > { %v3367_v15 = vpop.f32.mrb[12].mxu0  ;;  %v3415_v16 = vpop.f32.mrb[12].mxu1  ;;  %5901 = vst [vmem:[#allocation6_spill] sm:$0xff] %v4460_v29 }
 0x122   : > { %v3368_v18 = vpop.f32.mrb[13].mxu0  ;;  %v3416_v19 = vpop.f32.mrb[13].mxu1 }
 0x123   : > { %v3369_v20 = vadd.f32 %v3368_v18, %v3367_v15  ;;  %v3417_v21 = vadd.f32 %v3416_v19, %v3415_v16  ;;  %v3418_v22 = vpop.f32.mrb[14].mxu1  ;;  %918 = vadd.xlane.f32.xlu0 %v4452_v17  ;;  %888 = vadd.xlane.f32.xlu1 %v4449_v14  ;;  %v3370_v23 = vpop.f32.mrb[14].mxu0 }
 0x124   : > { %v3419_v24 = vpop.f32.mrb[15].mxu1  ;;  %v3371_v25 = vpop.f32.mrb[15].mxu0 }
 0x125   : > { %v3420_v26 = vadd.f32 %v3419_v24, %v3418_v22  ;;  %v3372_v27 = vadd.f32 %v3371_v25, %v3370_v23  ;;  %v4457_v28 = vadd.f32 %v3369_v20, %v4410_v36  ;;  %v4468_v33 = vadd.f32 %v3417_v21, %v4410_v36 }
 0x127   : > { %890 = vadd.xlane.f32.xlu0 %v4457_v28  ;;  %920 = vadd.xlane.f32.xlu1 %v4460_v29  ;;  %v4465_v30 = vadd.f32 %v3372_v27, %v4410_v36  ;;  %5902 = vst [vmem:[#allocation7_spill] sm:$0xff] %v4468_v33  ;;  %v4476_v49 = vadd.f32 %v3420_v26, %v4410_v36 }
 0x129   : > { %v3373_v31 = vpop.f32.mrb[16].mxu0  ;;  %v3421_v32 = vpop.f32.mrb[16].mxu1  ;;  %5903 = vst [vmem:[#allocation8_spill] sm:$0xff] %v4476_v49 }
 0x12a   : > { %v3374_v34 = vpop.f32.mrb[17].mxu0  ;;  %v3422_v35 = vpop.f32.mrb[17].mxu1 }
 0x12b   : > { %v3375_v37 = vadd.f32 %v3374_v34, %v3373_v31  ;;  %v3423_v38 = vadd.f32 %v3422_v35, %v3421_v32  ;;  %v3424_v39 = vpop.f32.mrb[18].mxu1  ;;  %922 = vadd.xlane.f32.xlu0 %v4468_v33  ;;  %892 = vadd.xlane.f32.xlu1 %v4465_v30  ;;  %v3376_v40 = vpop.f32.mrb[18].mxu0 }
 0x12c   : > { %v3425_v41 = vpop.f32.mrb[19].mxu1  ;;  %v3377_v42 = vpop.f32.mrb[19].mxu0 }
 0x12d   : > { %v3426_v43 = vadd.f32 %v3425_v41, %v3424_v39  ;;  %v3378_v44 = vadd.f32 %v3377_v42, %v3376_v40  ;;  %v4473_v48 = vadd.f32 %v3375_v37, %v4410_v36  ;;  %v4484_v53 = vadd.f32 %v3423_v38, %v4410_v36 }
 0x12f   : > { %894 = vadd.xlane.f32.xlu0 %v4473_v48  ;;  %924 = vadd.xlane.f32.xlu1 %v4476_v49  ;;  %v4481_v50 = vadd.f32 %v3378_v44, %v4410_v36  ;;  %5904 = vst [vmem:[#allocation9_spill] sm:$0xff] %v4484_v53  ;;  %v4489_v2 = vadd.f32 %v3426_v43, %v4410_v36 }
 0x131   : > { %v3379_v51 = vpop.f32.mrb[20].mxu0  ;;  %v3427_v52 = vpop.f32.mrb[20].mxu1  ;;  %5905 = vst [vmem:[#allocation10_spill] sm:$0xff] %v4489_v2 }
 0x132   : > { %v3380_v54 = vpop.f32.mrb[21].mxu0  ;;  %v3428_v55 = vpop.f32.mrb[21].mxu1 }
 0x133   : > { %v3381_v56 = vadd.f32 %v3380_v54, %v3379_v51  ;;  %v3429_v57 = vadd.f32 %v3428_v55, %v3427_v52  ;;  %v3430_v58 = vpop.f32.mrb[22].mxu1  ;;  %926 = vadd.xlane.f32.xlu0 %v4484_v53  ;;  %896 = vadd.xlane.f32.xlu1 %v4481_v50  ;;  %v3382_v59 = vpop.f32.mrb[22].mxu0 }
 0x134   : > { %v3431_v63 = vpop.f32.mrb[23].mxu1  ;;  %v3383_v0 = vpop.f32.mrb[23].mxu0 }
 0x135   : > { %v3432_v3 = vadd.f32 %v3431_v63, %v3430_v58  ;;  %v3384_v4 = vadd.f32 %v3383_v0, %v3382_v59  ;;  %v4492_v5 = vadd.f32 %v3381_v56, %v4410_v36  ;;  %v4495_v6 = vadd.f32 %v3429_v57, %v4410_v36  ;;  %v4534_v58 = vld [vmem:[%s5846_s5] ss:$0 sm:$0xff] }
 0x137   : > { %5906 = vst [vmem:[#allocation11_spill] sm:$0xff] %v4495_v6  ;;  %898 = vadd.xlane.f32.xlu0 %v4492_v5  ;;  %928 = vadd.xlane.f32.xlu1 %v4489_v2  ;;  %v4500_v7 = vadd.f32 %v3384_v4, %v4410_v36  ;;  %v4537_v0 = vadd.f32 %v3432_v3, %v4410_v36 }
 0x139   : > { %v3385_v8 = vpop.f32.mrb[24].mxu0  ;;  %v3433_v9 = vpop.f32.mrb[24].mxu1  ;;  %5907 = vst [vmem:[#allocation12_spill] sm:$0xff] %v4537_v0 }
 0x13a   : > { %v3386_v10 = vpop.f32.mrb[25].mxu0  ;;  %v3434_v11 = vpop.f32.mrb[25].mxu1 }
 0x13b   : > { %v3387_v15 = vadd.f32 %v3386_v10, %v3385_v8  ;;  %v3435_v16 = vadd.f32 %v3434_v11, %v3433_v9  ;;  %v3388_v18 = vpop.f32.mrb[26].mxu0  ;;  %v3436_v19 = vpop.f32.mrb[26].mxu1  ;;  %900 = vadd.xlane.f32.xlu1 %v4500_v7 }
 0x13c   : > { %v3389_v20 = vpop.f32.mrb[27].mxu0  ;;  %v3437_v21 = vpop.f32.mrb[27].mxu1 }
 0x13d   : > { %v3390_v22 = vadd.f32 %v3389_v20, %v3388_v18  ;;  %v3438_v23 = vadd.f32 %v3437_v21, %v3436_v19  ;;  %v4504_v24 = vadd.f32 %v3387_v15, %v4410_v36  ;;  %v4507_v25 = vadd.f32 %v3435_v16, %v4410_v36 }
 0x13f   : > { %902 = vadd.xlane.f32.xlu0 %v4504_v24  ;;  %v4511_v26 = vadd.f32 %v3390_v22, %v4410_v36  ;;  %v4514_v27 = vadd.f32 %v3438_v23, %v4410_v36 }
 0x141   : > { %v3391_v31 = vpop.f32.mrb[28].mxu0  ;;  %v3439_v32 = vpop.f32.mrb[28].mxu1  ;;  %904 = vadd.xlane.f32.xlu1 %v4511_v26 }
 0x142   : > { %v3392_v34 = vpop.f32.mrb[29].mxu0  ;;  %v3440_v35 = vpop.f32.mrb[29].mxu1 }
 0x143   : > { %v3393_v37 = vadd.f32 %v3392_v34, %v3391_v31  ;;  %v3441_v38 = vadd.f32 %v3440_v35, %v3439_v32  ;;  %v3394_v39 = vpop.f32.mrb[30].mxu0  ;;  %v3442_v40 = vpop.f32.mrb[30].mxu1 }
 0x144   : > { %v3395_v41 = vpop.f32.mrb[31].mxu0  ;;  %v3443_v42 = vpop.f32.mrb[31].mxu1 }
 0x145   : > { %v3396_v43 = vadd.f32 %v3395_v41, %v3394_v39  ;;  %v3444_v44 = vadd.f32 %v3443_v42, %v3442_v40  ;;  %v4518_v51 = vadd.f32 %v3393_v37, %v4410_v36  ;;  %v4521_v52 = vadd.f32 %v3441_v38, %v4410_v36 }
 0x147   : > { %906 = vadd.xlane.f32.xlu0 %v4518_v51  ;;  %v4525_v54 = vadd.f32 %v3396_v43, %v4410_v36  ;;  %v4528_v55 = vadd.f32 %v3444_v44, %v4410_v36 }
 0x149   : > { %v3461_v56 = vpop.f32.mrb[32].mxu1  ;;  %908 = vadd.xlane.f32.xlu1 %v4525_v54 }
 0x14a   : > { %v3462_v57 = vpop.f32.mrb[33].mxu1 }
 0x14b   : > { %v3463_v59 = vadd.f32 %v3462_v57, %v3461_v56  ;;  %v3464_v63 = vpop.f32.mrb[34].mxu1 }
 0x14c   : > { %v3465_v4 = vpop.f32.mrb[35].mxu1 }
 0x14d   : > { %v3466_v8 = vadd.f32 %v3465_v4, %v3464_v63  ;;  %932 = vadd.xlane.f32.xlu1 %v4537_v0  ;;  %v4541_v9 = vadd.f32 %v3463_v59, %v4534_v58 }
 0x14f   : > { %1823 = vadd.xlane.f32.xlu0 %v4541_v9  ;;  %v4545_v11 = vadd.f32 %v3466_v8, %v4534_v58 }
 0x151   : > { %v3467_v10 = vpop.f32.mrb[36].mxu1 }
 0x152   : > { %v3468_v15 = vpop.f32.mrb[37].mxu1 }
 0x153   : > { %v3469_v16 = vadd.f32 %v3468_v15, %v3467_v10  ;;  %v3470_v18 = vpop.f32.mrb[38].mxu1  ;;  %1825 = vadd.xlane.f32.xlu0 %v4545_v11 }
 0x154   : > { %v3471_v36 = vpop.f32.mrb[39].mxu1 }
 0x155   : > { %v3472_v3 = vadd.f32 %v3471_v36, %v3470_v18  ;;  %v4554_v21 = vadd.f32 %v3469_v16, %v4534_v58 }
 0x157   : > { %930 = vadd.xlane.f32.xlu0 %v4495_v6  ;;  %v4550_v19 = vadd.f32 %v3472_v3, %v4534_v58 }
 0x159   : > { %v3473_v20 = vpop.f32.mrb[40].mxu1  ;;  %1829 = vadd.xlane.f32.xlu1 %v4550_v19 }
 0x15a   : > { %v3474_v22 = vpop.f32.mrb[41].mxu1 }
 0x15b   : > { %v3475_v23 = vadd.f32 %v3474_v22, %v3473_v20  ;;  %v3476_v31 = vpop.f32.mrb[42].mxu1  ;;  %1827 = vadd.xlane.f32.xlu0 %v4554_v21 }
 0x15c   : > { %v3477_v32 = vpop.f32.mrb[43].mxu1 }
 0x15d   : > { %v3478_v34 = vadd.f32 %v3477_v32, %v3476_v31  ;;  %v4558_v35 = vadd.f32 %v3475_v23, %v4534_v58 }
 0x15f   : > { %1831 = vadd.xlane.f32.xlu0 %v4558_v35  ;;  %v4562_v37 = vadd.f32 %v3478_v34, %v4534_v58 }
 0x161   : > { %v3479_v38 = vpop.f32.mrb[44].mxu1  ;;  %1833 = vadd.xlane.f32.xlu1 %v4562_v37 }
 0x162   : > { %v3480_v39 = vpop.f32.mrb[45].mxu1 }
 0x163   : > { %v3481_v40 = vadd.f32 %v3480_v39, %v3479_v38  ;;  %v3482_v41 = vpop.f32.mrb[46].mxu1 }
 0x164   : > { %v3483_v42 = vpop.f32.mrb[47].mxu1 }
 0x165   : > { %v3484_v43 = vadd.f32 %v3483_v42, %v3482_v41  ;;  %v4566_v44 = vadd.f32 %v3481_v40, %v4534_v58 }
 0x167   : > { %1835 = vadd.xlane.f32.xlu0 %v4566_v44  ;;  %v4570_v56 = vadd.f32 %v3484_v43, %v4534_v58 }
 0x169   : > { %v3485_v57 = vpop.f32.mrb[48].mxu1  ;;  %1837 = vadd.xlane.f32.xlu1 %v4570_v56 }
 0x16a   : > { %v3486_v59 = vpop.f32.mrb[49].mxu1 }
 0x16b   : > { %v3487_v63 = vadd.f32 %v3486_v59, %v3485_v57  ;;  %v3488_v4 = vpop.f32.mrb[50].mxu1 }
 0x16c   : > { %v3489_v8 = vpop.f32.mrb[51].mxu1 }
 0x16d   : > { %v3490_v10 = vadd.f32 %v3489_v8, %v3488_v4  ;;  %v4574_v15 = vadd.f32 %v3487_v63, %v4534_v58 }
 0x16f   : > { %1839 = vadd.xlane.f32.xlu0 %v4574_v15  ;;  %v4578_v16 = vadd.f32 %v3490_v10, %v4534_v58 }
 0x171   : > { %v3491_v18 = vpop.f32.mrb[52].mxu1  ;;  %1841 = vadd.xlane.f32.xlu1 %v4578_v16 }
 0x172   : > { %v3492_v36 = vpop.f32.mrb[53].mxu1 }
 0x173   : > { %v3493_v3 = vadd.f32 %v3492_v36, %v3491_v18  ;;  %v3494_v20 = vpop.f32.mrb[54].mxu1 }
 0x174   : > { %v3495_v22 = vpop.f32.mrb[55].mxu1 }
 0x175   : > { %v3496_v23 = vadd.f32 %v3495_v22, %v3494_v20  ;;  %v4582_v31 = vadd.f32 %v3493_v3, %v4534_v58 }
 0x177   : > { %1843 = vadd.xlane.f32.xlu0 %v4582_v31  ;;  %v4586_v32 = vadd.f32 %v3496_v23, %v4534_v58 }
 0x179   : > { %v3497_v34 = vpop.f32.mrb[56].mxu1  ;;  %1845 = vadd.xlane.f32.xlu1 %v4586_v32 }
 0x17a   : > { %v3498_v38 = vpop.f32.mrb[57].mxu1 }
 0x17b   : > { %v3499_v39 = vadd.f32 %v3498_v38, %v3497_v34  ;;  %v3500_v40 = vpop.f32.mrb[58].mxu1 }
 0x17c   : > { %v3501_v41 = vpop.f32.mrb[59].mxu1 }
 0x17d   : > { %v3502_v42 = vadd.f32 %v3501_v41, %v3500_v40  ;;  %v4590_v43 = vadd.f32 %v3499_v39, %v4534_v58 }
 0x17f   : > { %1847 = vadd.xlane.f32.xlu0 %v4590_v43  ;;  %v4594_v57 = vadd.f32 %v3502_v42, %v4534_v58 }
 0x181   : > { %v3503_v59 = vpop.f32.mrb[60].mxu1  ;;  %1849 = vadd.xlane.f32.xlu1 %v4594_v57 }
 0x182   : > { %v3504_v63 = vpop.f32.mrb[61].mxu1 }
 0x183   : > { %v3505_v4 = vadd.f32 %v3504_v63, %v3503_v59  ;;  %v3506_v8 = vpop.f32.mrb[62].mxu1 }
 0x184   : > { %v3507_v10 = vpop.f32.mrb[63].mxu1 }
 0x185   : > { %v3508_v18 = vadd.f32 %v3507_v10, %v3506_v8  ;;  %v4598_v36 = vadd.f32 %v3505_v4, %v4534_v58 }
 0x187   : > { %1851 = vadd.xlane.f32.xlu0 %v4598_v36  ;;  %v4602_v3 = vadd.f32 %v3508_v18, %v4534_v58 }
 0x189   : > { %v3509_v20 = vpop.f32.mrb[64].mxu1  ;;  %1853 = vadd.xlane.f32.xlu1 %v4602_v3 }
 0x18a   : > { %v3510_v22 = vpop.f32.mrb[65].mxu1 }
 0x18b   : > { %v3511_v23 = vadd.f32 %v3510_v22, %v3509_v20  ;;  %v3512_v34 = vpop.f32.mrb[66].mxu1 }
 0x18c   : > { %v3513_v38 = vpop.f32.mrb[67].mxu1 }
 0x18d   : > { %v3514_v39 = vadd.f32 %v3513_v38, %v3512_v34  ;;  %v4606_v40 = vadd.f32 %v3511_v23, %v4534_v58 }
 0x18f   : > { %1855 = vadd.xlane.f32.xlu0 %v4606_v40  ;;  %v4610_v41 = vadd.f32 %v3514_v39, %v4534_v58 }
 0x191   : > { %v3515_v42 = vpop.f32.mrb[68].mxu1  ;;  %1857 = vadd.xlane.f32.xlu1 %v4610_v41 }
 0x192   : > { %v3516_v59 = vpop.f32.mrb[69].mxu1 }
 0x193   : > { %v3517_v63 = vadd.f32 %v3516_v59, %v3515_v42  ;;  %v3518_v4 = vpop.f32.mrb[70].mxu1 }
 0x194   : > { %v3519_v8 = vpop.f32.mrb[71].mxu1 }
 0x195   : > { %v3520_v10 = vadd.f32 %v3519_v8, %v3518_v4  ;;  %v4614_v18 = vadd.f32 %v3517_v63, %v4534_v58 }
 0x197   : > { %1859 = vadd.xlane.f32.xlu0 %v4614_v18  ;;  %v4618_v20 = vadd.f32 %v3520_v10, %v4534_v58 }
 0x199   : > { %v3521_v22 = vpop.f32.mrb[72].mxu1  ;;  %1861 = vadd.xlane.f32.xlu1 %v4618_v20 }
 0x19a   : > { %v3522_v23 = vpop.f32.mrb[73].mxu1 }
 0x19b   : > { %v3523_v34 = vadd.f32 %v3522_v23, %v3521_v22  ;;  %v3524_v38 = vpop.f32.mrb[74].mxu1 }
 0x19c   : > { %v3525_v39 = vpop.f32.mrb[75].mxu1  ;;  %v879_v42 = vpop.xlane.xlu1 %878 }
 0x19d   : > { %v3526_v0 = vadd.f32 %v3525_v39, %v3524_v38  ;;  %v4622_v59 = vadd.f32 %v3523_v34, %v4534_v58  ;;  %v943_v4 = vmul.f32 0.0078125, %v879_v42  ;;  %v4628_v8 = vpop.xlane.xlu0 %910 }
 0x19f   : > { %5908 = vst [vmem:[#allocation13_spill] sm:$0xff] %v4622_v59  ;;  %1863 = vadd.xlane.f32.xlu0 %v4622_v59  ;;  %v4626_v63 = vadd.f32 %v3526_v0, %v4534_v58  ;;  %v4631_v10 = vsub.f32 %v4416_v46, %v943_v4 }
 0x1a0   : > { %v881_v6 = vpop.xlane.xlu1 %880 }
 0x1a1   : > { %5909 = vst [vmem:[#allocation14_spill] sm:$0xff] %v4626_v63  ;;  %5910 = vst [vmem:[#allocation15_spill] sm:$0xff] %v4631_v10  ;;  %v3527_v22 = vpop.f32.mrb[76].mxu1  ;;  %1865 = vadd.xlane.f32.xlu1 %v4626_v63  ;;  %v944_v23 = vmul.f32 0.0078125, %v881_v6  ;;  %v1007_v34 = vmul.f32 %v4631_v10, %v4631_v10 }
 0x1a2   : > { %v3528_v38 = vpop.f32.mrb[77].mxu1 }
 0x1a3   : > { %v3529_v39 = vadd.f32 %v3528_v38, %v3527_v22  ;;  %v3530_v42 = vpop.f32.mrb[78].mxu1  ;;  %1039 = vadd.xlane.f32.xlu0 %v1007_v34  ;;  %v4637_v53 = vsub.f32 %v4421_v47, %v944_v23 }
 0x1a4   : > { %v883_v2 = vpop.xlane.xlu0 %882  ;;  %v3531_v0 = vpop.f32.mrb[79].mxu1 }
 0x1a5   : > { %5911 = vst [vmem:[#allocation16_spill] sm:$0xff] %v4637_v53  ;;  %v945_v49 = vmul.f32 0.0078125, %v883_v2  ;;  %v4639_v46 = vpop.xlane.xlu1 %912  ;;  %v3532_v4 = vadd.f32 %v3531_v0, %v3530_v42  ;;  %v4642_v33 = vadd.f32 %v3529_v39, %v4534_v58  ;;  %v1008_v6 = vmul.f32 %v4637_v53, %v4637_v53 }
 0x1a7   : > { %5912 = vst [vmem:[#allocation17_spill] sm:$0xff] %v4642_v33  ;;  %v4647_v10 = vsub.f32 %v4425_v60, %v945_v49  ;;  %1867 = vadd.xlane.f32.xlu0 %v4642_v33  ;;  %1041 = vadd.xlane.f32.xlu1 %v1008_v6  ;;  %v4653_v47 = vadd.f32 %v3532_v4, %v4534_v58 }
 0x1a8   : > { %v4650_v22 = vpop.xlane.xlu0 %914 }
 0x1a9   : > { %5913 = vst [vmem:[#allocation18_spill] sm:$0xff] %v4647_v10  ;;  %5914 = vst [vmem:[#allocation19_spill] sm:$0xff] %v4653_v47  ;;  %v885_v2 = vpop.xlane.xlu1 %884  ;;  %v3533_v23 = vpop.f32.mrb[80].mxu1  ;;  %v1009_v38 = vmul.f32 %v4647_v10, %v4647_v10 }
 0x1aa   : > { %v946_v34 = vmul.f32 0.0078125, %v885_v2  ;;  %v3534_v39 = vpop.f32.mrb[81].mxu1 }
 0x1ab   : > { %v3535_v42 = vadd.f32 %v3534_v39, %v3533_v23  ;;  %v3536_v0 = vpop.f32.mrb[82].mxu1  ;;  %1043 = vadd.xlane.f32.xlu0 %v1009_v38  ;;  %1869 = vadd.xlane.f32.xlu1 %v4653_v47 }
 0x1ac   : > { %v887_v60 = vpop.xlane.xlu0 %886  ;;  %v3537_v49 = vpop.f32.mrb[83].mxu1  ;;  %v4659_v6 = vsub.f32 %v4433_v62, %v946_v34 }
 0x1ad   : > { %v947_v53 = vmul.f32 0.0078125, %v887_v60  ;;  %v4661_v4 = vpop.xlane.xlu1 %916  ;;  %v3538_v33 = vadd.f32 %v3537_v49, %v3536_v0  ;;  %v4664_v29 = vadd.f32 %v3535_v42, %v4534_v58 }
 0x1ae   : > { %5915 = vst [vmem:[#allocation20_spill] sm:$0xff] %v4659_v6  ;;  %v1010_v2 = vmul.f32 %v4659_v6, %v4659_v6 }
 0x1af   : > { %5916 = vst [vmem:[#allocation21_spill] sm:$0xff] %v4664_v29  ;;  %v4669_v23 = vsub.f32 %v4441_v12, %v947_v53  ;;  %1871 = vadd.xlane.f32.xlu0 %v4664_v29  ;;  %v4675_v62 = vadd.f32 %v3538_v33, %v4534_v58 }
 0x1b0   : > { %1045 = vadd.xlane.f32.xlu1 %v1010_v2  ;;  %v4672_v38 = vpop.xlane.xlu0 %918 }
 0x1b1   : > { %5917 = vst [vmem:[#allocation22_spill] sm:$0xff] %v4669_v23  ;;  %5918 = vst [vmem:[#allocation23_spill] sm:$0xff] %v4672_v38  ;;  %v889_v34 = vpop.xlane.xlu1 %888  ;;  %v3539_v39 = vpop.f32.mrb[84].mxu1  ;;  %v1011_v42 = vmul.f32 %v4669_v23, %v4669_v23 }
 0x1b2   : > { %5919 = vst [vmem:[#allocation24_spill] sm:$0xff] %v4675_v62  ;;  %v948_v0 = vmul.f32 0.0078125, %v889_v34  ;;  %v3540_v60 = vpop.f32.mrb[85].mxu1 }
 0x1b3   : > { %v3541_v49 = vadd.f32 %v3540_v60, %v3539_v39  ;;  %v3542_v6 = vpop.f32.mrb[86].mxu1  ;;  %1047 = vadd.xlane.f32.xlu0 %v1011_v42 }
 0x1b4   : > { %1873 = vadd.xlane.f32.xlu1 %v4675_v62  ;;  %v891_v12 = vpop.xlane.xlu0 %890  ;;  %v3543_v53 = vpop.f32.mrb[87].mxu1  ;;  %v4681_v2 = vsub.f32 %v4449_v14, %v948_v0 }
 0x1b5   : > { %v949_v10 = vmul.f32 0.0078125, %v891_v12  ;;  %v4683_v33 = vpop.xlane.xlu1 %920  ;;  %v3544_v29 = vadd.f32 %v3543_v53, %v3542_v6  ;;  %v4686_v47 = vadd.f32 %v3541_v49, %v4534_v58 }
 0x1b6   : > { %5920 = vst [vmem:[#allocation25_spill] sm:$0xff] %v4681_v2  ;;  %5921 = vst [vmem:[#allocation26_spill] sm:$0xff] %v4683_v33  ;;  %v1012_v34 = vmul.f32 %v4681_v2, %v4681_v2 }
 0x1b7   : > { %5922 = vst [vmem:[#allocation27_spill] sm:$0xff] %v4686_v47  ;;  %v4691_v39 = vsub.f32 %v4457_v28, %v949_v10  ;;  %1875 = vadd.xlane.f32.xlu0 %v4686_v47  ;;  %v4695_v42 = vadd.f32 %v3544_v29, %v4534_v58 }
 0x1b8   : > { %1049 = vadd.xlane.f32.xlu1 %v1012_v34  ;;  %v4705_v29 = vpop.xlane.xlu0 %922 }
 0x1b9   : > { %5923 = vst [vmem:[#allocation28_spill] sm:$0xff] %v4691_v39  ;;  %5924 = vst [vmem:[#allocation29_spill] sm:$0xff] %v4695_v42  ;;  %v893_v14 = vpop.xlane.xlu1 %892  ;;  %v1013_v0 = vmul.f32 %v4691_v39, %v4691_v39  ;;  %v3545_v6 = vpop.f32.mrb[88].mxu1 }
 0x1ba   : > { %v950_v60 = vmul.f32 0.0078125, %v893_v14  ;;  %v3546_v49 = vpop.f32.mrb[89].mxu1  ;;  %5926 = vst [vmem:[#allocation31_spill] sm:$0xff] %v4705_v29 }
 0x1bb   : > { %v4699_v12 = vadd.f32 %v3546_v49, %v3545_v6  ;;  %v3548_v53 = vpop.f32.mrb[90].mxu1  ;;  %1051 = vadd.xlane.f32.xlu0 %v1013_v0 }
 0x1bc   : > { %1877 = vadd.xlane.f32.xlu1 %v4695_v42  ;;  %v4703_v28 = vsub.f32 %v4465_v30, %v950_v60  ;;  %v3549_v10 = vpop.f32.mrb[91].mxu1  ;;  %v895_v2 = vpop.xlane.xlu0 %894 }
 0x1bd   : > { %v3550_v34 = vadd.f32 %v3549_v10, %v3548_v53  ;;  %v4709_v14 = vpop.xlane.xlu1 %924 }
 0x1be   : > { %5925 = vst [vmem:[#allocation30_spill] sm:$0xff] %v4703_v28  ;;  %v1014_v23 = vmul.f32 %v4703_v28, %v4703_v28  ;;  %5927 = vst [vmem:[#allocation32_spill] sm:$0xff] %v4709_v14 }
 0x1c0   : > { %1053 = vadd.xlane.f32.xlu1 %v1014_v23  ;;  %v4715_v60 = vpop.xlane.xlu0 %926 }
 0x1c1   : > { %v3551_v39 = vpop.f32.mrb[92].mxu1  ;;  %v897_v30 = vpop.xlane.xlu1 %896  ;;  %5928 = vst [vmem:[#allocation33_spill] sm:$0xff] %v4715_v60  ;;  %v951_v60 = vmul.f32 0.0078125, %v895_v2 }
 0x1c2   : > { %v3552_v6 = vpop.f32.mrb[93].mxu1  ;;  %v952_v63 = vmul.f32 0.0078125, %v897_v30 }
 0x1c3   : > { %v4711_v49 = vadd.f32 %v3552_v6, %v3551_v39  ;;  %v3554_v0 = vpop.f32.mrb[94].mxu1  ;;  %v3853_v39 = vld [vmem:[%s5847_s6 + $0x40] sm:$0xff]  }
 0x1c4   : > { %v3555_v42 = vpop.f32.mrb[95].mxu1  ;;  %v4719_v10 = vpop.xlane.xlu0 %898  ;;  %3557 = vmatprep.subr.bf16.mxu0 %v3853_v39  ;;  %v4743_v39 = vsub.f32 %v4473_v48, %v951_v60 }
 0x1c5   : > { %v4713_v47 = vadd.f32 %v3555_v42, %v3554_v0  ;;  %v4717_v53 = vpop.xlane.xlu1 %928  ;;  %v3854_v42 = vld [vmem:[%s5847_s6] sm:$0xff]  }
 0x1c6   : > { %5929 = vst [vmem:[#allocation34_spill] sm:$0xff] %v4717_v53  ;;  %3558 = vmatpush3.bf16.msra.mxu0 %v3854_v42  ;;  %5930 = vst [vmem:[#allocation35_spill] sm:$0xff] %v4743_v39 }
 0x1c9   : > { %v4721_v28 = vpop.xlane.xlu1 %900 }
 0x1cc   : > { %v4723_v23 = vpop.xlane.xlu0 %902 }
 0x1ce   : > { %v4731_v6 = vpop.xlane.xlu1 %904 }
 0x1d4   : > { %v4733_v0 = vpop.xlane.xlu0 %906 }
 0x1d6   : > { %v4735_v62 = vpop.xlane.xlu1 %908 }
 0x1da   : > { %v4745_v42 = vpop.xlane.xlu1 %932 }
 0x1dc   : > { %v1824_v53 = vpop.xlane.xlu0 %1823 }
 0x1dd   : > { %v1887_v14 = vmul.f32 0.0078125, %v1824_v53 }
 0x1df   : > { %v4738_v29 = vsub.f32 %v4541_v9, %v1887_v14  ;;  %v1015_v9 = vmul.f32 %v4743_v39, %v4743_v39  ;;  %v4757_v14 = vsub.f32 %v4481_v50, %v952_v63 }
 0x1e0   : > { %v1826_v17 = vpop.xlane.xlu0 %1825 }
 0x1e1   : > { %v1888_v59 = vmul.f32 0.0078125, %v1826_v17  ;;  %v1951_v33 = vmul.f32 %v4738_v29, %v4738_v29 }
 0x1e3   : > { %1983 = vadd.xlane.f32.xlu0 %v1951_v33  ;;  %v4748_v38 = vsub.f32 %v4545_v11, %v1888_v59  ;;  %v1016_v11 = vmul.f32 %v4757_v14, %v4757_v14 }
 0x1e4   : > { %v4750_v2 = vpop.xlane.xlu0 %930 }
 0x1e5   : > { %5931 = vst [vmem:[#allocation36_spill] sm:$0xff] %v4748_v38  ;;  %v1952_v17 = vmul.f32 %v4748_v38, %v4748_v38 }
 0x1e6   : > { %v1830_v30 = vpop.xlane.xlu1 %1829 }
 0x1e7   : > { %v1890_v48 = vmul.f32 0.0078125, %v1830_v30  ;;  %1055 = vadd.xlane.f32.xlu0 %v1015_v9  ;;  %1985 = vadd.xlane.f32.xlu1 %v1952_v17  ;;  %v4776_v30 = vadd.f32 %v3550_v34, %v4534_v58 }
 0x1e8   : > { %v1828_v60 = vpop.xlane.xlu0 %1827 }
 0x1e9   : > { %v1889_v33 = vmul.f32 0.0078125, %v1828_v60  ;;  %v4762_v59 = vsub.f32 %v4550_v19, %v1890_v48  ;;  %v4773_v19 = vadd.f32 %v4699_v12, %v4534_v58  ;;  %v3855_v48 = vld [vmem:[%s5847_s6 + $0x48] sm:$0xff]  }
 0x1ea   : > { %v3856_v12 = vld [vmem:[%s5847_s6 + $0x8] sm:$0xff]   ;;  %3559 = vmatprep.subr.bf16.mxu0 %v3855_v48 }
 0x1eb   : > { %1057 = vadd.xlane.f32.xlu1 %v1016_v11  ;;  %v4765_v53 = vsub.f32 %v4554_v21, %v1889_v33  ;;  %v1954_v63 = vmul.f32 %v4762_v59, %v4762_v59  ;;  %3560 = vmatpush3.bf16.msra.mxu0 %v3856_v12  ;;  %v3857_v33 = vld [vmem:[%s5847_s6 + $0x50] sm:$0xff]   ;;  %v3859_v12 = vld [vmem:[%s5847_s6 + $0x58] sm:$0xff]  }
 0x1ec   : > { %v1832_v39 = vpop.xlane.xlu0 %1831  ;;  %3561 = vmatprep.subr.bf16.mxu0 %v3857_v33 }
 0x1ed   : > { %v1891_v38 = vmul.f32 0.0078125, %v1832_v39  ;;  %v1953_v50 = vmul.f32 %v4765_v53, %v4765_v53 }
 0x1ee   : > { %v1834_v9 = vpop.xlane.xlu1 %1833 }
 0x1ef   : > { %v1892_v17 = vmul.f32 0.0078125, %v1834_v9  ;;  %1987 = vadd.xlane.f32.xlu0 %v1953_v50  ;;  %1989 = vadd.xlane.f32.xlu1 %v1954_v63  ;;  %v4779_v21 = vsub.f32 %v4558_v35, %v1891_v38  ;;  %v3858_v50 = vld [vmem:[%s5847_s6 + $0x10] sm:$0xff]   ;;  %v953_v63 = vmul.f32 0.0078125, %v4719_v10  ;;  %v954_v9 = vmul.f32 0.0078125, %v4721_v28  ;;  %v3860_v10 = vld [vmem:[%s5847_s6 + $0x18] sm:$0xff]  }
 0x1f0   : > { %3562 = vmatpush3.bf16.msra.mxu0 %v3858_v50 }
 0x1f1   : > { %v4782_v39 = vsub.f32 %v4562_v37, %v1892_v17  ;;  %v1955_v35 = vmul.f32 %v4779_v21, %v4779_v21  ;;  %3563 = vmatprep.subr.bf16.mxu0 %v3859_v12  ;;  %v3864_v12 = vld [vmem:[%s5847_s6 + $0x28] sm:$0xff]  }
 0x1f3   : > { %1879 = vadd.xlane.f32.xlu0 %v4773_v19  ;;  %1881 = vadd.xlane.f32.xlu1 %v4776_v30  ;;  %v1956_v37 = vmul.f32 %v4782_v39, %v4782_v39 }
 0x1f4   : > { %v1836_v34 = vpop.xlane.xlu0 %1835  ;;  %3564 = vmatpush3.bf16.msra.mxu0 %v3860_v10 }
 0x1f5   : > { %v1893_v60 = vmul.f32 0.0078125, %v1836_v34 }
 0x1f6   : > { %v1838_v38 = vpop.xlane.xlu1 %1837 }
 0x1f7   : > { %v1894_v11 = vmul.f32 0.0078125, %v1838_v38  ;;  %1991 = vadd.xlane.f32.xlu0 %v1955_v35  ;;  %1993 = vadd.xlane.f32.xlu1 %v1956_v37  ;;  %v4805_v17 = vsub.f32 %v4566_v44, %v1893_v60  ;;  %v4819_v44 = vsub.f32 %v4492_v5, %v953_v63  ;;  %v4826_v35 = vsub.f32 %v4500_v7, %v954_v9  ;;  %v3861_v38 = vld [vmem:[%s5847_s6 + $0x60] sm:$0xff]   ;;  %v3863_v9 = vld [vmem:[%s5847_s6 + $0x68] sm:$0xff]  }
 0x1f8   : > { %v3862_v5 = vld [vmem:[%s5847_s6 + $0x20] sm:$0xff]   ;;  %3565 = vmatprep.subr.bf16.mxu0 %v3861_v38  ;;  %v4862_v38 = vadd.f32 %v4711_v49, %v4534_v58 }
 0x1f9   : > { %v4808_v48 = vsub.f32 %v4570_v56, %v1894_v11  ;;  %v1957_v34 = vmul.f32 %v4805_v17, %v4805_v17  ;;  %v1017_v11 = vmul.f32 %v4819_v44, %v4819_v44  ;;  %v1018_v7 = vmul.f32 %v4826_v35, %v4826_v35  ;;  %3566 = vmatpush3.bf16.msra.mxu0 %v3862_v5 }
 0x1fa   : > { %3567 = vmatprep.subr.bf16.mxu0 %v3863_v9 }
 0x1fb   : > { %934 = vadd.xlane.f32.xlu0 %v4507_v25  ;;  %936 = vadd.xlane.f32.xlu1 %v4514_v27  ;;  %v1958_v60 = vmul.f32 %v4808_v48, %v4808_v48 }
 0x1fc   : > { %v1840_v28 = vpop.xlane.xlu0 %1839 }
 0x1fd   : > { %v1895_v56 = vmul.f32 0.0078125, %v1840_v28  ;;  %3568 = vmatpush3.bf16.msra.mxu0 %v3864_v12 }
 0x1fe   : > { %v1842_v37 = vpop.xlane.xlu1 %1841 }
 0x1ff   : > { %v1896_v33 = vmul.f32 0.0078125, %v1842_v37  ;;  %1995 = vadd.xlane.f32.xlu0 %v1957_v34  ;;  %1997 = vadd.xlane.f32.xlu1 %v1958_v60  ;;  %v4839_v50 = vsub.f32 %v4574_v15, %v1895_v56  ;;  %v3865_v34 = vld [vmem:[%s5847_s6 + $0x70] sm:$0xff]  }
 0x200   : > { %v3866_v37 = vld [vmem:[%s5847_s6 + $0x30] sm:$0xff]   ;;  %3569 = vmatprep.subr.bf16.mxu0 %v3865_v34 }
 0x201   : > { %v4842_v63 = vsub.f32 %v4578_v16, %v1896_v33  ;;  %v1959_v15 = vmul.f32 %v4839_v50, %v4839_v50  ;;  %v4866_v33 = vadd.f32 %v4713_v47, %v4534_v58  ;;  %3570 = vmatpush3.bf16.msra.mxu0 %v3866_v37  ;;  %v3868_v58 = vld [vmem:[%s5847_s6 + $0x38] sm:$0xff]  }
 0x203   : > { %1059 = vadd.xlane.f32.xlu0 %v1017_v11  ;;  %1061 = vadd.xlane.f32.xlu1 %v1018_v7  ;;  %v1960_v16 = vmul.f32 %v4842_v63, %v4842_v63  ;;  %v3867_v7 = vld [vmem:[%s5847_s6 + $0x78] sm:$0xff]  }
 0x204   : > { %v1844_v10 = vpop.xlane.xlu0 %1843  ;;  %3571 = vmatprep.subr.bf16.mxu0 %v3867_v7  ;;  %v957_v7 = vmul.f32 0.0078125, %v4733_v0 }
 0x205   : > { %v1897_v28 = vmul.f32 0.0078125, %v1844_v10  ;;  %3572 = vmatpush3.bf16.msra.mxu0 %v3868_v58  ;;  %v955_v10 = vmul.f32 0.0078125, %v4723_v23  ;;  %v958_v58 = vmul.f32 0.0078125, %v4735_v62 }
 0x206   : > { %v1846_v56 = vpop.xlane.xlu1 %1845 }
 0x207   : > { %v1898_v60 = vmul.f32 0.0078125, %v1846_v56  ;;  %1999 = vadd.xlane.f32.xlu0 %v1959_v15  ;;  %2001 = vadd.xlane.f32.xlu1 %v1960_v16  ;;  %v4869_v5 = vsub.f32 %v4582_v31, %v1897_v28  ;;  %v956_v28 = vmul.f32 0.0078125, %v4731_v6  ;;  %v4897_v34 = vsub.f32 %v4504_v24, %v955_v10 }
 0x209   : > { %v4872_v11 = vsub.f32 %v4586_v32, %v1898_v60  ;;  %v1961_v32 = vmul.f32 %v4869_v5, %v4869_v5  ;;  %v1019_v24 = vmul.f32 %v4897_v34, %v4897_v34 }
 0x20b   : > { %1883 = vadd.xlane.f32.xlu0 %v4862_v38  ;;  %1885 = vadd.xlane.f32.xlu1 %v4866_v33  ;;  %v1962_v49 = vmul.f32 %v4872_v11, %v4872_v11 }
 0x20c   : > { %v1848_v47 = vpop.xlane.xlu0 %1847 }
 0x20d   : > { %v1899_v31 = vmul.f32 0.0078125, %v1848_v47 }
 0x20e   : > { %v1850_v9 = vpop.xlane.xlu1 %1849 }
 0x20f   : > { %v1900_v12 = vmul.f32 0.0078125, %v1850_v9  ;;  %2003 = vadd.xlane.f32.xlu0 %v1961_v32  ;;  %2005 = vadd.xlane.f32.xlu1 %v1962_v49  ;;  %v4889_v15 = vsub.f32 %v4590_v43, %v1899_v31  ;;  %v4904_v43 = vsub.f32 %v4511_v26, %v956_v28  ;;  %v4919_v49 = vsub.f32 %v4518_v51, %v957_v7 }
 0x210   : > { %v960_v28 = vmul.f32 0.0078125, %v4639_v46 }
 0x211   : > { %v4892_v16 = vsub.f32 %v4594_v57, %v1900_v12  ;;  %v1963_v23 = vmul.f32 %v4889_v15, %v4889_v15  ;;  %v1020_v47 = vmul.f32 %v4904_v43, %v4904_v43  ;;  %v4926_v12 = vsub.f32 %v4525_v54, %v958_v58 }
 0x212   : > { %v1021_v51 = vmul.f32 %v4919_v49, %v4919_v49  ;;  %v4944_v46 = vsub.f32 %v4428_v61, %v960_v28 }
 0x213   : > { %938 = vadd.xlane.f32.xlu0 %v4521_v52  ;;  %940 = vadd.xlane.f32.xlu1 %v4528_v55  ;;  %v1964_v6 = vmul.f32 %v4892_v16, %v4892_v16 }
 0x214   : > { %v1852_v56 = vpop.xlane.xlu0 %1851 }
 0x215   : > { %v1901_v60 = vmul.f32 0.0078125, %v1852_v56  ;;  %v1022_v56 = vmul.f32 %v4926_v12, %v4926_v12 }
 0x216   : > { %v1854_v57 = vpop.xlane.xlu1 %1853 }
 0x217   : > { %v1902_v37 = vmul.f32 0.0078125, %v1854_v57  ;;  %2007 = vadd.xlane.f32.xlu0 %v1963_v23  ;;  %2009 = vadd.xlane.f32.xlu1 %v1964_v6  ;;  %v4913_v31 = vsub.f32 %v4598_v36, %v1901_v60 }
 0x219   : > { %v4916_v26 = vsub.f32 %v4602_v3, %v1902_v37  ;;  %v1965_v9 = vmul.f32 %v4913_v31, %v4913_v31  ;;  %v959_v3 = vmul.f32 0.0078125, %v4628_v8 }
 0x21b   : > { %1063 = vadd.xlane.f32.xlu0 %v1019_v24  ;;  %1065 = vadd.xlane.f32.xlu1 %v1020_v47  ;;  %v1966_v62 = vmul.f32 %v4916_v26, %v4916_v26  ;;  %v4941_v23 = vsub.f32 %v4413_v45, %v959_v3  ;;  %v962_v24 = vmul.f32 0.0078125, %v4661_v4  ;;  %v1024_v47 = vmul.f32 %v4944_v46, %v4944_v46  ;;  %v5937_v3 = vld [vmem:[#allocation26_spill] sm:$0xff] }
 0x21c   : > { %v1856_v32 = vpop.xlane.xlu0 %1855  ;;  %v964_v28 = vmul.f32 0.0078125, %v5937_v3 }
 0x21d   : > { %v1903_v0 = vmul.f32 0.0078125, %v1856_v32  ;;  %v1023_v45 = vmul.f32 %v4941_v23, %v4941_v23 }
 0x21e   : > { %v1858_v36 = vpop.xlane.xlu1 %1857 }
 0x21f   : > { %v1904_v10 = vmul.f32 0.0078125, %v1858_v36  ;;  %2011 = vadd.xlane.f32.xlu0 %v1965_v9  ;;  %2013 = vadd.xlane.f32.xlu1 %v1966_v62  ;;  %v4935_v60 = vsub.f32 %v4606_v40, %v1903_v0  ;;  %v4966_v0 = vsub.f32 %v4444_v13, %v962_v24  ;;  %v5936_v36 = vld [vmem:[#allocation23_spill] sm:$0xff]  ;;  %v5938_v13 = vld [vmem:[#allocation13_spill] sm:$0xff] }
 0x221   : > { %v4938_v54 = vsub.f32 %v4610_v41, %v1904_v10  ;;  %v1967_v57 = vmul.f32 %v4935_v60, %v4935_v60  ;;  %v961_v41 = vmul.f32 0.0078125, %v4650_v22  ;;  %5935 = vst [vmem:[#allocation40_spill] sm:$0xff] %v4966_v0  ;;  %v963_v10 = vmul.f32 0.0078125, %v5936_v36 }
 0x223   : > { %1067 = vadd.xlane.f32.xlu0 %v1021_v51  ;;  %1069 = vadd.xlane.f32.xlu1 %v1022_v56  ;;  %v1968_v40 = vmul.f32 %v4938_v54, %v4938_v54  ;;  %v4963_v32 = vsub.f32 %v4436_v1, %v961_v41  ;;  %v5940_v56 = vld [vmem:[#allocation14_spill] sm:$0xff] }
 0x224   : > { %v1860_v8 = vpop.xlane.xlu0 %1859 }
 0x225   : > { %v1905_v6 = vmul.f32 0.0078125, %v1860_v8  ;;  %5934 = vst [vmem:[#allocation39_spill] sm:$0xff] %v4963_v32  ;;  %v1025_v1 = vmul.f32 %v4963_v32, %v4963_v32 }
 0x226   : > { %v1862_v37 = vpop.xlane.xlu1 %1861 }
 0x227   : > { %v1906_v7 = vmul.f32 0.0078125, %v1862_v37  ;;  %2015 = vadd.xlane.f32.xlu0 %v1967_v57  ;;  %2017 = vadd.xlane.f32.xlu1 %v1968_v40  ;;  %v4955_v61 = vsub.f32 %v4614_v18, %v1905_v6  ;;  %v1026_v57 = vmul.f32 %v4966_v0, %v4966_v0  ;;  %v5942_v40 = vld [vmem:[#allocation5_spill] sm:$0xff] }
 0x228   : > { %v4987_v37 = vsub.f32 %v5942_v40, %v963_v10 }
 0x229   : > { %5932 = vst [vmem:[#allocation37_spill] sm:$0xff] %v4955_v61  ;;  %v4958_v58 = vsub.f32 %v4618_v20, %v1906_v7  ;;  %v1969_v18 = vmul.f32 %v4955_v61, %v4955_v61  ;;  %v5944_v7 = vld [vmem:[#allocation6_spill] sm:$0xff] }
 0x22a   : > { %5943 = vst [vmem:[#allocation13_spill] sm:$0xff] %v4987_v37  ;;  %v4990_v41 = vsub.f32 %v5944_v7, %v964_v28  ;;  %v5949_v28 = vld [vmem:[#allocation32_spill] sm:$0xff]  ;;  %v5952_v7 = vld [vmem:[#allocation7_spill] sm:$0xff] }
 0x22b   : > { %5933 = vst [vmem:[#allocation38_spill] sm:$0xff] %v4958_v58  ;;  %1071 = vadd.xlane.f32.xlu0 %v1023_v45  ;;  %1073 = vadd.xlane.f32.xlu1 %v1024_v47  ;;  %v1970_v20 = vmul.f32 %v4958_v58, %v4958_v58 }
 0x22c   : > { %v1864_v22 = vpop.xlane.xlu0 %1863  ;;  %5945 = vst [vmem:[#allocation14_spill] sm:$0xff] %v4990_v41  ;;  %v1028_v3 = vmul.f32 %v4990_v41, %v4990_v41 }
 0x22d   : > { %v1907_v9 = vmul.f32 0.0078125, %v1864_v22 }
 0x22e   : > { %v1866_v4 = vpop.xlane.xlu1 %1865 }
 0x22f   : > { %v1908_v62 = vmul.f32 0.0078125, %v1866_v4  ;;  %2019 = vadd.xlane.f32.xlu0 %v1969_v18  ;;  %2021 = vadd.xlane.f32.xlu1 %v1970_v20  ;;  %v4977_v51 = vsub.f32 %v5938_v13, %v1907_v9  ;;  %v5946_v18 = vld [vmem:[#allocation31_spill] sm:$0xff]  ;;  %v5947_v4 = vld [vmem:[#allocation17_spill] sm:$0xff]  ;;  %v966_v13 = vmul.f32 0.0078125, %v5949_v28 }
 0x230   : > { %v4982_v6 = vpop.xlane.xlu0 %1039  ;;  %v965_v20 = vmul.f32 0.0078125, %v5946_v18  ;;  %v5954_v18 = vld [vmem:[#allocation8_spill] sm:$0xff]  ;;  %v5957_v28 = vld [vmem:[#allocation21_spill] sm:$0xff] }
 0x231   : > { %5939 = vst [vmem:[#allocation23_spill] sm:$0xff] %v4977_v51  ;;  %v4980_v8 = vsub.f32 %v5940_v56, %v1908_v62  ;;  %v1971_v47 = vmul.f32 %v4977_v51, %v4977_v51 }
 0x233   : > { %5941 = vst [vmem:[#allocation26_spill] sm:$0xff] %v4980_v8  ;;  %1075 = vadd.xlane.f32.xlu0 %v1025_v1  ;;  %1077 = vadd.xlane.f32.xlu1 %v1026_v57  ;;  %v1972_v22 = vmul.f32 %v4980_v8, %v4980_v8  ;;  %v1027_v1 = vmul.f32 %v4987_v37, %v4987_v37  ;;  %v5950_v57 = vld [vmem:[#allocation19_spill] sm:$0xff] }
 0x234   : > { %v1868_v45 = vpop.xlane.xlu0 %1867  ;;  %v4992_v24 = vpop.xlane.xlu1 %1041 }
 0x235   : > { %v1909_v9 = vmul.f32 0.0078125, %v1868_v45  ;;  %v5013_v45 = vsub.f32 %v5952_v7, %v965_v20 }
 0x237   : > { %2023 = vadd.xlane.f32.xlu0 %v1971_v47  ;;  %2025 = vadd.xlane.f32.xlu1 %v1972_v22  ;;  %v5000_v62 = vsub.f32 %v5947_v4, %v1909_v9  ;;  %5953 = vst [vmem:[#allocation31_spill] sm:$0xff] %v5013_v45  ;;  %v5018_v4 = vsub.f32 %v5954_v18, %v966_v13 }
 0x238   : > { %v5002_v36 = vpop.xlane.xlu0 %1043  ;;  %v1870_v10 = vpop.xlane.xlu1 %1869  ;;  %v1029_v7 = vmul.f32 %v5013_v45, %v5013_v45  ;;  %v5964_v45 = vld [vmem:[#allocation10_spill] sm:$0xff] }
 0x239   : > { %5948 = vst [vmem:[#allocation5_spill] sm:$0xff] %v5000_v62  ;;  %v1910_v56 = vmul.f32 0.0078125, %v1870_v10  ;;  %v1973_v9 = vmul.f32 %v5000_v62, %v5000_v62  ;;  %5955 = vst [vmem:[#allocation17_spill] sm:$0xff] %v5018_v4  ;;  %v5959_v62 = vld [vmem:[#allocation34_spill] sm:$0xff] }
 0x23a   : > { %v968_v13 = vmul.f32 0.0078125, %v5959_v62 }
 0x23b   : > { %1079 = vadd.xlane.f32.xlu0 %v1027_v1  ;;  %1081 = vadd.xlane.f32.xlu1 %v1028_v3  ;;  %v5010_v40 = vsub.f32 %v5950_v57, %v1910_v56  ;;  %v5956_v1 = vld [vmem:[#allocation33_spill] sm:$0xff] }
 0x23c   : > { %v1872_v47 = vpop.xlane.xlu0 %1871  ;;  %v967_v3 = vmul.f32 0.0078125, %v5956_v1  ;;  %v5962_v1 = vld [vmem:[#allocation9_spill] sm:$0xff]  ;;  %v5042_v8 = vsub.f32 %v5964_v45, %v968_v13 }
 0x23d   : > { %5951 = vst [vmem:[#allocation6_spill] sm:$0xff] %v5010_v40  ;;  %v1046_v22 = vpop.xlane.xlu1 %1045  ;;  %v1911_v41 = vmul.f32 0.0078125, %v1872_v47  ;;  %v1974_v10 = vmul.f32 %v5010_v40, %v5010_v40  ;;  %v1030_v47 = vmul.f32 %v5018_v4, %v5018_v4  ;;  %v5968_v13 = vld [vmem:[#allocation29_spill] sm:$0xff] }
 0x23e   : > { %5965 = vst [vmem:[#allocation8_spill] sm:$0xff] %v5042_v8  ;;  %v1032_v45 = vmul.f32 %v5042_v8, %v5042_v8 }
 0x23f   : > { %2027 = vadd.xlane.f32.xlu0 %v1973_v9  ;;  %2029 = vadd.xlane.f32.xlu1 %v1974_v10  ;;  %v5024_v56 = vsub.f32 %v5957_v28, %v1911_v41  ;;  %v5960_v9 = vld [vmem:[#allocation24_spill] sm:$0xff]  ;;  %v5037_v41 = vsub.f32 %v5962_v1, %v967_v3  ;;  %v970_v1 = vmul.f32 0.0078125, %v4745_v42 }
 0x240   : > { %v5026_v20 = vpop.xlane.xlu0 %1047 }
 0x241   : > { %5958 = vst [vmem:[#allocation32_spill] sm:$0xff] %v5024_v56  ;;  %v1874_v57 = vpop.xlane.xlu1 %1873  ;;  %5963 = vst [vmem:[#allocation7_spill] sm:$0xff] %v5037_v41  ;;  %v1975_v37 = vmul.f32 %v5024_v56, %v5024_v56 }
 0x242   : > { %v1912_v18 = vmul.f32 0.0078125, %v1874_v57 }
 0x243   : > { %1083 = vadd.xlane.f32.xlu0 %v1029_v7  ;;  %1085 = vadd.xlane.f32.xlu1 %v1030_v47  ;;  %v969_v7 = vmul.f32 0.0078125, %v4750_v2 }
 0x244   : > { %v5034_v10 = vsub.f32 %v5960_v9, %v1912_v18  ;;  %v1876_v28 = vpop.xlane.xlu0 %1875  ;;  %v5966_v18 = vld [vmem:[#allocation27_spill] sm:$0xff]  ;;  %v1031_v9 = vmul.f32 %v5037_v41, %v5037_v41 }
 0x245   : > { %v1050_v40 = vpop.xlane.xlu1 %1049  ;;  %v1913_v62 = vmul.f32 0.0078125, %v1876_v28 }
 0x246   : > { %5961 = vst [vmem:[#allocation19_spill] sm:$0xff] %v5034_v10  ;;  %v1976_v57 = vmul.f32 %v5034_v10, %v5034_v10 }
 0x247   : > { %2031 = vadd.xlane.f32.xlu0 %v1975_v37  ;;  %v5048_v47 = vsub.f32 %v5966_v18, %v1913_v62  ;;  %v5970_v37 = vld [vmem:[#allocation11_spill] sm:$0xff] }
 0x248   : > { %2033 = vadd.xlane.f32.xlu1 %v1976_v57  ;;  %v5059_v2 = vsub.f32 %v5970_v37, %v969_v7  ;;  %v5972_v57 = vld [vmem:[#allocation12_spill] sm:$0xff]  ;;  %v1103_v7 = vmul.f32 0.0078125, %v4982_v6  ;;  %v1052_v37 = vpop.xlane.xlu0 %1051  ;;  %v5078_v6 = vld [vmem:[%s5844_s3 + $0x1] ss:$0 sm:$0xff] }
 0x249   : > { %5967 = vst [vmem:[#allocation33_spill] sm:$0xff] %v5048_v47  ;;  %v1878_v3 = vpop.xlane.xlu1 %1877  ;;  %v1977_v62 = vmul.f32 %v5048_v47, %v5048_v47  ;;  %v5064_v18 = vsub.f32 %v5972_v57, %v970_v1 }
 0x24a   : > { %v1914_v56 = vmul.f32 0.0078125, %v1878_v3  ;;  %5971 = vst [vmem:[#allocation34_spill] sm:$0xff] %v5059_v2  ;;  %v1033_v3 = vmul.f32 %v5059_v2, %v5059_v2 }
 0x24b   : > { %1087 = vadd.xlane.f32.xlu0 %v1031_v9  ;;  %5973 = vst [vmem:[#allocation24_spill] sm:$0xff] %v5064_v18  ;;  %v1104_v9 = vmul.f32 0.0078125, %v4992_v24 }
 0x24c   : > { %v5056_v28 = vsub.f32 %v5968_v13, %v1914_v56  ;;  %1089 = vadd.xlane.f32.xlu1 %v1032_v45  ;;  %v1034_v56 = vmul.f32 %v5064_v18, %v5064_v18  ;;  %v1135_v45 = vadd.f32 1e-05, %v1103_v7  ;;  %v1105_v13 = vmul.f32 0.0078125, %v5002_v36 }
 0x24d   : > { %v1136_v1 = vadd.f32 1e-05, %v1104_v9 }
 0x24e   : > { %5969 = vst [vmem:[#allocation21_spill] sm:$0xff] %v5056_v28  ;;  %v1978_v42 = vmul.f32 %v5056_v28, %v5056_v28  ;;  %3869 = vrsqrt.f32 %v1135_v45  ;;  %v1137_v57 = vadd.f32 1e-05, %v1105_v13  ;;  %v5974_v13 = vld [vmem:[#allocation15_spill] sm:$0xff] }
 0x24f   : > { %2035 = vadd.xlane.f32.xlu0 %v1977_v62  ;;  %3871 = vrsqrt.f32 %v1136_v1  ;;  %v1106_v62 = vmul.f32 0.0078125, %v1046_v22  ;;  %v1108_v22 = vmul.f32 0.0078125, %v1050_v40  ;;  %v5088_v40 = vld [vmem:[%s5844_s3 + $0x2] ss:$0 sm:$0xff] }
 0x250   : > { %2037 = vadd.xlane.f32.xlu1 %v1978_v42  ;;  %v1054_v42 = vpop.xlane.xlu1 %1053  ;;  %3873 = vrsqrt.f32 %v1137_v57  ;;  %v5975_v57 = vld [vmem:[#allocation16_spill] sm:$0xff] }
 0x251   : > { %v1138_v47 = vadd.f32 1e-05, %v1106_v62  ;;  %v1140_v8 = vadd.f32 1e-05, %v1108_v22 }
 0x253   : > { %1091 = vadd.xlane.f32.xlu0 %v1033_v3 }
 0x254   : > { %1093 = vadd.xlane.f32.xlu1 %v1034_v56 }
 0x258   : > { %v3870_v3 = vpop.eup %3869 }
 0x259   : > { %v3872_v56 = vpop.eup %3871  ;;  %v1203_v36 = vmul.f32 %v3870_v3, %v5078_v6 }
 0x25b   : > { %v1235_v62 = vmul.f32 %v1203_v36, %v5974_v13  ;;  %v1110_v13 = vmul.f32 0.0078125, %v1054_v42 }
 0x270   : > { %v1984_v2 = vpop.xlane.xlu0 %1983 }
 0x271   : > { %v2047_v28 = vmul.f32 0.0078125, %v1984_v2  ;;  %v1204_v2 = vmul.f32 %v3872_v56, %v5078_v6  ;;  %v3874_v56 = vpop.eup %3873 }
 0x273   : > { %v2079_v18 = vadd.f32 1e-05, %v2047_v28  ;;  %v1107_v28 = vmul.f32 0.0078125, %v5026_v20  ;;  %v1236_v41 = vmul.f32 %v1204_v2, %v5975_v57  ;;  %v5093_v20 = vld [vmem:[%s5846_s5 + $0x1] ss:$0 sm:$0xff]  ;;  %v1271_v2 = vadd.f32 %v5088_v40, %v1235_v62 }
 0x274   : > { %v1986_v24 = vpop.xlane.xlu1 %1985  ;;  %v1056_v45 = vpop.xlane.xlu0 %1055 }
 0x275   : > { %3875 = vrsqrt.f32 %v2079_v18  ;;  %v2048_v7 = vmul.f32 0.0078125, %v1986_v24  ;;  %v1139_v10 = vadd.f32 1e-05, %v1107_v28 }
 0x276   : > { %3877 = vrsqrt.f32 %v1138_v47 }
 0x277   : > { %v2080_v9 = vadd.f32 1e-05, %v2048_v7  ;;  %v1109_v7 = vmul.f32 0.0078125, %v1052_v37 }
 0x278   : > { %v1058_v1 = vpop.xlane.xlu1 %1057 }
 0x279   : > { %3879 = vrsqrt.f32 %v2080_v9  ;;  %v1141_v32 = vadd.f32 1e-05, %v1109_v7 }
 0x27a   : > { %3881 = vrsqrt.f32 %v1140_v8  ;;  %v1205_v8 = vmul.f32 %v3874_v56, %v5078_v6 }
 0x27b   : > { %3883 = vrsqrt.f32 %v1139_v10 }
 0x27c   : > { %v1988_v18 = vpop.xlane.xlu0 %1987  ;;  %v1990_v24 = vpop.xlane.xlu1 %1989 }
 0x27d   : > { %v2049_v47 = vmul.f32 0.0078125, %v1988_v18  ;;  %v2050_v3 = vmul.f32 0.0078125, %v1990_v24  ;;  %v1272_v24 = vadd.f32 %v5088_v40, %v1236_v41 }
 0x27f   : > { %v3876_v36 = vpop.eup %3875  ;;  %v2081_v22 = vadd.f32 1e-05, %v2049_v47  ;;  %v2082_v9 = vadd.f32 1e-05, %v2050_v3  ;;  %v1142_v47 = vadd.f32 1e-05, %v1110_v13 }
 0x280   : > { %v3878_v28 = vpop.eup %3877  ;;  %v1880_v57 = vpop.xlane.xlu0 %1879  ;;  %v2147_v18 = vmul.f32 %v3876_v36, %v5093_v20 }
 0x281   : > { %v1882_v4 = vpop.xlane.xlu1 %1881  ;;  %3885 = vrsqrt.f32 %v2081_v22  ;;  %v1915_v51 = vmul.f32 0.0078125, %v1880_v57  ;;  %v1206_v10 = vmul.f32 %v3878_v28, %v5078_v6  ;;  %v1303_v22 = vmax.f32 %v1271_v2, 0.0 }
 0x282   : > { %v1916_v0 = vmul.f32 0.0078125, %v1882_v4  ;;  %3887 = vrsqrt.f32 %v2082_v9  ;;  %v2179_v41 = vmul.f32 %v2147_v18, %v4738_v29  ;;  %v1304_v4 = vmax.f32 %v1272_v24, 0.0  ;;  %v5978_v29 = vld [vmem:[#allocation18_spill] sm:$0xff]  ;;  %v5979_v18 = vld [vmem:[#allocation20_spill] sm:$0xff] }
 0x283   : > { %v5100_v37 = vsub.f32 %v4773_v19, %v1915_v51  ;;  %v3880_v42 = vpop.eup %3879  ;;  %3889 = vrsqrt.f32 %v1141_v32  ;;  %v1237_v2 = vmul.f32 %v1205_v8, %v5978_v29  ;;  %v1112_v28 = vmul.f32 0.0078125, %v1058_v1 }
 0x284   : > { %v5103_v62 = vsub.f32 %v4776_v30, %v1916_v0  ;;  %v1992_v3 = vpop.xlane.xlu0 %1991  ;;  %v5114_v30 = vld [vmem:[%s5846_s5 + $0x2] ss:$0 sm:$0xff]  ;;  %v1111_v0 = vmul.f32 0.0078125, %v1056_v45  ;;  %v2148_v51 = vmul.f32 %v3880_v42, %v5093_v20  ;;  %v1238_v24 = vmul.f32 %v1206_v10, %v5979_v18  ;;  %v3882_v32 = vpop.eup %3881 }
 0x285   : > { %5976 = vst [vmem:[#allocation9_spill] sm:$0xff] %v5100_v37  ;;  %v1994_v36 = vpop.xlane.xlu1 %1993  ;;  %v2051_v7 = vmul.f32 0.0078125, %v1992_v3  ;;  %v1979_v56 = vmul.f32 %v5100_v37, %v5100_v37  ;;  %3891 = vrsqrt.f32 %v1142_v47  ;;  %v2215_v58 = vadd.f32 %v5114_v30, %v2179_v41  ;;  %v3884_v8 = vpop.eup %3883 }
 0x286   : > { %5977 = vst [vmem:[#allocation10_spill] sm:$0xff] %v5103_v62  ;;  %v2052_v9 = vmul.f32 0.0078125, %v1994_v36  ;;  %v1980_v19 = vmul.f32 %v5103_v62, %v5103_v62  ;;  %v5980_v62 = vld [vmem:[#allocation36_spill] sm:$0xff]  ;;  %v2279_v61 = vpack.c.bf16 %v1304_v4, %v1303_v22  ;;  %v1143_v1 = vadd.f32 1e-05, %v1111_v0 }
 0x287   : > { %v2083_v13 = vadd.f32 1e-05, %v2051_v7  ;;  %2039 = vadd.xlane.f32.xlu0 %v1979_v56  ;;  %v2180_v37 = vmul.f32 %v2148_v51, %v5980_v62  ;;  %v1144_v47 = vadd.f32 1e-05, %v1112_v28  ;;  %v1274_v41 = vadd.f32 %v5088_v40, %v1238_v24 }
 0x288   : > { %v2084_v57 = vadd.f32 1e-05, %v2052_v9  ;;  %2041 = vadd.xlane.f32.xlu1 %v1980_v19  ;;  %v935_v3 = vpop.xlane.xlu0 %934  ;;  %v1273_v9 = vadd.f32 %v5088_v40, %v1237_v2  ;;  %v2247_v4 = vmax.f32 %v2215_v58, 0.0 }
 0x289   : > { %v937_v36 = vpop.xlane.xlu1 %936  ;;  %3893 = vrsqrt.f32 %v2083_v13  ;;  %v971_v45 = vmul.f32 0.0078125, %v935_v3  ;;  %v2216_v7 = vadd.f32 %v5114_v30, %v2180_v37  ;;  %v1208_v37 = vmul.f32 %v3882_v32, %v5078_v6 }
 0x28a   : > { %v972_v42 = vmul.f32 0.0078125, %v937_v36  ;;  %3895 = vrsqrt.f32 %v2084_v57  ;;  %v1207_v3 = vmul.f32 %v3884_v8, %v5078_v6 }
 0x28b   : > { %v3886_v10 = vpop.eup %3885  ;;  %v5124_v56 = vsub.f32 %v4507_v25, %v971_v45  ;;  %v2248_v0 = vmax.f32 %v2216_v7, 0.0  ;;  %3897 = vrsqrt.f32 %v1143_v1  ;;  %v1306_v7 = vmax.f32 %v1274_v41, 0.0 }
 0x28c   : > { %v5127_v62 = vsub.f32 %v4514_v27, %v972_v42  ;;  %v3888_v19 = vpop.eup %3887  ;;  %v1996_v51 = vpop.xlane.xlu0 %1995  ;;  %v2149_v29 = vmul.f32 %v3886_v10, %v5093_v20  ;;  %3899 = vrsqrt.f32 %v1144_v47  ;;  %v5981_v47 = vld [vmem:[#allocation25_spill] sm:$0xff] }
 0x28d   : > { %v1998_v22 = vpop.xlane.xlu1 %1997  ;;  %v2053_v2 = vmul.f32 0.0078125, %v1996_v51  ;;  %v1035_v25 = vmul.f32 %v5124_v56, %v5124_v56  ;;  %v2295_v28 = vpack.c.bf16 %v2248_v0, %v2247_v4  ;;  %v2150_v57 = vmul.f32 %v3888_v19, %v5093_v20  ;;  %v3890_v36 = vpop.eup %3889 }
 0x28e   : > { %v2054_v13 = vmul.f32 0.0078125, %v1998_v22  ;;  %v1036_v27 = vmul.f32 %v5127_v62, %v5127_v62  ;;  %v2181_v18 = vmul.f32 %v2149_v29, %v4765_v53  ;;  %v1240_v19 = vmul.f32 %v1208_v37, %v5981_v47 }
 0x28f   : > { %v2085_v58 = vadd.f32 1e-05, %v2053_v2  ;;  %1095 = vadd.xlane.f32.xlu0 %v1035_v25  ;;  %2478 = vmatprep.mubr.bf16.mxu0 %v2295_v28  ;;  %v2182_v42 = vmul.f32 %v2150_v57, %v4762_v59  ;;  %v3892_v51 = vpop.eup %3891  ;;  %v1305_v4 = vmax.f32 %v1273_v9, 0.0  ;;  %v5982_v2 = vld [vmem:[#allocation22_spill] sm:$0xff] }
 0x290   : > { %v2086_v24 = vadd.f32 1e-05, %v2054_v13  ;;  %1097 = vadd.xlane.f32.xlu1 %v1036_v27  ;;  %v1060_v32 = vpop.xlane.xlu0 %1059  ;;  %v2217_v1 = vadd.f32 %v5114_v30, %v2181_v18  ;;  %2479 = vmatmul.mubr.bf16.vlgmr.msra.gmra.mrb[32].mxu0 %v2279_v61  ;;  %v1239_v13 = vmul.f32 %v1207_v3, %v5982_v2  ;;  %v1210_v3 = vmul.f32 %v3892_v51, %v5078_v6 }
 0x291   : > { %v1062_v45 = vpop.xlane.xlu1 %1061  ;;  %3901 = vrsqrt.f32 %v2085_v58  ;;  %v1113_v10 = vmul.f32 0.0078125, %v1060_v32  ;;  %v2218_v22 = vadd.f32 %v5114_v30, %v2182_v42  ;;  %v2280_v61 = vpack.c.bf16 %v1306_v7, %v1305_v4 }
 0x292   : > { %v1114_v53 = vmul.f32 0.0078125, %v1062_v45  ;;  %3903 = vrsqrt.f32 %v2086_v24  ;;  %v2249_v8 = vmax.f32 %v2217_v1, 0.0  ;;  %v1276_v24 = vadd.f32 %v5088_v40, %v1240_v19 }
 0x293   : > { %v3894_v0 = vpop.eup %3893  ;;  %v1145_v29 = vadd.f32 1e-05, %v1113_v10  ;;  %v2250_v28 = vmax.f32 %v2218_v22, 0.0  ;;  %v1209_v45 = vmul.f32 %v3890_v36, %v5078_v6  ;;  %v1275_v19 = vadd.f32 %v5088_v40, %v1239_v13 }
 0x294   : > { %v3896_v59 = vpop.eup %3895  ;;  %v1146_v25 = vadd.f32 1e-05, %v1114_v53  ;;  %v2000_v27 = vpop.xlane.xlu0 %1999  ;;  %v2151_v57 = vmul.f32 %v3894_v0, %v5093_v20  ;;  %v1308_v0 = vmax.f32 %v1276_v24, 0.0 }
 0x295   : > { %v2002_v41 = vpop.xlane.xlu1 %2001  ;;  %v2055_v18 = vmul.f32 0.0078125, %v2000_v27  ;;  %v2152_v58 = vmul.f32 %v3896_v59, %v5093_v20  ;;  %v2296_v32 = vpack.c.bf16 %v2250_v28, %v2249_v8  ;;  %3905 = vrsqrt.f32 %v1145_v29  ;;  %v3898_v10 = vpop.eup %3897  ;;  %v5984_v27 = vld [vmem:[#allocation30_spill] sm:$0xff] }
 0x296   : > { %v2056_v37 = vmul.f32 0.0078125, %v2002_v41  ;;  %v2183_v9 = vmul.f32 %v2151_v57, %v4779_v21  ;;  %3907 = vrsqrt.f32 %v1146_v25  ;;  %v3900_v8 = vpop.eup %3899  ;;  %v1242_v41 = vmul.f32 %v1210_v3, %v5984_v27 }
 0x297   : > { %v2087_v42 = vadd.f32 1e-05, %v2055_v18  ;;  %v2184_v7 = vmul.f32 %v2152_v58, %v4782_v39  ;;  %2486 = vmatprep.mubr.bf16.mxu0 %v2296_v32  ;;  %v5983_v39 = vld [vmem:[#allocation28_spill] sm:$0xff]  ;;  %v1307_v18 = vmax.f32 %v1275_v19, 0.0  ;;  %v1211_v58 = vmul.f32 %v3898_v10, %v5078_v6 }
 0x298   : > { %v2088_v1 = vadd.f32 1e-05, %v2056_v37  ;;  %v1884_v53 = vpop.xlane.xlu0 %1883  ;;  %v2219_v22 = vadd.f32 %v5114_v30, %v2183_v9  ;;  %2487 = vmatmul.mubr.bf16.gmra.mrb[36].mxu0 %v2280_v61  ;;  %v1241_v29 = vmul.f32 %v1209_v45, %v5983_v39  ;;  %v1212_v24 = vmul.f32 %v3900_v8, %v5078_v6 }
 0x299   : > { %v1886_v47 = vpop.xlane.xlu1 %1885  ;;  %3909 = vrsqrt.f32 %v2087_v42  ;;  %v1917_v21 = vmul.f32 0.0078125, %v1884_v53  ;;  %v2220_v51 = vadd.f32 %v5114_v30, %v2184_v7  ;;  %v2281_v45 = vpack.c.bf16 %v1308_v0, %v1307_v18 }
 0x29a   : > { %v1918_v36 = vmul.f32 0.0078125, %v1886_v47  ;;  %3911 = vrsqrt.f32 %v2088_v1  ;;  %v2251_v4 = vmax.f32 %v2219_v22, 0.0  ;;  %v1277_v10 = vadd.f32 %v5088_v40, %v1241_v29 }
 0x29b   : > { %v3902_v2 = vpop.eup %3901  ;;  %v5156_v59 = vsub.f32 %v4862_v38, %v1917_v21  ;;  %v2252_v13 = vmax.f32 %v2220_v51, 0.0  ;;  %v1278_v47 = vadd.f32 %v5088_v40, %v1242_v41 }
 0x29c   : > { %v5159_v25 = vsub.f32 %v4866_v33, %v1918_v36  ;;  %v3904_v28 = vpop.eup %3903  ;;  %v2004_v61 = vpop.xlane.xlu0 %2003  ;;  %v2153_v37 = vmul.f32 %v3902_v2, %v5093_v20  ;;  %v5985_v36 = vld [vmem:[#allocation35_spill] sm:$0xff] }
 0x29d   : > { %v2006_v57 = vpop.xlane.xlu1 %2005  ;;  %v2057_v32 = vmul.f32 0.0078125, %v2004_v61  ;;  %v2297_v38 = vpack.c.bf16 %v2252_v13, %v2251_v4  ;;  %v1981_v33 = vmul.f32 %v5156_v59, %v5156_v59  ;;  %v2154_v42 = vmul.f32 %v3904_v28, %v5093_v20 }
 0x29e   : > { %v2058_v9 = vmul.f32 0.0078125, %v2006_v57  ;;  %v1982_v3 = vmul.f32 %v5159_v25, %v5159_v25  ;;  %v2185_v1 = vmul.f32 %v2153_v37, %v4805_v17  ;;  %v1243_v51 = vmul.f32 %v1211_v58, %v5985_v36 }
 0x29f   : > { %v2089_v7 = vadd.f32 1e-05, %v2057_v32  ;;  %2494 = vmatprep.mubr.bf16.mxu0 %v2297_v38  ;;  %2043 = vadd.xlane.f32.xlu0 %v1981_v33  ;;  %v2186_v8 = vmul.f32 %v2154_v42, %v4808_v48  ;;  %v1244_v4 = vmul.f32 %v1212_v24, %v4757_v14  ;;  %v3906_v17 = vpop.eup %3905  ;;  %v1309_v28 = vmax.f32 %v1277_v10, 0.0 }
 0x2a0   : > { %v2090_v53 = vadd.f32 1e-05, %v2058_v9  ;;  %2045 = vadd.xlane.f32.xlu1 %v1982_v3  ;;  %v939_v22 = vpop.xlane.xlu0 %938  ;;  %v2221_v21 = vadd.f32 %v5114_v30, %v2185_v1  ;;  %2495 = vmatmul.mubr.bf16.gmra.mrb[40].mxu0 %v2281_v45  ;;  %v3908_v2 = vpop.eup %3907  ;;  %v1310_v61 = vmax.f32 %v1278_v47, 0.0  ;;  %v1279_v24 = vadd.f32 %v5088_v40, %v1243_v51 }
 0x2a1   : > { %v941_v19 = vpop.xlane.xlu1 %940  ;;  %3913 = vrsqrt.f32 %v2089_v7  ;;  %v973_v0 = vmul.f32 0.0078125, %v939_v22  ;;  %v2222_v29 = vadd.f32 %v5114_v30, %v2186_v8  ;;  %v1280_v32 = vadd.f32 %v5088_v40, %v1244_v4 }
 0x2a2   : > { %v974_v39 = vmul.f32 0.0078125, %v941_v19  ;;  %3915 = vrsqrt.f32 %v2090_v53  ;;  %v2253_v13 = vmax.f32 %v2221_v21, 0.0  ;;  %v1213_v42 = vmul.f32 %v3906_v17, %v5078_v6 }
 0x2a3   : > { %v3910_v27 = vpop.eup %3909  ;;  %v5179_v41 = vsub.f32 %v4521_v52, %v973_v0  ;;  %v2254_v37 = vmax.f32 %v2222_v29, 0.0  ;;  %v2282_v53 = vpack.c.bf16 %v1310_v61, %v1309_v28  ;;  %v1214_v10 = vmul.f32 %v3908_v2, %v5078_v6 }
 0x2a4   : > { %v5182_v48 = vsub.f32 %v4528_v55, %v974_v39  ;;  %v3912_v14 = vpop.eup %3911  ;;  %v2008_v57 = vpop.xlane.xlu0 %2007  ;;  %v2155_v58 = vmul.f32 %v3910_v27, %v5093_v20  ;;  %v1312_v21 = vmax.f32 %v1280_v32, 0.0  ;;  %v1311_v51 = vmax.f32 %v1279_v24, 0.0 }
 0x2a5   : > { %v2010_v18 = vpop.xlane.xlu1 %2009  ;;  %v2059_v9 = vmul.f32 0.0078125, %v2008_v57  ;;  %v1037_v52 = vmul.f32 %v5179_v41, %v5179_v41  ;;  %v2298_v33 = vpack.c.bf16 %v2254_v37, %v2253_v13  ;;  %v2156_v45 = vmul.f32 %v3912_v14, %v5093_v20 }
 0x2a6   : > { %v2060_v38 = vmul.f32 0.0078125, %v2010_v18  ;;  %v1038_v55 = vmul.f32 %v5182_v48, %v5182_v48  ;;  %v2187_v3 = vmul.f32 %v2155_v58, %v4839_v50  ;;  %v1245_v0 = vmul.f32 %v1213_v42, %v4819_v44 }
 0x2a7   : > { %v2091_v1 = vadd.f32 1e-05, %v2059_v9  ;;  %1099 = vadd.xlane.f32.xlu0 %v1037_v52  ;;  %2502 = vmatprep.mubr.bf16.mxu0 %v2298_v33  ;;  %v2188_v19 = vmul.f32 %v2156_v45, %v4842_v63  ;;  %v1246_v13 = vmul.f32 %v1214_v10, %v4826_v35  ;;  %v2283_v14 = vpack.c.bf16 %v1312_v21, %v1311_v51 }
 0x2a8   : > { %v2092_v7 = vadd.f32 1e-05, %v2060_v38  ;;  %1101 = vadd.xlane.f32.xlu1 %v1038_v55  ;;  %v1064_v47 = vpop.xlane.xlu0 %1063  ;;  %v2223_v8 = vadd.f32 %v5114_v30, %v2187_v3  ;;  %2503 = vmatmul.mubr.bf16.gmra.mrb[44].mxu0 %v2282_v53  ;;  %v1281_v32 = vadd.f32 %v5088_v40, %v1245_v0 }
 0x2a9   : > { %v1066_v22 = vpop.xlane.xlu1 %1065  ;;  %3917 = vrsqrt.f32 %v2091_v1  ;;  %v1115_v50 = vmul.f32 0.0078125, %v1064_v47  ;;  %v2224_v4 = vadd.f32 %v5114_v30, %v2188_v19  ;;  %v1282_v52 = vadd.f32 %v5088_v40, %v1246_v13 }
 0x2aa   : > { %v1116_v36 = vmul.f32 0.0078125, %v1066_v22  ;;  %3919 = vrsqrt.f32 %v2092_v7  ;;  %v2255_v17 = vmax.f32 %v2223_v8, 0.0  ;;  %v1313_v7 = vmax.f32 %v1281_v32, 0.0 }
 0x2ab   : > { %v3914_v39 = vpop.eup %3913  ;;  %v1147_v2 = vadd.f32 1e-05, %v1115_v50  ;;  %v2256_v61 = vmax.f32 %v2224_v4, 0.0  ;;  %v1314_v22 = vmax.f32 %v1282_v52, 0.0 }
 0x2ac   : > { %v1148_v29 = vadd.f32 1e-05, %v1116_v36  ;;  %v3916_v63 = vpop.eup %3915  ;;  %v2012_v27 = vpop.xlane.xlu0 %2011  ;;  %v2157_v57 = vmul.f32 %v3914_v39, %v5093_v20 }
 0x2ad   : > { %v2014_v28 = vpop.xlane.xlu1 %2013  ;;  %3921 = vrsqrt.f32 %v1147_v2  ;;  %v2061_v18 = vmul.f32 0.0078125, %v2012_v27  ;;  %v2158_v58 = vmul.f32 %v3916_v63, %v5093_v20  ;;  %v2299_v24 = vpack.c.bf16 %v2256_v61, %v2255_v17 }
 0x2ae   : > { %v2062_v37 = vmul.f32 0.0078125, %v2014_v28  ;;  %3923 = vrsqrt.f32 %v1148_v29  ;;  %v2189_v44 = vmul.f32 %v2157_v57, %v4869_v5  ;;  %v2284_v13 = vpack.c.bf16 %v1314_v22, %v1313_v7 }
 0x2af   : > { %v2093_v9 = vadd.f32 1e-05, %v2061_v18  ;;  %v2190_v38 = vmul.f32 %v2158_v58, %v4872_v11  ;;  %2510 = vmatprep.mubr.bf16.mxu0 %v2299_v24 }
 0x2b0   : > { %v2094_v35 = vadd.f32 1e-05, %v2062_v37  ;;  %v1068_v55 = vpop.xlane.xlu0 %1067  ;;  %v2225_v45 = vadd.f32 %v5114_v30, %v2189_v44  ;;  %2511 = vmatmul.mubr.bf16.gmra.mrb[48].mxu0 %v2283_v14 }
 0x2b1   : > { %v1070_v33 = vpop.xlane.xlu1 %1069  ;;  %3925 = vrsqrt.f32 %v2093_v9  ;;  %v1117_v3 = vmul.f32 0.0078125, %v1068_v55  ;;  %v2226_v1 = vadd.f32 %v5114_v30, %v2190_v38 }
 0x2b2   : > { %v1118_v42 = vmul.f32 0.0078125, %v1070_v33  ;;  %3927 = vrsqrt.f32 %v2094_v35  ;;  %v2257_v5 = vmax.f32 %v2225_v45, 0.0 }
 0x2b3   : > { %v3918_v53 = vpop.eup %3917  ;;  %v1149_v10 = vadd.f32 1e-05, %v1117_v3  ;;  %v2258_v11 = vmax.f32 %v2226_v1, 0.0 }
 0x2b4   : > { %v1150_v47 = vadd.f32 1e-05, %v1118_v42  ;;  %v3920_v19 = vpop.eup %3919  ;;  %v2016_v8 = vpop.xlane.xlu0 %2015  ;;  %v2159_v50 = vmul.f32 %v3918_v53, %v5093_v20 }
 0x2b5   : > { %v2018_v21 = vpop.xlane.xlu1 %2017  ;;  %3929 = vrsqrt.f32 %v1149_v10  ;;  %v2063_v36 = vmul.f32 0.0078125, %v2016_v8  ;;  %v2300_v4 = vpack.c.bf16 %v2258_v11, %v2257_v5  ;;  %v2160_v17 = vmul.f32 %v3920_v19, %v5093_v20 }
 0x2b6   : > { %v2064_v51 = vmul.f32 0.0078125, %v2018_v21  ;;  %3931 = vrsqrt.f32 %v1150_v47  ;;  %v2191_v0 = vmul.f32 %v2159_v50, %v4889_v15 }
 0x2b7   : > { %v3922_v39 = vpop.eup %3921  ;;  %v2095_v2 = vadd.f32 1e-05, %v2063_v36  ;;  %2518 = vmatprep.mubr.bf16.mxu0 %v2300_v4  ;;  %v2192_v61 = vmul.f32 %v2160_v17, %v4892_v16 }
 0x2b8   : > { %v2096_v29 = vadd.f32 1e-05, %v2064_v51  ;;  %v3924_v63 = vpop.eup %3923  ;;  %v1072_v27 = vpop.xlane.xlu0 %1071  ;;  %v2227_v14 = vadd.f32 %v5114_v30, %v2191_v0  ;;  %v1215_v57 = vmul.f32 %v3922_v39, %v5078_v6  ;;  %2519 = vmatmul.mubr.bf16.gmra.mrb[52].mxu0 %v2284_v13 }
 0x2b9   : > { %v1074_v28 = vpop.xlane.xlu1 %1073  ;;  %3933 = vrsqrt.f32 %v2095_v2  ;;  %v1119_v18 = vmul.f32 0.0078125, %v1072_v27  ;;  %v1216_v15 = vmul.f32 %v3924_v63, %v5078_v6  ;;  %v2228_v58 = vadd.f32 %v5114_v30, %v2192_v61 }
 0x2ba   : > { %v1120_v37 = vmul.f32 0.0078125, %v1074_v28  ;;  %3935 = vrsqrt.f32 %v2096_v29  ;;  %v2259_v24 = vmax.f32 %v2227_v14, 0.0  ;;  %v1247_v44 = vmul.f32 %v1215_v57, %v4897_v34 }
 0x2bb   : > { %v3926_v32 = vpop.eup %3925  ;;  %v1151_v9 = vadd.f32 1e-05, %v1119_v18  ;;  %v1248_v16 = vmul.f32 %v1216_v15, %v4904_v43  ;;  %v2260_v33 = vmax.f32 %v2228_v58, 0.0 }
 0x2bc   : > { %v1152_v35 = vadd.f32 1e-05, %v1120_v37  ;;  %v3928_v38 = vpop.eup %3927  ;;  %v2020_v52 = vpop.xlane.xlu0 %2019  ;;  %v1283_v45 = vadd.f32 %v5088_v40, %v1247_v44  ;;  %v2161_v3 = vmul.f32 %v3926_v32, %v5093_v20 }
 0x2bd   : > { %v2022_v55 = vpop.xlane.xlu1 %2021  ;;  %3937 = vrsqrt.f32 %v1151_v9  ;;  %v2065_v42 = vmul.f32 0.0078125, %v2020_v52  ;;  %v1284_v5 = vadd.f32 %v5088_v40, %v1248_v16  ;;  %v2301_v34 = vpack.c.bf16 %v2260_v33, %v2259_v24 }
 0x2be   : > { %v2066_v1 = vmul.f32 0.0078125, %v2022_v55  ;;  %3939 = vrsqrt.f32 %v1152_v35  ;;  %v1315_v7 = vmax.f32 %v1283_v45, 0.0  ;;  %v2162_v53 = vmul.f32 %v3928_v38, %v5093_v20 }
 0x2bf   : > { %v3930_v10 = vpop.eup %3929  ;;  %v2097_v43 = vadd.f32 1e-05, %v2065_v42  ;;  %v1316_v11 = vmax.f32 %v1284_v5, 0.0  ;;  %v2193_v22 = vmul.f32 %v2161_v3, %v4913_v31  ;;  %2526 = vmatprep.mubr.bf16.mxu0 %v2301_v34 }
 0x2c0   : > { %v2098_v47 = vadd.f32 1e-05, %v2066_v1  ;;  %v3932_v19 = vpop.eup %3931  ;;  %v1076_v8 = vpop.xlane.xlu0 %1075  ;;  %v2194_v50 = vmul.f32 %v2162_v53, %v4916_v26  ;;  %v1217_v36 = vmul.f32 %v3930_v10, %v5078_v6 }
 0x2c1   : > { %v1078_v21 = vpop.xlane.xlu1 %1077  ;;  %3941 = vrsqrt.f32 %v2097_v43  ;;  %v1121_v51 = vmul.f32 0.0078125, %v1076_v8  ;;  %v2285_v17 = vpack.c.bf16 %v1316_v11, %v1315_v7  ;;  %v2229_v0 = vadd.f32 %v5114_v30, %v2193_v22 }
 0x2c2   : > { %v1122_v4 = vmul.f32 0.0078125, %v1078_v21  ;;  %3943 = vrsqrt.f32 %v2098_v47  ;;  %v2230_v39 = vadd.f32 %v5114_v30, %v2194_v50  ;;  %v1218_v2 = vmul.f32 %v3932_v19, %v5078_v6 }
 0x2c3   : > { %v3934_v31 = vpop.eup %3933  ;;  %v1153_v29 = vadd.f32 1e-05, %v1121_v51  ;;  %2527 = vmatmul.mubr.bf16.gmra.mrb[56].mxu0 %v2285_v17  ;;  %v1249_v63 = vmul.f32 %v1217_v36, %v4919_v49  ;;  %v2261_v61 = vmax.f32 %v2229_v0, 0.0 }
 0x2c4   : > { %v1154_v13 = vadd.f32 1e-05, %v1122_v4  ;;  %v3936_v26 = vpop.eup %3935  ;;  %v2024_v27 = vpop.xlane.xlu0 %2023  ;;  %v2262_v14 = vmax.f32 %v2230_v39, 0.0  ;;  %v1250_v57 = vmul.f32 %v1218_v2, %v4926_v12  ;;  %v2163_v18 = vmul.f32 %v3934_v31, %v5093_v20 }
 0x2c5   : > { %v2026_v28 = vpop.xlane.xlu1 %2025  ;;  %3945 = vrsqrt.f32 %v1153_v29  ;;  %v2067_v37 = vmul.f32 0.0078125, %v2024_v27  ;;  %v1285_v58 = vadd.f32 %v5088_v40, %v1249_v63  ;;  %v2164_v49 = vmul.f32 %v3936_v26, %v5093_v20  ;;  %v5986_v29 = vld [vmem:[#allocation37_spill] sm:$0xff] }
 0x2c6   : > { %v2068_v15 = vmul.f32 0.0078125, %v2026_v28  ;;  %3947 = vrsqrt.f32 %v1154_v13  ;;  %v2302_v24 = vpack.c.bf16 %v2262_v14, %v2261_v61  ;;  %v1286_v44 = vadd.f32 %v5088_v40, %v1250_v57 }
 0x2c7   : > { %v3938_v32 = vpop.eup %3937  ;;  %v2099_v9 = vadd.f32 1e-05, %v2067_v37  ;;  %v1317_v16 = vmax.f32 %v1285_v58, 0.0  ;;  %v2195_v38 = vmul.f32 %v2163_v18, %v4935_v60  ;;  %v2196_v45 = vmul.f32 %v2164_v49, %v4938_v54 }
 0x2c8   : > { %v2100_v35 = vadd.f32 1e-05, %v2068_v15  ;;  %v3940_v12 = vpop.eup %3939  ;;  %2534 = vmatprep.mubr.bf16.mxu0 %v2302_v24  ;;  %v1080_v52 = vpop.xlane.xlu0 %1079  ;;  %v1318_v33 = vmax.f32 %v1286_v44, 0.0  ;;  %v1219_v3 = vmul.f32 %v3938_v32, %v5078_v6 }
 0x2c9   : > { %v1082_v55 = vpop.xlane.xlu1 %1081  ;;  %3949 = vrsqrt.f32 %v2099_v9  ;;  %v1123_v42 = vmul.f32 0.0078125, %v1080_v52  ;;  %v2231_v5 = vadd.f32 %v5114_v30, %v2195_v38  ;;  %v2232_v7 = vadd.f32 %v5114_v30, %v2196_v45 }
 0x2ca   : > { %v1124_v1 = vmul.f32 0.0078125, %v1082_v55  ;;  %3951 = vrsqrt.f32 %v2100_v35  ;;  %v2286_v34 = vpack.c.bf16 %v1318_v33, %v1317_v16  ;;  %v1220_v60 = vmul.f32 %v3940_v12, %v5078_v6  ;;  %v5988_v16 = vld [vmem:[#allocation39_spill] sm:$0xff]  ;;  %v5989_v33 = vld [vmem:[#allocation40_spill] sm:$0xff] }
 0x2cb   : > { %v3942_v53 = vpop.eup %3941  ;;  %v1155_v10 = vadd.f32 1e-05, %v1123_v42  ;;  %v2263_v47 = vmax.f32 %v2231_v5, 0.0  ;;  %v1251_v11 = vmul.f32 %v1219_v3, %v4941_v23  ;;  %v2264_v19 = vmax.f32 %v2232_v7, 0.0 }
 0x2cc   : > { %v1156_v43 = vadd.f32 1e-05, %v1124_v1  ;;  %v3944_v54 = vpop.eup %3943  ;;  %2535 = vmatmul.mubr.bf16.gmra.mrb[60].mxu0 %v2286_v34  ;;  %v2028_v22 = vpop.xlane.xlu0 %2027  ;;  %v1252_v8 = vmul.f32 %v1220_v60, %v4944_v46  ;;  %v2165_v21 = vmul.f32 %v3942_v53, %v5093_v20  ;;  %v5987_v46 = vld [vmem:[#allocation38_spill] sm:$0xff] }
 0x2cd   : > { %3953 = vrsqrt.f32 %v1155_v10  ;;  %v2069_v50 = vmul.f32 0.0078125, %v2028_v22  ;;  %v2030_v36 = vpop.xlane.xlu1 %2029  ;;  %v1287_v51 = vadd.f32 %v5088_v40, %v1251_v11  ;;  %v2166_v4 = vmul.f32 %v3944_v54, %v5093_v20  ;;  %v5990_v11 = vld [vmem:[#allocation23_spill] sm:$0xff] }
 0x2ce   : > { %3955 = vrsqrt.f32 %v1156_v43  ;;  %v2070_v17 = vmul.f32 0.0078125, %v2030_v36  ;;  %v2303_v0 = vpack.c.bf16 %v2264_v19, %v2263_v47  ;;  %v1288_v23 = vadd.f32 %v5088_v40, %v1252_v8 }
 0x2cf   : > { %v3946_v39 = vpop.eup %3945  ;;  %v2101_v2 = vadd.f32 1e-05, %v2069_v50  ;;  %v1319_v31 = vmax.f32 %v1287_v51, 0.0  ;;  %v2197_v13 = vmul.f32 %v2165_v21, %v5986_v29  ;;  %v2198_v63 = vmul.f32 %v2166_v4, %v5987_v46  ;;  %v5991_v50 = vld [vmem:[#allocation26_spill] sm:$0xff] }
 0x2d0   : > { %v3948_v26 = vpop.eup %3947  ;;  %v2102_v27 = vadd.f32 1e-05, %v2070_v17  ;;  %2542 = vmatprep.mubr.bf16.mxu0 %v2303_v0  ;;  %v1084_v28 = vpop.xlane.xlu0 %1083  ;;  %v1320_v61 = vmax.f32 %v1288_v23, 0.0  ;;  %v1221_v14 = vmul.f32 %v3946_v39, %v5078_v6 }
 0x2d1   : > { %3957 = vrsqrt.f32 %v2101_v2  ;;  %v1125_v57 = vmul.f32 0.0078125, %v1084_v28  ;;  %v1086_v18 = vpop.xlane.xlu1 %1085  ;;  %v2233_v37 = vadd.f32 %v5114_v30, %v2197_v13  ;;  %v2234_v15 = vadd.f32 %v5114_v30, %v2198_v63  ;;  %v5992_v63 = vld [vmem:[#allocation13_spill] sm:$0xff] }
 0x2d2   : > { %3959 = vrsqrt.f32 %v2102_v27  ;;  %v1126_v58 = vmul.f32 0.0078125, %v1086_v18  ;;  %v2287_v24 = vpack.c.bf16 %v1320_v61, %v1319_v31  ;;  %v1222_v44 = vmul.f32 %v3948_v26, %v5078_v6  ;;  %v5993_v27 = vld [vmem:[#allocation14_spill] sm:$0xff] }
 0x2d3   : > { %v3950_v49 = vpop.eup %3949  ;;  %v1157_v32 = vadd.f32 1e-05, %v1125_v57  ;;  %v2265_v9 = vmax.f32 %v2233_v37, 0.0  ;;  %v2266_v35 = vmax.f32 %v2234_v15, 0.0  ;;  %v1253_v38 = vmul.f32 %v1221_v14, %v5988_v16 }
 0x2d4   : > { %v3952_v12 = vpop.eup %3951  ;;  %v1158_v52 = vadd.f32 1e-05, %v1126_v58  ;;  %2543 = vmatmul.mubr.bf16.gmra.mrb[64].mxu0 %v2287_v24  ;;  %v2032_v55 = vpop.xlane.xlu0 %2031  ;;  %v1254_v45 = vmul.f32 %v1222_v44, %v5989_v33  ;;  %v2167_v3 = vmul.f32 %v3950_v49, %v5093_v20 }
 0x2d5   : > { %3961 = vrsqrt.f32 %v1157_v32  ;;  %v2071_v42 = vmul.f32 0.0078125, %v2032_v55  ;;  %v2034_v1 = vpop.xlane.xlu1 %2033  ;;  %v2304_v5 = vpack.c.bf16 %v2266_v35, %v2265_v9  ;;  %v1289_v34 = vadd.f32 %v5088_v40, %v1253_v38 }
 0x2d6   : > { %3963 = vrsqrt.f32 %v1158_v52  ;;  %v2072_v7 = vmul.f32 0.0078125, %v2034_v1  ;;  %v1290_v60 = vadd.f32 %v5088_v40, %v1254_v45  ;;  %v2168_v53 = vmul.f32 %v3952_v12, %v5093_v20  ;;  %v5994_v52 = vld [vmem:[#allocation5_spill] sm:$0xff] }
 0x2d7   : > { %v3954_v10 = vpop.eup %3953  ;;  %v2103_v43 = vadd.f32 1e-05, %v2071_v42  ;;  %2550 = vmatprep.mubr.bf16.mxu0 %v2304_v5  ;;  %v1321_v47 = vmax.f32 %v1289_v34, 0.0  ;;  %v2199_v54 = vmul.f32 %v2167_v3, %v5990_v11  ;;  %v5995_v42 = vld [vmem:[#allocation6_spill] sm:$0xff] }
 0x2d8   : > { %v3956_v22 = vpop.eup %3955  ;;  %v2104_v19 = vadd.f32 1e-05, %v2072_v7  ;;  %v1088_v8 = vpop.xlane.xlu0 %1087  ;;  %v1322_v21 = vmax.f32 %v1290_v60, 0.0  ;;  %v2200_v36 = vmul.f32 %v2168_v53, %v5991_v50  ;;  %v1223_v51 = vmul.f32 %v3954_v10, %v5078_v6 }
 0x2d9   : > { %3965 = vrsqrt.f32 %v2103_v43  ;;  %v1127_v4 = vmul.f32 0.0078125, %v1088_v8  ;;  %v1090_v17 = vpop.xlane.xlu1 %1089  ;;  %v2235_v0 = vadd.f32 %v5114_v30, %v2199_v54  ;;  %v1224_v23 = vmul.f32 %v3956_v22, %v5078_v6 }
 0x2da   : > { %3967 = vrsqrt.f32 %v2104_v19  ;;  %v1128_v39 = vmul.f32 0.0078125, %v1090_v17  ;;  %v2288_v2 = vpack.c.bf16 %v1322_v21, %v1321_v47  ;;  %v2236_v31 = vadd.f32 %v5114_v30, %v2200_v36  ;;  %v5278_v47 = vld [vmem:[%s5844_s3 + $0x1] ss:$0 sm:$0xff]  ;;  %v5996_v19 = vld [vmem:[#allocation31_spill] sm:$0xff] }
 0x2db   : > { %v3958_v29 = vpop.eup %3957  ;;  %v1159_v13 = vadd.f32 1e-05, %v1127_v4  ;;  %v2267_v46 = vmax.f32 %v2235_v0, 0.0  ;;  %v1255_v26 = vmul.f32 %v1223_v51, %v5992_v63  ;;  %v1256_v28 = vmul.f32 %v1224_v23, %v5993_v27  ;;  %v5997_v51 = vld [vmem:[#allocation17_spill] sm:$0xff]  ;;  %v5999_v63 = vld [vmem:[#allocation19_spill] sm:$0xff] }
 0x2dc   : > { %v3960_v61 = vpop.eup %3959  ;;  %v1160_v14 = vadd.f32 1e-05, %v1128_v39  ;;  %2551 = vmatmul.mubr.bf16.gmra.mrb[68].mxu0 %v2288_v2  ;;  %v2036_v57 = vpop.xlane.xlu0 %2035  ;;  %v2268_v18 = vmax.f32 %v2236_v31, 0.0  ;;  %v2169_v37 = vmul.f32 %v3958_v29, %v5093_v20  ;;  %v5998_v31 = vld [vmem:[#allocation32_spill] sm:$0xff] }
 0x2dd   : > { %3969 = vrsqrt.f32 %v1159_v13  ;;  %v2073_v15 = vmul.f32 0.0078125, %v2036_v57  ;;  %v2038_v58 = vpop.xlane.xlu1 %2037  ;;  %v1291_v24 = vadd.f32 %v5088_v40, %v1255_v26  ;;  %v1292_v44 = vadd.f32 %v5088_v40, %v1256_v28 }
 0x2de   : > { %3971 = vrsqrt.f32 %v1160_v14  ;;  %v2074_v49 = vmul.f32 0.0078125, %v2038_v58  ;;  %v2305_v32 = vpack.c.bf16 %v2268_v18, %v2267_v46  ;;  %v2170_v9 = vmul.f32 %v3960_v61, %v5093_v20 }
 0x2df   : > { %v3962_v35 = vpop.eup %3961  ;;  %v2105_v16 = vadd.f32 1e-05, %v2073_v15  ;;  %v1323_v38 = vmax.f32 %v1291_v24, 0.0  ;;  %v1324_v12 = vmax.f32 %v1292_v44, 0.0  ;;  %v2201_v55 = vmul.f32 %v2169_v37, %v5994_v52  ;;  %v6001_v44 = vld [vmem:[#allocation8_spill] sm:$0xff] }
 0x2e0   : > { %v3964_v33 = vpop.eup %3963  ;;  %v2106_v45 = vadd.f32 1e-05, %v2074_v49  ;;  %2558 = vmatprep.mubr.bf16.mxu0 %v2305_v32  ;;  %v1092_v3 = vpop.xlane.xlu0 %1091  ;;  %v2202_v1 = vmul.f32 %v2170_v9, %v5995_v42  ;;  %v1225_v5 = vmul.f32 %v3962_v35, %v5078_v6  ;;  %v5298_v9 = vld [vmem:[%s5844_s3 + $0x2] ss:$0 sm:$0xff] }
 0x2e1   : > { %3973 = vrsqrt.f32 %v2105_v16  ;;  %v1129_v34 = vmul.f32 0.0078125, %v1092_v3  ;;  %v1094_v7 = vpop.xlane.xlu1 %1093  ;;  %v2289_v60 = vpack.c.bf16 %v1324_v12, %v1323_v38  ;;  %v2237_v53 = vadd.f32 %v5114_v30, %v2201_v55  ;;  %v5304_v16 = vld [vmem:[%s5846_s5 + $0x1] ss:$0 sm:$0xff] }
 0x2e2   : > { %3975 = vrsqrt.f32 %v2106_v45  ;;  %v1130_v10 = vmul.f32 0.0078125, %v1094_v7  ;;  %v2238_v43 = vadd.f32 %v5114_v30, %v2202_v1  ;;  %v1226_v11 = vmul.f32 %v5278_v47, %v3964_v33  ;;  %v6002_v45 = vld [vmem:[#allocation33_spill] sm:$0xff] }
 0x2e3   : > { %v3966_v54 = vpop.eup %3965  ;;  %v1161_v22 = vadd.f32 1e-05, %v1129_v34  ;;  %v2269_v6 = vmax.f32 %v2237_v53, 0.0  ;;  %v1257_v8 = vmul.f32 %v1225_v5, %v5996_v19  ;;  %v6003_v5 = vld [vmem:[#allocation21_spill] sm:$0xff] }
 0x2e4   : > { %v3968_v21 = vpop.eup %3967  ;;  %v1162_v50 = vadd.f32 1e-05, %v1130_v10  ;;  %2559 = vmatmul.mubr.bf16.gmra.mrb[72].mxu0 %v2289_v60  ;;  %v2270_v36 = vmax.f32 %v2238_v43, 0.0  ;;  %v1258_v4 = vmul.f32 %v1226_v11, %v5997_v51  ;;  %v2171_v17 = vmul.f32 %v3966_v54, %v5093_v20 }
 0x2e5   : > { %3977 = vrsqrt.f32 %v1161_v22  ;;  %v1293_v0 = vadd.f32 %v5088_v40, %v1257_v8  ;;  %v2172_v23 = vmul.f32 %v3968_v21, %v5093_v20  ;;  %v6004_v22 = vld [vmem:[#allocation34_spill] sm:$0xff]  ;;  %v6005_v8 = vld [vmem:[#allocation24_spill] sm:$0xff] }
 0x2e6   : > { %3979 = vrsqrt.f32 %v1162_v50  ;;  %v2306_v39 = vpack.c.bf16 %v2270_v36, %v2269_v6  ;;  %v1294_v2 = vadd.f32 %v5088_v40, %v1258_v4  ;;  %v2203_v29 = vmul.f32 %v2171_v17, %v5998_v31  ;;  %v6000_v40 = vld [vmem:[#allocation7_spill] sm:$0xff] }
 0x2e7   : > { %v3970_v13 = vpop.eup %3969  ;;  %v1325_v46 = vmax.f32 %v1293_v0, 0.0  ;;  %v2204_v26 = vmul.f32 %v2172_v23, %v5999_v63 }
 0x2e8   : > { %v3972_v27 = vpop.eup %3971  ;;  %2566 = vmatprep.mubr.bf16.mxu0 %v2306_v39  ;;  %v1326_v28 = vmax.f32 %v1294_v2, 0.0  ;;  %v2239_v61 = vadd.f32 %v5114_v30, %v2203_v29  ;;  %v1227_v14 = vmul.f32 %v5278_v47, %v3970_v13 }
 0x2e9   : > { %v2240_v57 = vadd.f32 %v5114_v30, %v2204_v26  ;;  %v1228_v20 = vmul.f32 %v5278_v47, %v3972_v27 }
 0x2ea   : > { %v2290_v18 = vpack.c.bf16 %v1326_v28, %v1325_v46  ;;  %v2271_v37 = vmax.f32 %v2239_v61, 0.0  ;;  %v1259_v15 = vmul.f32 %v1227_v14, %v6000_v40  ;;  %v6007_v40 = vld [vmem:[#allocation10_spill] sm:$0xff] }
 0x2eb   : > { %v3974_v58 = vpop.eup %3973  ;;  %v2272_v24 = vmax.f32 %v2240_v57, 0.0  ;;  %v1260_v49 = vmul.f32 %v1228_v20, %v6001_v44 }
 0x2ec   : > { %v3976_v32 = vpop.eup %3975  ;;  %2567 = vmatmul.mubr.bf16.gmra.mrb[76].mxu0 %v2290_v18  ;;  %v1295_v35 = vadd.f32 %v5298_v9, %v1259_v15  ;;  %v2173_v38 = vmul.f32 %v5304_v16, %v3974_v58  ;;  %v6006_v18 = vld [vmem:[#allocation9_spill] sm:$0xff] }
 0x2ed   : > { %v2307_v12 = vpack.c.bf16 %v2272_v24, %v2271_v37  ;;  %v1296_v52 = vadd.f32 %v5298_v9, %v1260_v49  ;;  %v2174_v55 = vmul.f32 %v5304_v16, %v3976_v32  ;;  %v4064_v58 = vld [vmem:[%s5846_s5 + $0x2] ss:$0 sm:$0xff] }
 0x2ee   : > { %v1327_v33 = vmax.f32 %v1295_v35, 0.0  ;;  %v2205_v3 = vmul.f32 %v2173_v38, %v6002_v45 }
 0x2ef   : > { %v3978_v42 = vpop.eup %3977  ;;  %2574 = vmatprep.mubr.bf16.mxu0 %v2307_v12  ;;  %v1328_v1 = vmax.f32 %v1296_v52, 0.0  ;;  %v2206_v34 = vmul.f32 %v2174_v55, %v6003_v5 }
 0x2f0   : > { %v3980_v7 = vpop.eup %3979  ;;  %v2241_v60 = vadd.f32 %v5114_v30, %v2205_v3  ;;  %v1229_v53 = vmul.f32 %v5278_v47, %v3978_v42 }
 0x2f1   : > { %v2291_v10 = vpack.c.bf16 %v1328_v1, %v1327_v33  ;;  %v2242_v43 = vadd.f32 %v5114_v30, %v2206_v34  ;;  %v1230_v11 = vmul.f32 %v5278_v47, %v3980_v7 }
 0x2f2   : > { %v2273_v54 = vmax.f32 %v2241_v60, 0.0  ;;  %v1261_v6 = vmul.f32 %v1229_v53, %v6004_v22 }
 0x2f3   : > { %v2274_v19 = vmax.f32 %v2242_v43, 0.0  ;;  %v1262_v21 = vmul.f32 %v1230_v11, %v6005_v8 }
 0x2f4   : > { %2575 = vmatmul.mubr.bf16.gmra.mrb[80].mxu0 %v2291_v10  ;;  %v1297_v50 = vadd.f32 %v5298_v9, %v1261_v6 }
 0x2f5   : > { %v2308_v36 = vpack.c.bf16 %v2274_v19, %v2273_v54  ;;  %v1298_v51 = vadd.f32 %v5298_v9, %v1262_v21 }
 0x2f6   : > { %v1329_v4 = vmax.f32 %v1297_v50, 0.0 }
 0x2f7   : > { %2582 = vmatprep.mubr.bf16.mxu0 %v2308_v36  ;;  %v1330_v17 = vmax.f32 %v1298_v51, 0.0 }
 0x2f9   : > { %v2292_v0 = vpack.c.bf16 %v1330_v17, %v1329_v4 }
 0x2fc   : > { %2583 = vmatmul.mubr.bf16.gmra.mrb[84].mxu0 %v2292_v0 }
 0x314   : > { %v2040_v30 = vpop.xlane.xlu0 %2039 }
 0x315   : > { %v2042_v23 = vpop.xlane.xlu1 %2041  ;;  %v2075_v39 = vmul.f32 0.0078125, %v2040_v30 }
 0x316   : > { %v2076_v2 = vmul.f32 0.0078125, %v2042_v23 }
 0x317   : > { %v2107_v31 = vadd.f32 1e-05, %v2075_v39 }
 0x318   : > { %v2108_v29 = vadd.f32 1e-05, %v2076_v2 }
 0x319   : > { %3981 = vrsqrt.f32 %v2107_v31 }
 0x31a   : > { %3983 = vrsqrt.f32 %v2108_v29 }
 0x31c   : > { %v1096_v13 = vpop.xlane.xlu0 %1095 }
 0x31d   : > { %v1098_v46 = vpop.xlane.xlu1 %1097  ;;  %v1131_v63 = vmul.f32 0.0078125, %v1096_v13 }
 0x31e   : > { %v1132_v26 = vmul.f32 0.0078125, %v1098_v46 }
 0x31f   : > { %v1163_v27 = vadd.f32 1e-05, %v1131_v63 }
 0x320   : > { %v1164_v28 = vadd.f32 1e-05, %v1132_v26 }
 0x321   : > { %3985 = vrsqrt.f32 %v1163_v27 }
 0x322   : > { %3987 = vrsqrt.f32 %v1164_v28 }
 0x323   : > { %v3982_v61 = vpop.eup %3981 }
 0x324   : > { %v3984_v14 = vpop.eup %3983  ;;  %v2175_v57 = vmul.f32 %v5304_v16, %v3982_v61  ;;  %v5345_v61 = vld [vmem:[%s5848_s7] ss:$0 sm:$0xff] }
 0x325   : > { %v2176_v20 = vmul.f32 %v5304_v16, %v3984_v14 }
 0x326   : > { %v2207_v37 = vmul.f32 %v2175_v57, %v6006_v18 }
 0x327   : > { %v2208_v15 = vmul.f32 %v2176_v20, %v6007_v40 }
 0x328   : > { %v2243_v24 = vadd.f32 %v4064_v58, %v2207_v37 }
 0x329   : > { %v2244_v44 = vadd.f32 %v4064_v58, %v2208_v15 }
 0x32a   : > { %v2275_v49 = vmax.f32 %v2243_v24, 0.0 }
 0x32b   : > { %v3986_v32 = vpop.eup %3985  ;;  %v2276_v35 = vmax.f32 %v2244_v44, 0.0 }
 0x32c   : > { %v3988_v38 = vpop.eup %3987  ;;  %v2044_v12 = vpop.xlane.xlu0 %2043  ;;  %v1231_v52 = vmul.f32 %v5278_v47, %v3986_v32 }
 0x32d   : > { %v2077_v55 = vmul.f32 0.0078125, %v2044_v12  ;;  %v2046_v33 = vpop.xlane.xlu1 %2045  ;;  %v2309_v45 = vpack.c.bf16 %v2276_v35, %v2275_v49  ;;  %v1232_v3 = vmul.f32 %v5278_v47, %v3988_v38 }
 0x32e   : > { %v2078_v42 = vmul.f32 0.0078125, %v2046_v33  ;;  %v1263_v1 = vmul.f32 %v1231_v52, %v5124_v56 }
 0x32f   : > { %v2109_v5 = vadd.f32 1e-05, %v2077_v55  ;;  %2590 = vmatprep.mubr.bf16.mxu0 %v2309_v45  ;;  %v1264_v34 = vmul.f32 %v1232_v3, %v5127_v62 }
 0x330   : > { %v2110_v7 = vadd.f32 1e-05, %v2078_v42  ;;  %v1299_v60 = vadd.f32 %v5298_v9, %v1263_v1 }
 0x331   : > { %3989 = vrsqrt.f32 %v2109_v5  ;;  %v1300_v53 = vadd.f32 %v5298_v9, %v1264_v34 }
 0x332   : > { %3991 = vrsqrt.f32 %v2110_v7  ;;  %v1331_v10 = vmax.f32 %v1299_v60, 0.0 }
 0x333   : > { %v1332_v43 = vmax.f32 %v1300_v53, 0.0 }
 0x334   : > { %v1100_v11 = vpop.xlane.xlu0 %1099 }
 0x335   : > { %v1102_v54 = vpop.xlane.xlu1 %1101  ;;  %v1133_v22 = vmul.f32 0.0078125, %v1100_v11  ;;  %v2293_v19 = vpack.c.bf16 %v1332_v43, %v1331_v10 }
 0x336   : > { %v1134_v6 = vmul.f32 0.0078125, %v1102_v54 }
 0x337   : > { %v1165_v8 = vadd.f32 1e-05, %v1133_v22  ;;  %2591 = vmatmul.mubr.bf16.gmra.mrb[88].mxu0 %v2293_v19 }
 0x338   : > { %v1166_v56 = vadd.f32 1e-05, %v1134_v6 }
 0x339   : > { %3993 = vrsqrt.f32 %v1165_v8 }
 0x33a   : > { %3995 = vrsqrt.f32 %v1166_v56 }
 0x33b   : > { %v3990_v62 = vpop.eup %3989 }
 0x33c   : > { %v3992_v21 = vpop.eup %3991  ;;  %v2177_v50 = vmul.f32 %v5304_v16, %v3990_v62 }
 0x33d   : > { %v2178_v36 = vmul.f32 %v5304_v16, %v3992_v21 }
 0x33e   : > { %v2209_v51 = vmul.f32 %v2177_v50, %v5156_v59 }
 0x33f   : > { %v2210_v4 = vmul.f32 %v2178_v36, %v5159_v25 }
 0x340   : > { %v2245_v17 = vadd.f32 %v4064_v58, %v2209_v51 }
 0x341   : > { %v2246_v0 = vadd.f32 %v4064_v58, %v2210_v4 }
 0x342   : > { %v2277_v30 = vmax.f32 %v2245_v17, 0.0 }
 0x343   : > { %v3994_v23 = vpop.eup %3993  ;;  %v2278_v39 = vmax.f32 %v2246_v0, 0.0 }
 0x344   : > { %v3996_v2 = vpop.eup %3995  ;;  %v1233_v31 = vmul.f32 %v5278_v47, %v3994_v23 }
 0x345   : > { %v2310_v29 = vpack.c.bf16 %v2278_v39, %v2277_v30  ;;  %v1234_v13 = vmul.f32 %v5278_v47, %v3996_v2 }
 0x346   : > { %v1265_v46 = vmul.f32 %v1233_v31, %v5179_v41 }
 0x347   : > { %2598 = vmatprep.mubr.bf16.mxu0 %v2310_v29  ;;  %v1266_v16 = vmul.f32 %v1234_v13, %v5182_v48 }
 0x348   : > { %v1301_v59 = vadd.f32 %v5298_v9, %v1265_v46 }
 0x349   : > { %v1302_v25 = vadd.f32 %v5298_v9, %v1266_v16 }
 0x34a   : > { %v1333_v63 = vmax.f32 %v1301_v59, 0.0 }
 0x34b   : > { %v1334_v26 = vmax.f32 %v1302_v25, 0.0 }
 0x34d   : > { %v2294_v27 = vpack.c.bf16 %v1334_v26, %v1333_v63 }
 0x34f   : > { %2599 = vmatmul.mubr.bf16.gmra.mrb[92].mxu0 %v2294_v27 }
 0x363   : > { %v3573_v28 = vpop.f32.mrb[32].mxu0 }
 0x364   : > { %v3574_v47 = vpop.f32.mrb[33].mxu0 }
 0x365   : > { %v3575_v14 = vadd.f32 %v3574_v47, %v3573_v28  ;;  %v3576_v41 = vpop.f32.mrb[34].mxu0 }
 0x366   : > { %v3577_v57 = vpop.f32.mrb[35].mxu0 }
 0x367   : > { %v5348_v48 = vadd.f32 %v3575_v14, %v5345_v61  ;;  %v3578_v20 = vadd.f32 %v3577_v57, %v3576_v41 }
 0x369   : > { %v5351_v9 = vadd.f32 %v3578_v20, %v5345_v61  ;;  %2607 = vadd.xlane.f32.xlu0 %v5348_v48 }
 0x36b   : > { %v3579_v18 = vpop.f32.mrb[36].mxu0  ;;  %2609 = vadd.xlane.f32.xlu1 %v5351_v9 }
 0x36c   : > { %v3580_v37 = vpop.f32.mrb[37].mxu0 }
 0x36d   : > { %v3581_v40 = vadd.f32 %v3580_v37, %v3579_v18  ;;  %v3582_v15 = vpop.f32.mrb[38].mxu0 }
 0x36e   : > { %v3583_v58 = vpop.f32.mrb[39].mxu0 }
 0x36f   : > { %v5356_v24 = vadd.f32 %v3581_v40, %v5345_v61  ;;  %v3584_v44 = vadd.f32 %v3583_v58, %v3582_v15 }
 0x371   : > { %v5359_v49 = vadd.f32 %v3584_v44, %v5345_v61  ;;  %2611 = vadd.xlane.f32.xlu0 %v5356_v24 }
 0x373   : > { %v3585_v32 = vpop.f32.mrb[40].mxu0  ;;  %2613 = vadd.xlane.f32.xlu1 %v5359_v49 }
 0x374   : > { %v3586_v35 = vpop.f32.mrb[41].mxu0 }
 0x375   : > { %v3587_v38 = vadd.f32 %v3586_v35, %v3585_v32  ;;  %v3588_v12 = vpop.f32.mrb[42].mxu0 }
 0x376   : > { %v3589_v52 = vpop.f32.mrb[43].mxu0 }
 0x377   : > { %v5364_v55 = vadd.f32 %v3587_v38, %v5345_v61  ;;  %v3590_v33 = vadd.f32 %v3589_v52, %v3588_v12 }
 0x379   : > { %v5367_v45 = vadd.f32 %v3590_v33, %v5345_v61  ;;  %2615 = vadd.xlane.f32.xlu0 %v5364_v55 }
 0x37b   : > { %v3591_v3 = vpop.f32.mrb[44].mxu0  ;;  %2617 = vadd.xlane.f32.xlu1 %v5367_v45 }
 0x37c   : > { %v3592_v42 = vpop.f32.mrb[45].mxu0 }
 0x37d   : > { %v3593_v1 = vadd.f32 %v3592_v42, %v3591_v3  ;;  %v3594_v5 = vpop.f32.mrb[46].mxu0 }
 0x37e   : > { %v3595_v34 = vpop.f32.mrb[47].mxu0 }
 0x37f   : > { %v5372_v7 = vadd.f32 %v3593_v1, %v5345_v61  ;;  %v3596_v60 = vadd.f32 %v3595_v34, %v3594_v5 }
 0x381   : > { %v5375_v53 = vadd.f32 %v3596_v60, %v5345_v61  ;;  %2619 = vadd.xlane.f32.xlu0 %v5372_v7 }
 0x383   : > { %v3597_v10 = vpop.f32.mrb[48].mxu0  ;;  %2621 = vadd.xlane.f32.xlu1 %v5375_v53 }
 0x384   : > { %v3598_v43 = vpop.f32.mrb[49].mxu0 }
 0x385   : > { %v3599_v11 = vadd.f32 %v3598_v43, %v3597_v10  ;;  %v3600_v54 = vpop.f32.mrb[50].mxu0 }
 0x386   : > { %v3601_v22 = vpop.f32.mrb[51].mxu0 }
 0x387   : > { %v5380_v6 = vadd.f32 %v3599_v11, %v5345_v61  ;;  %v3602_v19 = vadd.f32 %v3601_v22, %v3600_v54 }
 0x389   : > { %v5383_v8 = vadd.f32 %v3602_v19, %v5345_v61  ;;  %2623 = vadd.xlane.f32.xlu0 %v5380_v6 }
 0x38b   : > { %v3603_v56 = vpop.f32.mrb[52].mxu0  ;;  %2625 = vadd.xlane.f32.xlu1 %v5383_v8 }
 0x38c   : > { %v3604_v62 = vpop.f32.mrb[53].mxu0 }
 0x38d   : > { %v3605_v21 = vadd.f32 %v3604_v62, %v3603_v56  ;;  %v3606_v50 = vpop.f32.mrb[54].mxu0 }
 0x38e   : > { %v3607_v36 = vpop.f32.mrb[55].mxu0 }
 0x38f   : > { %v5388_v51 = vadd.f32 %v3605_v21, %v5345_v61  ;;  %v3608_v4 = vadd.f32 %v3607_v36, %v3606_v50 }
 0x391   : > { %v5391_v17 = vadd.f32 %v3608_v4, %v5345_v61  ;;  %2627 = vadd.xlane.f32.xlu0 %v5388_v51 }
 0x393   : > { %2629 = vadd.xlane.f32.xlu1 %v5391_v17 }
 0x396   : > { %v3609_v0 = vpop.f32.mrb[56].mxu0 }
 0x397   : > { %v3610_v30 = vpop.f32.mrb[57].mxu0 }
 0x398   : > { %v3611_v23 = vadd.f32 %v3610_v30, %v3609_v0  ;;  %v3612_v39 = vpop.f32.mrb[58].mxu0 }
 0x399   : > { %v3613_v2 = vpop.f32.mrb[59].mxu0 }
 0x39a   : > { %v5396_v31 = vadd.f32 %v3611_v23, %v5345_v61  ;;  %v3614_v29 = vadd.f32 %v3613_v2, %v3612_v39 }
 0x39c   : > { %v5399_v13 = vadd.f32 %v3614_v29, %v5345_v61  ;;  %2631 = vadd.xlane.f32.xlu0 %v5396_v31 }
 0x39e   : > { %2633 = vadd.xlane.f32.xlu1 %v5399_v13 }
 0x39f   : > { %v3615_v46 = vpop.f32.mrb[60].mxu0 }
 0x3a0   : > { %v3616_v16 = vpop.f32.mrb[61].mxu0 }
 0x3a1   : > { %v3617_v59 = vadd.f32 %v3616_v16, %v3615_v46  ;;  %v3618_v25 = vpop.f32.mrb[62].mxu0 }
 0x3a2   : > { %v3619_v63 = vpop.f32.mrb[63].mxu0 }
 0x3a3   : > { %v5404_v26 = vadd.f32 %v3617_v59, %v5345_v61  ;;  %v3620_v27 = vadd.f32 %v3619_v63, %v3618_v25 }
 0x3a5   : > { %v5407_v28 = vadd.f32 %v3620_v27, %v5345_v61  ;;  %2635 = vadd.xlane.f32.xlu0 %v5404_v26 }
 0x3a7   : > { %2637 = vadd.xlane.f32.xlu1 %v5407_v28  ;;  %v3621_v47 = vpop.f32.mrb[64].mxu0 }
 0x3a8   : > { %v3622_v14 = vpop.f32.mrb[65].mxu0 }
 0x3a9   : > { %v3623_v41 = vadd.f32 %v3622_v14, %v3621_v47  ;;  %v3624_v57 = vpop.f32.mrb[66].mxu0 }
 0x3aa   : > { %v3625_v20 = vpop.f32.mrb[67].mxu0 }
 0x3ab   : > { %v5412_v18 = vadd.f32 %v3623_v41, %v5345_v61  ;;  %v3626_v37 = vadd.f32 %v3625_v20, %v3624_v57 }
 0x3ad   : > { %v5415_v40 = vadd.f32 %v3626_v37, %v5345_v61  ;;  %2639 = vadd.xlane.f32.xlu0 %v5412_v18 }
 0x3af   : > { %2641 = vadd.xlane.f32.xlu1 %v5415_v40  ;;  %v3627_v15 = vpop.f32.mrb[68].mxu0 }
 0x3b0   : > { %v3628_v58 = vpop.f32.mrb[69].mxu0 }
 0x3b1   : > { %v3629_v44 = vadd.f32 %v3628_v58, %v3627_v15  ;;  %v3630_v32 = vpop.f32.mrb[70].mxu0 }
 0x3b2   : > { %v3631_v35 = vpop.f32.mrb[71].mxu0 }
 0x3b3   : > { %v5420_v38 = vadd.f32 %v3629_v44, %v5345_v61  ;;  %v3632_v12 = vadd.f32 %v3631_v35, %v3630_v32 }
 0x3b5   : > { %v5423_v52 = vadd.f32 %v3632_v12, %v5345_v61  ;;  %2643 = vadd.xlane.f32.xlu0 %v5420_v38 }
 0x3b7   : > { %2645 = vadd.xlane.f32.xlu1 %v5423_v52  ;;  %v3633_v33 = vpop.f32.mrb[72].mxu0 }
 0x3b8   : > { %v3634_v3 = vpop.f32.mrb[73].mxu0 }
 0x3b9   : > { %v3635_v42 = vadd.f32 %v3634_v3, %v3633_v33  ;;  %v3636_v1 = vpop.f32.mrb[74].mxu0 }
 0x3ba   : > { %v3637_v5 = vpop.f32.mrb[75].mxu0 }
 0x3bb   : > { %v5428_v34 = vadd.f32 %v3635_v42, %v5345_v61  ;;  %v3638_v60 = vadd.f32 %v3637_v5, %v3636_v1 }
 0x3bd   : > { %v5431_v10 = vadd.f32 %v3638_v60, %v5345_v61  ;;  %2647 = vadd.xlane.f32.xlu0 %v5428_v34 }
 0x3bf   : > { %2649 = vadd.xlane.f32.xlu1 %v5431_v10  ;;  %v3639_v43 = vpop.f32.mrb[76].mxu0 }
 0x3c0   : > { %v3640_v11 = vpop.f32.mrb[77].mxu0 }
 0x3c1   : > { %v3641_v54 = vadd.f32 %v3640_v11, %v3639_v43  ;;  %v3642_v22 = vpop.f32.mrb[78].mxu0 }
 0x3c2   : > { %v3643_v19 = vpop.f32.mrb[79].mxu0 }
 0x3c3   : > { %v5436_v56 = vadd.f32 %v3641_v54, %v5345_v61  ;;  %v3644_v62 = vadd.f32 %v3643_v19, %v3642_v22 }
 0x3c5   : > { %v5439_v21 = vadd.f32 %v3644_v62, %v5345_v61  ;;  %2651 = vadd.xlane.f32.xlu0 %v5436_v56 }
 0x3c7   : > { %2653 = vadd.xlane.f32.xlu1 %v5439_v21  ;;  %v3645_v50 = vpop.f32.mrb[80].mxu0 }
 0x3c8   : > { %v3646_v36 = vpop.f32.mrb[81].mxu0 }
 0x3c9   : > { %v3647_v4 = vadd.f32 %v3646_v36, %v3645_v50  ;;  %v3648_v0 = vpop.f32.mrb[82].mxu0 }
 0x3ca   : > { %v3649_v30 = vpop.f32.mrb[83].mxu0 }
 0x3cb   : > { %v5444_v23 = vadd.f32 %v3647_v4, %v5345_v61  ;;  %v3650_v39 = vadd.f32 %v3649_v30, %v3648_v0 }
 0x3cd   : > { %v5447_v2 = vadd.f32 %v3650_v39, %v5345_v61  ;;  %2655 = vadd.xlane.f32.xlu0 %v5444_v23 }
 0x3cf   : > { %2657 = vadd.xlane.f32.xlu1 %v5447_v2  ;;  %v3651_v29 = vpop.f32.mrb[84].mxu0 }
 0x3d0   : > { %v3652_v46 = vpop.f32.mrb[85].mxu0 }
 0x3d1   : > { %v3653_v16 = vadd.f32 %v3652_v46, %v3651_v29  ;;  %v3654_v59 = vpop.f32.mrb[86].mxu0 }
 0x3d2   : > { %v3655_v25 = vpop.f32.mrb[87].mxu0 }
 0x3d3   : > { %v5452_v63 = vadd.f32 %v3653_v16, %v5345_v61  ;;  %v3656_v27 = vadd.f32 %v3655_v25, %v3654_v59 }
 0x3d5   : > { %v5455_v47 = vadd.f32 %v3656_v27, %v5345_v61  ;;  %2659 = vadd.xlane.f32.xlu0 %v5452_v63 }
 0x3d7   : > { %2661 = vadd.xlane.f32.xlu1 %v5455_v47 }
 0x3f6   : > { %v2608_v32 = vpop.xlane.xlu0 %2607 }
 0x3f7   : > { %v2671_v12 = vmul.f32 0.0078125, %v2608_v32 }
 0x3f8   : > { %v2610_v35 = vpop.xlane.xlu1 %2609 }
 0x3f9   : > { %v2672_v1 = vmul.f32 0.0078125, %v2610_v35  ;;  %v5468_v54 = vsub.f32 %v5348_v48, %v2671_v12 }
 0x3fb   : > { %v5474_v36 = vsub.f32 %v5351_v9, %v2672_v1  ;;  %v2735_v29 = vmul.f32 %v5468_v54, %v5468_v54 }
 0x3fe   : > { %v2612_v3 = vpop.xlane.xlu0 %2611 }
 0x3ff   : > { %v2673_v22 = vmul.f32 0.0078125, %v2612_v3 }
 0x400   : > { %v2614_v43 = vpop.xlane.xlu1 %2613 }
 0x401   : > { %v2674_v4 = vmul.f32 0.0078125, %v2614_v43  ;;  %v5481_v39 = vsub.f32 %v5356_v24, %v2673_v22 }
 0x403   : > { %v5487_v9 = vsub.f32 %v5359_v49, %v2674_v4  ;;  %v2737_v27 = vmul.f32 %v5481_v39, %v5481_v39 }
 0x406   : > { %v2616_v50 = vpop.xlane.xlu0 %2615 }
 0x407   : > { %v2675_v48 = vmul.f32 0.0078125, %v2616_v50 }
 0x408   : > { %v2618_v30 = vpop.xlane.xlu1 %2617 }
 0x409   : > { %v2676_v16 = vmul.f32 0.0078125, %v2618_v30  ;;  %v5492_v25 = vsub.f32 %v5364_v55, %v2675_v48 }
 0x40a   : > { %v3657_v14 = vpop.f32.mrb[88].mxu0 }
 0x40b   : > { %v3658_v41 = vpop.f32.mrb[89].mxu0 }
 0x40c   : > { %v3659_v57 = vadd.f32 %v3658_v41, %v3657_v14  ;;  %v3660_v20 = vpop.f32.mrb[90].mxu0  ;;  %v5497_v41 = vsub.f32 %v5367_v45, %v2676_v16 }
 0x40d   : > { %v3661_v37 = vpop.f32.mrb[91].mxu0 }
 0x40e   : > { %v5460_v15 = vadd.f32 %v3659_v57, %v5345_v61  ;;  %v3662_v58 = vadd.f32 %v3661_v37, %v3660_v20  ;;  %v2620_v46 = vpop.xlane.xlu0 %2619  ;;  %v2738_v57 = vmul.f32 %v5487_v9, %v5487_v9  ;;  %v2740_v12 = vmul.f32 %v5497_v41, %v5497_v41 }
 0x40f   : > { %v2677_v24 = vmul.f32 0.0078125, %v2620_v46 }
 0x410   : > { %v5463_v44 = vadd.f32 %v3662_v58, %v5345_v61  ;;  %2663 = vadd.xlane.f32.xlu0 %v5460_v15  ;;  %v2622_v59 = vpop.xlane.xlu1 %2621  ;;  %v2739_v58 = vmul.f32 %v5492_v25, %v5492_v25 }
 0x411   : > { %v2678_v49 = vmul.f32 0.0078125, %v2622_v59  ;;  %v5502_v37 = vsub.f32 %v5372_v7, %v2677_v24 }
 0x412   : > { %2665 = vadd.xlane.f32.xlu1 %v5463_v44 }
 0x413   : > { %v5507_v35 = vsub.f32 %v5375_v53, %v2678_v49 }
 0x416   : > { %v2624_v14 = vpop.xlane.xlu0 %2623 }
 0x417   : > { %v2679_v55 = vmul.f32 0.0078125, %v2624_v14 }
 0x418   : > { %v2626_v20 = vpop.xlane.xlu1 %2625 }
 0x419   : > { %v2680_v45 = vmul.f32 0.0078125, %v2626_v20  ;;  %v5512_v3 = vsub.f32 %v5380_v6, %v2679_v55 }
 0x41b   : > { %v2743_v22 = vmul.f32 %v5512_v3, %v5512_v3 }
 0x41e   : > { %v2628_v32 = vpop.xlane.xlu0 %2627 }
 0x41f   : > { %v2681_v7 = vmul.f32 0.0078125, %v2628_v32 }
 0x422   : > { %v3663_v33 = vpop.f32.mrb[92].mxu0 }
 0x423   : > { %v3664_v42 = vpop.f32.mrb[93].mxu0 }
 0x424   : > { %v3665_v5 = vadd.f32 %v3664_v42, %v3663_v33  ;;  %v3666_v60 = vpop.f32.mrb[94].mxu0  ;;  %v2630_v33 = vpop.xlane.xlu1 %2629  ;;  %v2741_v42 = vmul.f32 %v5502_v37, %v5502_v37 }
 0x425   : > { %v3667_v11 = vpop.f32.mrb[95].mxu0  ;;  %v2682_v53 = vmul.f32 0.0078125, %v2630_v33 }
 0x426   : > { %v5471_v19 = vadd.f32 %v3665_v5, %v5345_v61  ;;  %v3668_v62 = vadd.f32 %v3667_v11, %v3666_v60  ;;  %v5517_v5 = vsub.f32 %v5383_v8, %v2680_v45  ;;  %v2742_v60 = vmul.f32 %v5507_v35, %v5507_v35 }
 0x427   : > { %v5522_v11 = vsub.f32 %v5388_v51, %v2681_v7  ;;  %v5527_v50 = vsub.f32 %v5391_v17, %v2682_v53 }
 0x428   : > { %v5477_v0 = vadd.f32 %v3668_v62, %v5345_v61  ;;  %2667 = vadd.xlane.f32.xlu0 %v5471_v19  ;;  %v2736_v61 = vmul.f32 %v5474_v36, %v5474_v36  ;;  %v2744_v4 = vmul.f32 %v5517_v5, %v5517_v5 }
 0x429   : > { %v2632_v1 = vpop.xlane.xlu0 %2631 }
 0x42a   : > { %2669 = vadd.xlane.f32.xlu1 %v5477_v0  ;;  %v2683_v6 = vmul.f32 0.0078125, %v2632_v1 }
 0x42b   : > { %v2634_v43 = vpop.xlane.xlu1 %2633 }
 0x42c   : > { %2767 = vadd.xlane.f32.xlu0 %v2735_v29  ;;  %v2684_v8 = vmul.f32 0.0078125, %v2634_v43  ;;  %v5532_v48 = vsub.f32 %v5396_v31, %v2683_v6  ;;  %v2745_v29 = vmul.f32 %v5522_v11, %v5522_v11 }
 0x42e   : > { %2769 = vadd.xlane.f32.xlu1 %v2736_v61  ;;  %v5537_v16 = vsub.f32 %v5399_v13, %v2684_v8  ;;  %v2746_v61 = vmul.f32 %v5527_v50, %v5527_v50 }
 0x430   : > { %2771 = vadd.xlane.f32.xlu0 %v2737_v27  ;;  %v2747_v27 = vmul.f32 %v5532_v48, %v5532_v48 }
 0x432   : > { %2773 = vadd.xlane.f32.xlu1 %v2738_v57  ;;  %v2636_v62 = vpop.xlane.xlu0 %2635  ;;  %v2748_v57 = vmul.f32 %v5537_v16, %v5537_v16 }
 0x433   : > { %v2685_v51 = vmul.f32 0.0078125, %v2636_v62 }
 0x434   : > { %2775 = vadd.xlane.f32.xlu0 %v2739_v58  ;;  %v2638_v30 = vpop.xlane.xlu1 %2637 }
 0x435   : > { %v2686_v17 = vmul.f32 0.0078125, %v2638_v30  ;;  %v5542_v24 = vsub.f32 %v5404_v26, %v2685_v51 }
 0x436   : > { %2777 = vadd.xlane.f32.xlu1 %v2740_v12 }
 0x437   : > { %v5547_v49 = vsub.f32 %v5407_v28, %v2686_v17  ;;  %v2749_v58 = vmul.f32 %v5542_v24, %v5542_v24 }
 0x438   : > { %2779 = vadd.xlane.f32.xlu0 %v2741_v42 }
 0x439   : > { %v2750_v28 = vmul.f32 %v5547_v49, %v5547_v49 }
 0x43a   : > { %2781 = vadd.xlane.f32.xlu1 %v2742_v60  ;;  %v2640_v46 = vpop.xlane.xlu0 %2639 }
 0x43b   : > { %v2687_v31 = vmul.f32 0.0078125, %v2640_v46 }
 0x43c   : > { %2783 = vadd.xlane.f32.xlu0 %v2743_v22  ;;  %v2642_v59 = vpop.xlane.xlu1 %2641 }
 0x43d   : > { %v2688_v13 = vmul.f32 0.0078125, %v2642_v59  ;;  %v5552_v55 = vsub.f32 %v5412_v18, %v2687_v31 }
 0x43e   : > { %2785 = vadd.xlane.f32.xlu1 %v2744_v4 }
 0x43f   : > { %v5557_v32 = vsub.f32 %v5415_v40, %v2688_v13  ;;  %v2751_v18 = vmul.f32 %v5552_v55, %v5552_v55 }
 0x440   : > { %2787 = vadd.xlane.f32.xlu0 %v2745_v29 }
 0x441   : > { %v2752_v40 = vmul.f32 %v5557_v32, %v5557_v32 }
 0x442   : > { %2789 = vadd.xlane.f32.xlu1 %v2746_v61  ;;  %v2644_v14 = vpop.xlane.xlu0 %2643 }
 0x443   : > { %v2689_v26 = vmul.f32 0.0078125, %v2644_v14 }
 0x444   : > { %2791 = vadd.xlane.f32.xlu0 %v2747_v27  ;;  %v2646_v20 = vpop.xlane.xlu1 %2645 }
 0x445   : > { %v2690_v45 = vmul.f32 0.0078125, %v2646_v20  ;;  %v5562_v12 = vsub.f32 %v5420_v38, %v2689_v26 }
 0x446   : > { %2793 = vadd.xlane.f32.xlu1 %v2748_v57 }
 0x447   : > { %v5567_v42 = vsub.f32 %v5423_v52, %v2690_v45  ;;  %v2753_v38 = vmul.f32 %v5562_v12, %v5562_v12 }
 0x448   : > { %2795 = vadd.xlane.f32.xlu0 %v2749_v58 }
 0x449   : > { %v2754_v52 = vmul.f32 %v5567_v42, %v5567_v42 }
 0x44a   : > { %v2648_v33 = vpop.xlane.xlu0 %2647  ;;  %2797 = vadd.xlane.f32.xlu1 %v2750_v28 }
 0x44b   : > { %v2691_v7 = vmul.f32 0.0078125, %v2648_v33 }
 0x44c   : > { %v2650_v1 = vpop.xlane.xlu1 %2649  ;;  %2799 = vadd.xlane.f32.xlu0 %v2751_v18 }
 0x44d   : > { %v2692_v53 = vmul.f32 0.0078125, %v2650_v1  ;;  %v5572_v60 = vsub.f32 %v5428_v34, %v2691_v7 }
 0x44e   : > { %2801 = vadd.xlane.f32.xlu1 %v2752_v40 }
 0x44f   : > { %v5577_v43 = vsub.f32 %v5431_v10, %v2692_v53  ;;  %v2755_v22 = vmul.f32 %v5572_v60, %v5572_v60 }
 0x450   : > { %2803 = vadd.xlane.f32.xlu0 %v2753_v38 }
 0x451   : > { %v2756_v34 = vmul.f32 %v5577_v43, %v5577_v43 }
 0x452   : > { %v2652_v6 = vpop.xlane.xlu0 %2651  ;;  %2805 = vadd.xlane.f32.xlu1 %v2754_v52 }
 0x453   : > { %v2693_v62 = vmul.f32 0.0078125, %v2652_v6 }
 0x454   : > { %v2654_v8 = vpop.xlane.xlu1 %2653  ;;  %2807 = vadd.xlane.f32.xlu0 %v2755_v22 }
 0x455   : > { %v5586_v4 = vsub.f32 %v5436_v56, %v2693_v62  ;;  %v2694_v10 = vmul.f32 0.0078125, %v2654_v8 }
 0x456   : > { %2809 = vadd.xlane.f32.xlu1 %v2756_v34 }
 0x457   : > { %v5589_v30 = vsub.f32 %v5439_v21, %v2694_v10  ;;  %v2757_v51 = vmul.f32 %v5586_v4, %v5586_v4 }
 0x459   : > { %2811 = vadd.xlane.f32.xlu0 %v2757_v51  ;;  %v2758_v29 = vmul.f32 %v5589_v30, %v5589_v30 }
 0x45a   : > { %v2656_v46 = vpop.xlane.xlu0 %2655 }
 0x45b   : > { %v2695_v17 = vmul.f32 0.0078125, %v2656_v46  ;;  %2813 = vadd.xlane.f32.xlu1 %v2758_v29 }
 0x45c   : > { %v2658_v61 = vpop.xlane.xlu1 %2657 }
 0x45d   : > { %v5596_v59 = vsub.f32 %v5444_v23, %v2695_v17  ;;  %v2696_v56 = vmul.f32 0.0078125, %v2658_v61 }
 0x45f   : > { %v5599_v31 = vsub.f32 %v5447_v2, %v2696_v56  ;;  %v2759_v21 = vmul.f32 %v5596_v59, %v5596_v59 }
 0x461   : > { %2815 = vadd.xlane.f32.xlu0 %v2759_v21  ;;  %v2760_v27 = vmul.f32 %v5599_v31, %v5599_v31 }
 0x462   : > { %v2660_v14 = vpop.xlane.xlu0 %2659 }
 0x463   : > { %v2697_v13 = vmul.f32 0.0078125, %v2660_v14  ;;  %2817 = vadd.xlane.f32.xlu1 %v2760_v27 }
 0x464   : > { %v2662_v57 = vpop.xlane.xlu1 %2661 }
 0x465   : > { %v5606_v20 = vsub.f32 %v5452_v63, %v2697_v13  ;;  %v2698_v23 = vmul.f32 0.0078125, %v2662_v57 }
 0x467   : > { %v5609_v26 = vsub.f32 %v5455_v47, %v2698_v23  ;;  %v2761_v2 = vmul.f32 %v5606_v20, %v5606_v20 }
 0x469   : > { %2819 = vadd.xlane.f32.xlu0 %v2761_v2  ;;  %v2762_v58 = vmul.f32 %v5609_v26, %v5609_v26  ;;  %v5638_v2 = vld [vmem:[%s5848_s7 + $0x1] ss:$0 sm:$0xff] }
 0x46b   : > { %2821 = vadd.xlane.f32.xlu1 %v2762_v58 }
 0x49d   : > { %v2664_v45 = vpop.xlane.xlu0 %2663 }
 0x49e   : > { %v2699_v28 = vmul.f32 0.0078125, %v2664_v45 }
 0x49f   : > { %v2666_v33 = vpop.xlane.xlu1 %2665 }
 0x4a0   : > { %v5616_v18 = vsub.f32 %v5460_v15, %v2699_v28  ;;  %v2700_v63 = vmul.f32 0.0078125, %v2666_v33 }
 0x4a2   : > { %v5619_v7 = vsub.f32 %v5463_v44, %v2700_v63  ;;  %v2763_v47 = vmul.f32 %v5616_v18, %v5616_v18 }
 0x4a4   : > { %2823 = vadd.xlane.f32.xlu0 %v2763_v47  ;;  %v2764_v1 = vmul.f32 %v5619_v7, %v5619_v7 }
 0x4a6   : > { %2825 = vadd.xlane.f32.xlu1 %v2764_v1 }
 0x4b5   : > { %v2668_v40 = vpop.xlane.xlu0 %2667 }
 0x4b6   : > { %v2701_v53 = vmul.f32 0.0078125, %v2668_v40 }
 0x4b7   : > { %v2670_v38 = vpop.xlane.xlu1 %2669 }
 0x4b8   : > { %v5626_v52 = vsub.f32 %v5471_v19, %v2701_v53  ;;  %v2702_v15 = vmul.f32 0.0078125, %v2670_v38  ;;  %v5645_v38 = vld [vmem:[%s5848_s7 + $0x2] ss:$0 sm:$0xff] }
 0x4b9   : > { %v2768_v6 = vpop.xlane.xlu0 %2767 }
 0x4ba   : > { %v5629_v22 = vsub.f32 %v5477_v0, %v2702_v15  ;;  %v2831_v44 = vmul.f32 0.0078125, %v2768_v6  ;;  %v2765_v62 = vmul.f32 %v5626_v52, %v5626_v52 }
 0x4bb   : > { %v2770_v8 = vpop.xlane.xlu1 %2769 }
 0x4bc   : > { %v2863_v34 = vadd.f32 1e-05, %v2831_v44  ;;  %v2832_v10 = vmul.f32 0.0078125, %v2770_v8  ;;  %2827 = vadd.xlane.f32.xlu0 %v2765_v62  ;;  %v2766_v51 = vmul.f32 %v5629_v22, %v5629_v22 }
 0x4bd   : > { %v2772_v29 = vpop.xlane.xlu0 %2771 }
 0x4be   : > { %3997 = vrsqrt.f32 %v2863_v34  ;;  %v2864_v19 = vadd.f32 1e-05, %v2832_v10  ;;  %v2833_v46 = vmul.f32 0.0078125, %v2772_v29  ;;  %2829 = vadd.xlane.f32.xlu1 %v2766_v51 }
 0x4bf   : > { %v2774_v17 = vpop.xlane.xlu1 %2773 }
 0x4c0   : > { %3999 = vrsqrt.f32 %v2864_v19  ;;  %v2865_v0 = vadd.f32 1e-05, %v2833_v46  ;;  %v2834_v61 = vmul.f32 0.0078125, %v2774_v17 }
 0x4c1   : > { %v2776_v56 = vpop.xlane.xlu0 %2775 }
 0x4c2   : > { %4001 = vrsqrt.f32 %v2865_v0  ;;  %v2866_v21 = vadd.f32 1e-05, %v2834_v61  ;;  %v2835_v27 = vmul.f32 0.0078125, %v2776_v56 }
 0x4c3   : > { %v2778_v14 = vpop.xlane.xlu1 %2777 }
 0x4c4   : > { %4003 = vrsqrt.f32 %v2866_v21  ;;  %v2867_v13 = vadd.f32 1e-05, %v2835_v27  ;;  %v2836_v57 = vmul.f32 0.0078125, %v2778_v14 }
 0x4c5   : > { %v2780_v23 = vpop.xlane.xlu0 %2779 }
 0x4c6   : > { %4005 = vrsqrt.f32 %v2867_v13  ;;  %v2868_v58 = vadd.f32 1e-05, %v2836_v57  ;;  %v2837_v45 = vmul.f32 0.0078125, %v2780_v23 }
 0x4c7   : > { %v2782_v28 = vpop.xlane.xlu1 %2781 }
 0x4c8   : > { %v3998_v33 = vpop.eup %3997  ;;  %4007 = vrsqrt.f32 %v2868_v58  ;;  %v2869_v63 = vadd.f32 1e-05, %v2837_v45  ;;  %v2838_v47 = vmul.f32 0.0078125, %v2782_v28 }
 0x4c9   : > { %v2931_v1 = vmul.f32 %v3998_v33, %v5638_v2  ;;  %v2784_v40 = vpop.xlane.xlu0 %2783 }
 0x4ca   : > { %v4000_v53 = vpop.eup %3999  ;;  %4009 = vrsqrt.f32 %v2869_v63  ;;  %v2870_v15 = vadd.f32 1e-05, %v2838_v47  ;;  %v2839_v6 = vmul.f32 0.0078125, %v2784_v40 }
 0x4cb   : > { %v2963_v44 = vmul.f32 %v2931_v1, %v5468_v54  ;;  %v2932_v62 = vmul.f32 %v4000_v53, %v5638_v2  ;;  %v2786_v8 = vpop.xlane.xlu1 %2785 }
 0x4cc   : > { %v4002_v34 = vpop.eup %4001  ;;  %4011 = vrsqrt.f32 %v2870_v15  ;;  %v2871_v10 = vadd.f32 1e-05, %v2839_v6  ;;  %v2840_v51 = vmul.f32 0.0078125, %v2786_v8 }
 0x4cd   : > { %v2999_v29 = vadd.f32 %v5645_v38, %v2963_v44  ;;  %v2964_v19 = vmul.f32 %v2932_v62, %v5474_v36  ;;  %v2933_v46 = vmul.f32 %v4002_v34, %v5638_v2  ;;  %v2788_v17 = vpop.xlane.xlu0 %2787 }
 0x4ce   : > { %v4004_v0 = vpop.eup %4003  ;;  %4013 = vrsqrt.f32 %v2871_v10  ;;  %v2872_v61 = vadd.f32 1e-05, %v2840_v51  ;;  %v2841_v56 = vmul.f32 0.0078125, %v2788_v17 }
 0x4cf   : > { %v3031_v21 = vmax.f32 %v2999_v29, 0.0  ;;  %v3000_v54 = vadd.f32 %v5645_v38, %v2964_v19  ;;  %v2965_v27 = vmul.f32 %v2933_v46, %v5481_v39  ;;  %v2934_v14 = vmul.f32 %v4004_v0, %v5638_v2  ;;  %v2790_v13 = vpop.xlane.xlu1 %2789 }
 0x4d0   : > { %v4006_v57 = vpop.eup %4005  ;;  %4015 = vrsqrt.f32 %v2872_v61  ;;  %v2873_v23 = vadd.f32 1e-05, %v2841_v56  ;;  %v2842_v58 = vmul.f32 0.0078125, %v2790_v13 }
 0x4d1   : > { %3063 = vst [vmem:[%s5657_s12] sm:$0xff] %v3031_v21  ;;  %v3032_v36 = vmax.f32 %v3000_v54, 0.0  ;;  %v3001_v45 = vadd.f32 %v5645_v38, %v2965_v27  ;;  %v2966_v28 = vmul.f32 %v2934_v14, %v5487_v9  ;;  %v2935_v33 = vmul.f32 %v4006_v57, %v5638_v2  ;;  %v2792_v39 = vpop.xlane.xlu0 %2791 }
 0x4d2   : > { %v4008_v63 = vpop.eup %4007  ;;  %4017 = vrsqrt.f32 %v2873_v23  ;;  %v2874_v47 = vadd.f32 1e-05, %v2842_v58  ;;  %v2843_v1 = vmul.f32 0.0078125, %v2792_v39 }
 0x4d3   : > { %3064 = vst [vmem:[%s5657_s12 + $0x8] sm:$0xff] %v3032_v36  ;;  %v3033_v40 = vmax.f32 %v3001_v45, 0.0  ;;  %v3002_v53 = vadd.f32 %v5645_v38, %v2966_v28  ;;  %v2967_v15 = vmul.f32 %v2935_v33, %v5492_v25  ;;  %v2936_v6 = vmul.f32 %v4008_v63, %v5638_v2  ;;  %v2794_v44 = vpop.xlane.xlu1 %2793 }
 0x4d4   : > { %v4010_v62 = vpop.eup %4009  ;;  %4019 = vrsqrt.f32 %v2874_v47  ;;  %v2875_v9 = vadd.f32 1e-05, %v2843_v1  ;;  %v2844_v8 = vmul.f32 0.0078125, %v2794_v44 }
 0x4d5   : > { %3065 = vst [vmem:[%s5657_s12 + $0x10] sm:$0xff] %v3033_v40  ;;  %v3034_v34 = vmax.f32 %v3002_v53, 0.0  ;;  %v3003_v10 = vadd.f32 %v5645_v38, %v2967_v15  ;;  %v2968_v51 = vmul.f32 %v2936_v6, %v5497_v41  ;;  %v2937_v29 = vmul.f32 %v4010_v62, %v5638_v2  ;;  %v2796_v19 = vpop.xlane.xlu0 %2795 }
 0x4d6   : > { %v4012_v46 = vpop.eup %4011  ;;  %4021 = vrsqrt.f32 %v2875_v9  ;;  %v2876_v25 = vadd.f32 1e-05, %v2844_v8  ;;  %v2845_v17 = vmul.f32 0.0078125, %v2796_v19 }
 0x4d7   : > { %3066 = vst [vmem:[%s5657_s12 + $0x18] sm:$0xff] %v3034_v34  ;;  %v3035_v0 = vmax.f32 %v3003_v10, 0.0  ;;  %v3004_v61 = vadd.f32 %v5645_v38, %v2968_v51  ;;  %v2969_v56 = vmul.f32 %v2937_v29, %v5502_v37  ;;  %v2938_v21 = vmul.f32 %v4012_v46, %v5638_v2  ;;  %v2798_v54 = vpop.xlane.xlu1 %2797 }
 0x4d8   : > { %v4014_v27 = vpop.eup %4013  ;;  %4023 = vrsqrt.f32 %v2876_v25  ;;  %v2877_v41 = vadd.f32 1e-05, %v2845_v17  ;;  %v2846_v14 = vmul.f32 0.0078125, %v2798_v54 }
 0x4d9   : > { %3067 = vst [vmem:[%s5657_s12 + $0x20] sm:$0xff] %v3035_v0  ;;  %v3036_v13 = vmax.f32 %v3004_v61, 0.0  ;;  %v3005_v57 = vadd.f32 %v5645_v38, %v2969_v56  ;;  %v2970_v23 = vmul.f32 %v2938_v21, %v5507_v35  ;;  %v2939_v58 = vmul.f32 %v4014_v27, %v5638_v2  ;;  %v2800_v36 = vpop.xlane.xlu0 %2799 }
 0x4da   : > { %v4016_v45 = vpop.eup %4015  ;;  %4025 = vrsqrt.f32 %v2877_v41  ;;  %v2878_v37 = vadd.f32 1e-05, %v2846_v14  ;;  %v2847_v28 = vmul.f32 0.0078125, %v2800_v36 }
 0x4db   : > { %3068 = vst [vmem:[%s5657_s12 + $0x28] sm:$0xff] %v3036_v13  ;;  %v3037_v33 = vmax.f32 %v3005_v57, 0.0  ;;  %v3006_v39 = vadd.f32 %v5645_v38, %v2970_v23  ;;  %v2971_v63 = vmul.f32 %v2939_v58, %v5512_v3  ;;  %v2940_v47 = vmul.f32 %v4016_v45, %v5638_v2  ;;  %v2802_v1 = vpop.xlane.xlu1 %2801 }
 0x4dc   : > { %v4018_v40 = vpop.eup %4017  ;;  %4027 = vrsqrt.f32 %v2878_v37  ;;  %v2879_v35 = vadd.f32 1e-05, %v2847_v28  ;;  %v2848_v53 = vmul.f32 0.0078125, %v2802_v1 }
 0x4dd   : > { %3069 = vst [vmem:[%s5657_s12 + $0x30] sm:$0xff] %v3037_v33  ;;  %v3038_v15 = vmax.f32 %v3006_v39, 0.0  ;;  %v3007_v6 = vadd.f32 %v5645_v38, %v2971_v63  ;;  %v2972_v44 = vmul.f32 %v2940_v47, %v5517_v5  ;;  %v2941_v62 = vmul.f32 %v4018_v40, %v5638_v2  ;;  %v2804_v9 = vpop.xlane.xlu0 %2803 }
 0x4de   : > { %v4020_v8 = vpop.eup %4019  ;;  %4029 = vrsqrt.f32 %v2879_v35  ;;  %v2880_v3 = vadd.f32 1e-05, %v2848_v53  ;;  %v2849_v34 = vmul.f32 0.0078125, %v2804_v9 }
 0x4df   : > { %3070 = vst [vmem:[%s5657_s12 + $0x38] sm:$0xff] %v3038_v15  ;;  %v3039_v10 = vmax.f32 %v3007_v6, 0.0  ;;  %v3008_v51 = vadd.f32 %v5645_v38, %v2972_v44  ;;  %v2973_v29 = vmul.f32 %v2941_v62, %v5522_v11  ;;  %v2942_v19 = vmul.f32 %v4020_v8, %v5638_v2  ;;  %v2806_v46 = vpop.xlane.xlu1 %2805 }
 0x4e0   : > { %v4022_v25 = vpop.eup %4021  ;;  %4031 = vrsqrt.f32 %v2880_v3  ;;  %v2881_v5 = vadd.f32 1e-05, %v2849_v34  ;;  %v2850_v17 = vmul.f32 0.0078125, %v2806_v46 }
 0x4e1   : > { %3071 = vst [vmem:[%s5657_s12 + $0x40] sm:$0xff] %v3039_v10  ;;  %v3040_v0 = vmax.f32 %v3008_v51, 0.0  ;;  %v3009_v61 = vadd.f32 %v5645_v38, %v2973_v29  ;;  %v2974_v56 = vmul.f32 %v2942_v19, %v5527_v50  ;;  %v2943_v21 = vmul.f32 %v4022_v25, %v5638_v2  ;;  %v2808_v54 = vpop.xlane.xlu0 %2807 }
 0x4e2   : > { %v4024_v27 = vpop.eup %4023  ;;  %4033 = vrsqrt.f32 %v2881_v5  ;;  %v2882_v11 = vadd.f32 1e-05, %v2850_v17  ;;  %v2851_v41 = vmul.f32 0.0078125, %v2808_v54 }
 0x4e3   : > { %3072 = vst [vmem:[%s5657_s12 + $0x48] sm:$0xff] %v3040_v0  ;;  %v3041_v14 = vmax.f32 %v3009_v61, 0.0  ;;  %v3010_v13 = vadd.f32 %v5645_v38, %v2974_v56  ;;  %v2975_v57 = vmul.f32 %v2943_v21, %v5532_v48  ;;  %v2944_v23 = vmul.f32 %v4024_v27, %v5638_v2  ;;  %v2810_v58 = vpop.xlane.xlu1 %2809 }
 0x4e4   : > { %v4026_v36 = vpop.eup %4025  ;;  %4035 = vrsqrt.f32 %v2882_v11  ;;  %v2883_v50 = vadd.f32 1e-05, %v2851_v41  ;;  %v2852_v45 = vmul.f32 0.0078125, %v2810_v58 }
 0x4e5   : > { %3073 = vst [vmem:[%s5657_s12 + $0x50] sm:$0xff] %v3041_v14  ;;  %v3042_v37 = vmax.f32 %v3010_v13, 0.0  ;;  %v3011_v28 = vadd.f32 %v5645_v38, %v2975_v57  ;;  %v2976_v33 = vmul.f32 %v2944_v23, %v5537_v16  ;;  %v2945_v39 = vmul.f32 %v4026_v36, %v5638_v2 }
 0x4e6   : > { %v4028_v63 = vpop.eup %4027  ;;  %4037 = vrsqrt.f32 %v2883_v50  ;;  %v2884_v48 = vadd.f32 1e-05, %v2852_v45  ;;  %v2812_v47 = vpop.xlane.xlu0 %2811 }
 0x4e7   : > { %3074 = vst [vmem:[%s5657_s12 + $0x58] sm:$0xff] %v3042_v37  ;;  %v3043_v1 = vmax.f32 %v3011_v28, 0.0  ;;  %v3012_v40 = vadd.f32 %v5645_v38, %v2976_v33  ;;  %v2977_v35 = vmul.f32 %v2945_v39, %v5542_v24  ;;  %v2946_v53 = vmul.f32 %v4028_v63, %v5638_v2 }
 0x4e8   : > { %v4030_v15 = vpop.eup %4029  ;;  %4039 = vrsqrt.f32 %v2884_v48  ;;  %v2853_v6 = vmul.f32 0.0078125, %v2812_v47  ;;  %v2814_v44 = vpop.xlane.xlu1 %2813 }
 0x4e9   : > { %3075 = vst [vmem:[%s5657_s12 + $0x60] sm:$0xff] %v3043_v1  ;;  %v3044_v16 = vmax.f32 %v3012_v40, 0.0  ;;  %v3013_v62 = vadd.f32 %v5645_v38, %v2977_v35  ;;  %v2978_v9 = vmul.f32 %v2946_v53, %v5547_v49  ;;  %v2947_v8 = vmul.f32 %v4030_v15, %v5638_v2 }
 0x4ea   : > { %v4032_v3 = vpop.eup %4031  ;;  %v2885_v34 = vadd.f32 1e-05, %v2853_v6  ;;  %v2854_v10 = vmul.f32 0.0078125, %v2814_v44 }
 0x4eb   : > { %3076 = vst [vmem:[%s5657_s12 + $0x68] sm:$0xff] %v3044_v16  ;;  %v3045_v24 = vmax.f32 %v3013_v62, 0.0  ;;  %v3014_v51 = vadd.f32 %v5645_v38, %v2978_v9  ;;  %v2979_v29 = vmul.f32 %v2947_v8, %v5552_v55  ;;  %v2948_v19 = vmul.f32 %v4032_v3, %v5638_v2 }
 0x4ec   : > { %v4034_v46 = vpop.eup %4033  ;;  %4041 = vrsqrt.f32 %v2885_v34  ;;  %v2886_v25 = vadd.f32 1e-05, %v2854_v10 }
 0x4ed   : > { %3077 = vst [vmem:[%s5657_s12 + $0x70] sm:$0xff] %v3045_v24  ;;  %v3046_v49 = vmax.f32 %v3014_v51, 0.0  ;;  %v3015_v5 = vadd.f32 %v5645_v38, %v2979_v29  ;;  %v2980_v17 = vmul.f32 %v2948_v19, %v5557_v32  ;;  %v2949_v0 = vmul.f32 %v4034_v46, %v5638_v2 }
 0x4ee   : > { %v4036_v61 = vpop.eup %4035  ;;  %4043 = vrsqrt.f32 %v2886_v25  ;;  %v2816_v56 = vpop.xlane.xlu0 %2815 }
 0x4ef   : > { %3078 = vst [vmem:[%s5657_s12 + $0x78] sm:$0xff] %v3046_v49  ;;  %v3047_v55 = vmax.f32 %v3015_v5, 0.0  ;;  %v3016_v21 = vadd.f32 %v5645_v38, %v2980_v17  ;;  %v2981_v54 = vmul.f32 %v2949_v0, %v5562_v12  ;;  %v2950_v27 = vmul.f32 %v4036_v61, %v5638_v2 }
 0x4f0   : > { %v4038_v11 = vpop.eup %4037  ;;  %v2855_v41 = vmul.f32 0.0078125, %v2816_v56  ;;  %v2818_v14 = vpop.xlane.xlu1 %2817 }
 0x4f1   : > { %3079 = vst [vmem:[%s5657_s12 + $0x80] sm:$0xff] %v3047_v55  ;;  %v3048_v32 = vmax.f32 %v3016_v21, 0.0  ;;  %v3017_v13 = vadd.f32 %v5645_v38, %v2981_v54  ;;  %v2982_v57 = vmul.f32 %v2950_v27, %v5567_v42  ;;  %v2951_v23 = vmul.f32 %v4038_v11, %v5638_v2 }
 0x4f2   : > { %v4040_v58 = vpop.eup %4039  ;;  %v2887_v36 = vadd.f32 1e-05, %v2855_v41  ;;  %v2856_v50 = vmul.f32 0.0078125, %v2818_v14 }
 0x4f3   : > { %3080 = vst [vmem:[%s5657_s12 + $0x88] sm:$0xff] %v3048_v32  ;;  %v3049_v12 = vmax.f32 %v3017_v13, 0.0  ;;  %v3018_v45 = vadd.f32 %v5645_v38, %v2982_v57  ;;  %v2983_v37 = vmul.f32 %v2951_v23, %v5572_v60  ;;  %v2952_v28 = vmul.f32 %v4040_v58, %v5638_v2 }
 0x4f4   : > { %4045 = vrsqrt.f32 %v2887_v36  ;;  %v2888_v33 = vadd.f32 1e-05, %v2856_v50 }
 0x4f5   : > { %3081 = vst [vmem:[%s5657_s12 + $0x90] sm:$0xff] %v3049_v12  ;;  %v3050_v39 = vmax.f32 %v3018_v45, 0.0  ;;  %v3019_v42 = vadd.f32 %v5645_v38, %v2983_v37  ;;  %v2984_v63 = vmul.f32 %v2952_v28, %v5577_v43 }
 0x4f6   : > { %v4042_v48 = vpop.eup %4041  ;;  %4047 = vrsqrt.f32 %v2888_v33  ;;  %v2820_v47 = vpop.xlane.xlu0 %2819 }
 0x4f7   : > { %3082 = vst [vmem:[%s5657_s12 + $0x98] sm:$0xff] %v3050_v39  ;;  %v3051_v1 = vmax.f32 %v3019_v42, 0.0  ;;  %v3020_v40 = vadd.f32 %v5645_v38, %v2984_v63  ;;  %v2953_v60 = vmul.f32 %v4042_v48, %v5638_v2  ;;  %v2857_v35 = vmul.f32 0.0078125, %v2820_v47 }
 0x4f8   : > { %v4044_v53 = vpop.eup %4043  ;;  %v2822_v15 = vpop.xlane.xlu1 %2821 }
 0x4f9   : > { %3083 = vst [vmem:[%s5657_s12 + $0xa0] sm:$0xff] %v3051_v1  ;;  %v3052_v6 = vmax.f32 %v3020_v40, 0.0  ;;  %v2985_v44 = vmul.f32 %v2953_v60, %v5586_v4  ;;  %v2954_v43 = vmul.f32 %v4044_v53, %v5638_v2  ;;  %v2889_v16 = vadd.f32 1e-05, %v2857_v35 }
 0x4fa   : > { %v2858_v62 = vmul.f32 0.0078125, %v2822_v15 }
 0x4fb   : > { %3084 = vst [vmem:[%s5657_s12 + $0xa8] sm:$0xff] %v3052_v6  ;;  %v3021_v9 = vadd.f32 %v5645_v38, %v2985_v44  ;;  %v2986_v8 = vmul.f32 %v2954_v43, %v5589_v30  ;;  %4049 = vrsqrt.f32 %v2889_v16 }
 0x4fc   : > { %v2890_v3 = vadd.f32 1e-05, %v2858_v62 }
 0x4fd   : > { %v3053_v34 = vmax.f32 %v3021_v9, 0.0  ;;  %v3022_v10 = vadd.f32 %v5645_v38, %v2986_v8 }
 0x4fe   : > { %v4046_v24 = vpop.eup %4045  ;;  %4051 = vrsqrt.f32 %v2890_v3 }
 0x4ff   : > { %3085 = vst [vmem:[%s5657_s12 + $0xb0] sm:$0xff] %v3053_v34  ;;  %v3054_v4 = vmax.f32 %v3022_v10, 0.0  ;;  %v2955_v51 = vmul.f32 %v4046_v24, %v5638_v2 }
 0x500   : > { %v4048_v29 = vpop.eup %4047 }
 0x501   : > { %3086 = vst [vmem:[%s5657_s12 + $0xb8] sm:$0xff] %v3054_v4  ;;  %v2987_v19 = vmul.f32 %v2955_v51, %v5596_v59  ;;  %v2956_v46 = vmul.f32 %v4048_v29, %v5638_v2 }
 0x503   : > { %v3023_v30 = vadd.f32 %v5645_v38, %v2987_v19  ;;  %v2988_v25 = vmul.f32 %v2956_v46, %v5599_v31 }
 0x505   : > { %v4050_v49 = vpop.eup %4049  ;;  %v3055_v5 = vmax.f32 %v3023_v30, 0.0  ;;  %v3024_v17 = vadd.f32 %v5645_v38, %v2988_v25 }
 0x506   : > { %v2957_v0 = vmul.f32 %v4050_v49, %v5638_v2 }
 0x507   : > { %3087 = vst [vmem:[%s5657_s12 + $0xc0] sm:$0xff] %v3055_v5  ;;  %v3056_v61 = vmax.f32 %v3024_v17, 0.0 }
 0x508   : > { %v4052_v56 = vpop.eup %4051  ;;  %v2989_v55 = vmul.f32 %v2957_v0, %v5606_v20 }
 0x509   : > { %3088 = vst [vmem:[%s5657_s12 + $0xc8] sm:$0xff] %v3056_v61  ;;  %v2958_v59 = vmul.f32 %v4052_v56, %v5638_v2 }
 0x50a   : > { %v3025_v21 = vadd.f32 %v5645_v38, %v2989_v55 }
 0x50b   : > { %v2990_v54 = vmul.f32 %v2958_v59, %v5609_v26 }
 0x50c   : > { %v3057_v31 = vmax.f32 %v3025_v21, 0.0 }
 0x50d   : > { %v3026_v27 = vadd.f32 %v5645_v38, %v2990_v54 }
 0x50e   : > { %3089 = vst [vmem:[%s5657_s12 + $0xd0] sm:$0xff] %v3057_v31 }
 0x50f   : > { %v3058_v11 = vmax.f32 %v3026_v27, 0.0 }
 0x511   : > { %3090 = vst [vmem:[%s5657_s12 + $0xd8] sm:$0xff] %v3058_v11 }
 0x531   : > { %v2824_v41 = vpop.xlane.xlu0 %2823 }
 0x532   : > { %v2859_v14 = vmul.f32 0.0078125, %v2824_v41 }
 0x533   : > { %v2826_v32 = vpop.xlane.xlu1 %2825 }
 0x534   : > { %v2891_v13 = vadd.f32 1e-05, %v2859_v14  ;;  %v2860_v57 = vmul.f32 0.0078125, %v2826_v32 }
 0x536   : > { %4053 = vrsqrt.f32 %v2891_v13  ;;  %v2892_v20 = vadd.f32 1e-05, %v2860_v57 }
 0x538   : > { %4055 = vrsqrt.f32 %v2892_v20 }
 0x540   : > { %v4054_v23 = vpop.eup %4053 }
 0x541   : > { %v2959_v58 = vmul.f32 %v4054_v23, %v5638_v2 }
 0x542   : > { %v4056_v26 = vpop.eup %4055 }
 0x543   : > { %v2991_v36 = vmul.f32 %v2959_v58, %v5616_v18  ;;  %v2960_v50 = vmul.f32 %v4056_v26, %v5638_v2 }
 0x545   : > { %v3027_v12 = vadd.f32 %v5645_v38, %v2991_v36  ;;  %v2992_v45 = vmul.f32 %v2960_v50, %v5619_v7 }
 0x547   : > { %v3059_v37 = vmax.f32 %v3027_v12, 0.0  ;;  %v3028_v28 = vadd.f32 %v5645_v38, %v2992_v45 }
 0x549   : > { %3091 = vst [vmem:[%s5657_s12 + $0xe0] sm:$0xff] %v3059_v37  ;;  %v3060_v33 = vmax.f32 %v3028_v28, 0.0  ;;  %v2828_v39 = vpop.xlane.xlu0 %2827 }
 0x54a   : > { %v2861_v42 = vmul.f32 0.0078125, %v2828_v39 }
 0x54b   : > { %3092 = vst [vmem:[%s5657_s12 + $0xe8] sm:$0xff] %v3060_v33  ;;  %v2830_v63 = vpop.xlane.xlu1 %2829 }
 0x54c   : > { %v2893_v48 = vadd.f32 1e-05, %v2861_v42  ;;  %v2862_v47 = vmul.f32 0.0078125, %v2830_v63 }
 0x54e   : > { %4057 = vrsqrt.f32 %v2893_v48  ;;  %v2894_v18 = vadd.f32 1e-05, %v2862_v47 }
 0x550   : > { %4059 = vrsqrt.f32 %v2894_v18 }
 0x558   : > { %v4058_v1 = vpop.eup %4057 }
 0x559   : > { %v2961_v7 = vmul.f32 %v4058_v1, %v5638_v2 }
 0x55a   : > { %v4060_v40 = vpop.eup %4059 }
 0x55b   : > { %v2993_v60 = vmul.f32 %v2961_v7, %v5626_v52  ;;  %v2962_v35 = vmul.f32 %v4060_v40, %v5638_v2 }
 0x55d   : > { %v3029_v53 = vadd.f32 %v5645_v38, %v2993_v60  ;;  %v2994_v15 = vmul.f32 %v2962_v35, %v5629_v22  ;;  %3102 = sbr.rel (!%p4215_p5) target bundleno = 1408 (0x580), region = 56 }
 0x55f   : > { %v3061_v6 = vmax.f32 %v3029_v53, 0.0  ;;  %v3030_v44 = vadd.f32 %v5645_v38, %v2994_v15 }
 0x561   : > { %3093 = vst [vmem:[%s5657_s12 + $0xf0] sm:$0xff] %v3061_v6  ;;  %v3062_v43 = vmax.f32 %v3030_v44, 0.0 }
 0x563   : > { %3094 = vst [vmem:[%s5657_s12 + $0xf8] sm:$0xff] %v3062_v43 }
 0x564   : > { %s6013_s20 = smov (!%p3105_p11, %s3104_s20), 32 }
 0x565   : > { %s5785_s22 = sshll.u32 %s6013_s20, 7 }
 0x566   : > { %s3109_s24 = ssub.s32 4096, %s5785_s22 }
 0x567   : > { %3110 = vsyncadd %s5780_s21, %s3109_s24  ;;  %p3324_p12 = scmp.ne.s32.totalorder %s5785_s22, 0  ;;  %s3332_s25 = sshll.u32 %s4198_s9, 12 }
 0x568   : > { %s5794_s23 = scalar_lea.hbm %s5849_s8, %s3332_s25  ;;  %s3115_s19 = sshll.u32 %s5657_s12, 4  ;;  %s5797_s19 = int_to_ptr.vmem [resolvable:$true] %s3115_s19 }
 0x569   : > { %s4065_s26 = scalar_lea.vmem %s5797_s19, %s5785_s22  ;;  %s4129_s10 = smov [#allocation2]  }
 0x56a   : > { %p4066_p13 = scmp.ne.s32.totalorder %s5797_s19, %s4065_s26  ;;  %s4069_s13 = sshll.u32 %s4129_s10, 4  ;;  %s4070_s13 = int_to_ptr.vmem [resolvable:$false] %s4069_s13 }
 0x56b   : > { %s4071_s9 = scalar_lea.vmem %s4070_s13, 8192  ;;  %p4072_p2 = scmp.lt.s32.totalorder %s5797_s19, %s4070_s13 }
 0x56c   : > { %p4067_p0 = pnand %p4066_p13, %p3324_p12  ;;  %p4073_p3 = scmp.lt.s32.totalorder %s4071_s9, %s4065_s26 }
 0x56e   : > { %p4068_p1 = pneg %p4067_p0  ;;  %p4074_p4 = por %p4073_p3, %p4072_p2 }
 0x570   : > { %p4075_p5 = pnand %p4074_p4, %p4068_p1 }
 0x572   : > { %4078 = shalt.err (!%p4075_p5)
}
 0x573   : > { %s4079_s18 = scalar_lea.hbm %s5794_s23, %s5785_s22  ;;  %s4083_s24 = scalar_lea.hbm %s5849_s8, 5120 }
 0x574   : > { %p4080_p7 = scmp.ne.s32.totalorder %s5794_s23, %s4079_s18  ;;  %p4084_p10 = scmp.lt.u32.totalorder %s5794_s23, %s5849_s8 }
 0x575   : > { %p4085_p11 = scmp.lt.u32.totalorder %s4083_s24, %s4079_s18  ;;  %p4087_p0 = scmp.lt.u32.totalorder %s4079_s18, %s5794_s23 }
 0x576   : > { %p4081_p8 = pnand %p4080_p7, %p3324_p12 }
 0x577   : > { %p4086_p13 = por %p4085_p11, %p4084_p10 }
 0x578   : > { %p4082_p9 = pneg %p4081_p8 }
 0x579   : > { %p4088_p1 = por %p4087_p0, %p4086_p13 }
 0x57b   : > { %p4089_p2 = pnand %p4088_p1, %p4082_p9 }
 0x57d   : > { %4092 = shalt.err (!%p4089_p2)
}
 0x57e   : > { %s4130_s15 = smov 128   ;;  %s4131_s26 = smov 8  }
 0x57f   : > { %3121 = dma.vmem_to_hbm [thread:$0]  (%p3324_p12), %s5797_s19, %s5785_s22, %s5794_s23, %s5780_s21, %s4130_s15, %s4130_s15, %s4131_s26  }
 0x580 PF: > { %p3690_p3 = scmp.ge.s32.totalorder %s4127_s30, 2  ;;  %s3130_s10 = sand.u32 1, %s4115_s27  }
 0x581   : > { %s3131_s13 = scalar_lea.sflag [#allocation3], %s3130_s10 }
 0x582   : > { %p3687_p4 = pnand %p3690_p3, %p4219_p6 }
 0x584   : > { %4110 = dma.done.wait (!%p3687_p4), %s3131_s13, 4096  }
 0x585   : > { %4112 = vsyncadd (!%p3687_p4), %s3131_s13, 4294963200  ;;  %p18_p5 = scmp.ge.s32.totalorder %s4202_s11, 4   ;;  %s6008_s27 = smov %s4119_s28 }
 0x586   : > { %s6009_s28 = smov %s4123_s29  ;;  %s6010_s29 = smov %s4213_s14 }
 0x587   : > { %s6011_s30 = smov %s4202_s11  ;;  %20 = sbr.rel (!%p18_p5) target bundleno = 3 (0x3), region = 90 }
 0x58e   :  { %3136 = vsyncpa [#allocation3], 1 }
 0x58f   :  { %3138 = vsyncpa [#allocation3 + $0x1], 1 }

</bundles_post_ra>
